<compile_context>
chip_gen: v6e
topology: v6e:2x2x1
jax: 0.10.0
libtpu: 0.0.40
codegen_flags: <defaults>
</compile_context>

<pallas_src>
import math

import jax
import jax.numpy as jnp
from jax import lax
from jax.experimental import pallas as pl
from jax.experimental.pallas import tpu as pltpu

F32 = jnp.float32
SELU_ALPHA = 1.6732632423543772848170429916717
SELU_SCALE = 1.0507009873554804934193349852946
BN_EPS = 1e-5
BN_FOLD_SCALE = 1.0 / math.sqrt(1.0 + BN_EPS)   # eval-mode BN with default stats


def _selu(x):
    return SELU_SCALE * jnp.where(
        x > 0, x, SELU_ALPHA * (jnp.exp(jnp.minimum(x, 0.0)) - 1.0))


def _has_bf16_vpu():
    """True on TPU generations with bf16 VALU/EUP (v6e, v7x)."""
    try:
        kind = jax.devices()[0].device_kind.lower()
    except Exception:
        return True
    return ("v6" in kind) or ("v7" in kind)


# ----------------------------------------------------------------------------
# fused GraphAttentionLayer kernel (B_TILE batch elements per grid step)
# ----------------------------------------------------------------------------
def _make_gat_kernel(n_valid, compute_dtype, cast_pairwise):
    def kernel(x_ref, apw_ref, apb_ref, aw_ref, pw_ref, pb_ref, o_ref):
        x = x_ref[...]                                   # (BT, Np, D) f32
        BT, Np, D = x.shape
        O = o_ref.shape[-1]

        x_cd = x.astype(compute_dtype)                   # MXU-operand copy of x
        # v6e/v7x: do the pairwise product in bf16 (bf16 VALU, half the vregs);
        # v5e: keep elementwise math in f32, cast only at the matmuls.
        x_pair = x_cd if cast_pairwise else x

        # pairwise node products, flattened with 8-aligned sublanes (Np % 8 == 0
        # is guaranteed by the wrapper -> this reshape is a free relabel).
        pair = (x_pair[:, :, None, :] * x_pair[:, None, :, :]
                ).reshape(BT * Np * Np, D)

        # attention logits: tanh(att_proj(x_i * x_j)) . (att_weight / temp)
        att = jnp.dot(pair.astype(compute_dtype), apw_ref[...],
                      preferred_element_type=jnp.float32)      # (BT*Np*Np, O)
        att = jnp.tanh(att + apb_ref[0]).reshape(BT, Np, Np, O)
        # lane reduction runs on the XLU (free slot next to MXU/VALU work);
        # 1/temperature is already folded into aw by the wrapper.
        scores = jnp.sum(att * aw_ref[0], axis=-1)             # (BT, Np, Np)

        if Np != n_valid:                                      # mask padded j
            j = lax.broadcasted_iota(jnp.int32, (1, 1, Np), 2)
            scores = jnp.where(j < n_valid, scores, -1e30)

        # softmax over j  (== F.softmax(dim=-2) on torch's (B,N,N,1) tensor);
        # reciprocal on the EUP slot instead of a VALU divide.
        m = jnp.max(scores, axis=-1, keepdims=True)
        e = jnp.exp(scores - m)
        denom = jnp.sum(e, axis=-1, keepdims=True)
        att_map = e * pl.reciprocal(denom, approx=True)        # (BT, Np, Np)

        # aggregation + fused projection (single concat-K matmul, K = 2*D).
        agg = jnp.einsum("bij,bjd->bid", att_map.astype(compute_dtype), x_cd,
                         preferred_element_type=jnp.float32)   # (BT, Np, D)
        cat = jnp.concatenate([agg.astype(compute_dtype), x_cd], axis=-1)
        y = jnp.dot(cat.reshape(BT * Np, 2 * D), pw_ref[...],
                    preferred_element_type=jnp.float32) + pb_ref[0]

        # eval-mode BatchNorm is folded into pw/pb -> SELU epilogue only.
        o_ref[...] = _selu(y).reshape(BT, Np, O)

    return kernel


def graph_attention_layer(x, params, temperature=1.0,
                          compute_dtype=jnp.bfloat16,
                          cast_pairwise=None, b_tile=None):
    """x: (B, N, D) -> (B, N, O).  Entire layer is one pallas_call."""
    x = x.astype(F32)
    B, N, D = x.shape
    O = params["att_proj_w"].shape[1]

    if cast_pairwise is None:
        cast_pairwise = _has_bf16_vpu()

    # --- node-axis padding to a multiple of 8 (sublane-aligned reshapes) ------
    Np = max(8, pl.cdiv(N, 8) * 8)

    # --- batch tiling: >=2 grid steps when B >= 2 (v7x has 2 TCs), capped so
    #     the pair/att intermediates stay far below the scoped-VMEM limit ------
    if b_tile is None:
        n_steps = 2 if B >= 2 else 1
        b_tile = pl.cdiv(B, n_steps)
        per_b = Np * Np * (D * jnp.dtype(compute_dtype).itemsize + O * 4)
        b_tile = max(1, min(b_tile, (8 << 20) // max(per_b, 1)))
    B_pad = pl.cdiv(B, b_tile) * b_tile
    grid = (B_pad // b_tile,)

    xp = jnp.pad(x, ((0, B_pad - B), (0, Np - N), (0, 0)))

    # --- parameter prep: fold 1/temp into att_weight, eval-BN into proj -------
    inv_temp = 1.0 / float(temperature)
    apw = params["att_proj_w"].astype(compute_dtype)                     # (D, O)
    apb = params["att_proj_b"].reshape(1, O).astype(F32)
    aw = (params["att_weight"].reshape(1, O) * inv_temp).astype(F32)
    bn_s = params["bn_scale"].reshape(1, O).astype(F32)
    bn_t = params["bn_shift"].reshape(1, O).astype(F32)
    proj_w = jnp.concatenate(
        [params["proj_with_att_w"], params["proj_without_att_w"]], axis=0)
    proj_w = (proj_w * bn_s).astype(compute_dtype)                       # (2D, O)
    proj_b = ((params["proj_with_att_b"] + params["proj_without_att_b"]
               ).reshape(1, O) * bn_s + bn_t).astype(F32)

    rep = lambda shape: pl.BlockSpec(shape, lambda b: (0,) * len(shape))
    kernel = _make_gat_kernel(N, compute_dtype, cast_pairwise)

    out = pl.pallas_call(
        kernel,
        out_shape=jax.ShapeDtypeStruct((B_pad, Np, O), F32),
        grid=grid,
        in_specs=[pl.BlockSpec((b_tile, Np, D), lambda b: (b, 0, 0)),
                  rep((D, O)), rep((1, O)), rep((1, O)),
                  rep((2 * D, O)), rep((1, O))],
        out_specs=pl.BlockSpec((b_tile, Np, O), lambda b: (b, 0, 0)),
        compiler_params=pltpu.CompilerParams(
            dimension_semantics=("parallel",)),
    )(xp, apw, apb, aw, proj_w, proj_b)
    return out[:B, :N, :]


# ----------------------------------------------------------------------------
# pure-JAX reference (mirrors the PyTorch forward in eval mode)
# ----------------------------------------------------------------------------
def gat_reference(x, params, temperature):
    pair = x[:, :, None, :] * x[:, None, :, :]                    # (B,N,N,D)
    att = jnp.tanh(jnp.einsum("bijd,do->bijo", pair, params["att_proj_w"])
                   + params["att_proj_b"])
    scores = jnp.einsum("bijo,ok->bijk", att, params["att_weight"]) / temperature
    att_map = jax.nn.softmax(scores, axis=-2)[..., 0]              # softmax over j
    agg = jnp.einsum("bij,bjd->bid", att_map, x)
    y = (jnp.einsum("bid,do->bio", agg, params["proj_with_att_w"])
         + params["proj_with_att_b"]
         + jnp.einsum("bid,do->bio", x, params["proj_without_att_w"])
         + params["proj_without_att_b"])
    y = y * params["bn_scale"] + params["bn_shift"]
    return jax.nn.selu(y)


# ----------------------------------------------------------------------------
# deterministic parameter construction (shapes per GraphAttentionLayer.__init__)
# ----------------------------------------------------------------------------
def build_params(key, in_dim, out_dim):
    ks = jax.random.split(key, 4)

    def linear_init(k, din, dout):
        kw, kb = jax.random.split(k)
        lim = 1.0 / math.sqrt(din)
        w = jax.random.uniform(kw, (din, dout), F32, -lim, lim)
        b = jax.random.uniform(kb, (dout,), F32, -lim, lim)
        return w, b

    apw, apb = linear_init(ks[0], in_dim, out_dim)
    pww, pwb = linear_init(ks[1], in_dim, out_dim)
    poww, powb = linear_init(ks[2], in_dim, out_dim)
    # xavier_normal_ for att_weight (out_dim, 1)
    aw_std = math.sqrt(2.0 / (out_dim + 1))
    att_w = aw_std * jax.random.normal(ks[3], (out_dim, 1), F32)

    return dict(
        att_proj_w=apw, att_proj_b=apb,
        att_weight=att_w,
        proj_with_att_w=pww, proj_with_att_b=pwb,
        proj_without_att_w=poww, proj_without_att_b=powb,
        bn_scale=jnp.full((out_dim,), BN_FOLD_SCALE, F32),
        bn_shift=jnp.zeros((out_dim,), F32),
    )


# ----------------------------------------------------------------------------
if __name__ == "__main__":
    B, N, IN_DIM, OUT_DIM = 8, 12, 64, 64
    TEMP = 2.0

    root = jax.random.PRNGKey(0)
    k_params, k_x = jax.random.split(root)
    params = build_params(k_params, IN_DIM, OUT_DIM)
    x = jax.random.normal(k_x, (B, N, IN_DIM), F32)

    ref = gat_reference(x, params, TEMP)

    # exact-dtype path (f32 MXU operands)
    out_f32 = jax.block_until_ready(
        graph_attention_layer(x, params, temperature=TEMP,
                              compute_dtype=jnp.float32))
    err_f32 = float(jnp.max(jnp.abs(out_f32 - ref)))
    assert out_f32.shape == (B, N, OUT_DIM) and out_f32.dtype == F32
    assert err_f32 < 1e-2, f"f32 path mismatch vs reference: {err_f32}"

    # default fast path (bf16 MXU operands, f32 accumulation)
    out_fast = jax.block_until_ready(
        graph_attention_layer(x, params, temperature=TEMP))
    err_fast = float(jnp.max(jnp.abs(out_fast - ref)))
    assert out_fast.shape == (B, N, OUT_DIM) and out_fast.dtype == F32
    assert err_fast < 5e-2, f"bf16 path mismatch vs reference: {err_fast}"

    print("KERNEL_OK")
</pallas_src>

<mosaic_0001>
module attributes {stable_mosaic.version = 11 : i64} {
  func.func @kernel(%arg0: i32, %arg1: memref<4x16x64xf32, #tpu.memory_space<vmem>>, %arg2: memref<64x64xf32, #tpu.memory_space<vmem>>, %arg3: memref<1x64xf32, #tpu.memory_space<vmem>>, %arg4: memref<1x64xf32, #tpu.memory_space<vmem>>, %arg5: memref<128x64xf32, #tpu.memory_space<vmem>>, %arg6: memref<1x64xf32, #tpu.memory_space<vmem>>, %arg7: memref<4x16x64xf32, #tpu.memory_space<vmem>>) attributes {dimension_semantics = [#tpu.dimension_semantics<parallel>], iteration_bounds = array<i64: 2>, scalar_prefetch = 0 : i64, scratch_operands = 0 : i64, tpu.core_type = #tpu.core_type<tc>, window_params = [{transform_indices = @transform_0, window_bounds = array<i64: 4, 16, 64>}, {pipeline_mode = #tpu.pipeline_mode<synchronous>, transform_indices = @transform_1, window_bounds = array<i64: 64, 64>}, {pipeline_mode = #tpu.pipeline_mode<synchronous>, transform_indices = @transform_2, window_bounds = array<i64: 1, 64>}, {pipeline_mode = #tpu.pipeline_mode<synchronous>, transform_indices = @transform_3, window_bounds = array<i64: 1, 64>}, {pipeline_mode = #tpu.pipeline_mode<synchronous>, transform_indices = @transform_4, window_bounds = array<i64: 128, 64>}, {pipeline_mode = #tpu.pipeline_mode<synchronous>, transform_indices = @transform_5, window_bounds = array<i64: 1, 64>}, {transform_indices = @transform_6, window_bounds = array<i64: 4, 16, 64>}]} {
    %c0 = arith.constant 0 : index
    %c0_0 = arith.constant 0 : index
    %c0_1 = arith.constant 0 : index
    %0 = vector.load %arg1[%c0, %c0_0, %c0_1] : memref<4x16x64xf32, #tpu.memory_space<vmem>>, vector<4x16x64xf32>
    %1 = vector.shape_cast %0 : vector<4x16x64xf32> to vector<4x16x1x64xf32>
    %2 = vector.shape_cast %0 : vector<4x16x64xf32> to vector<4x1x16x64xf32>
    %3 = vector.broadcast %1 : vector<4x16x1x64xf32> to vector<4x16x16x64xf32>
    %4 = vector.broadcast %2 : vector<4x1x16x64xf32> to vector<4x16x16x64xf32>
    %5 = arith.mulf %3, %4 : vector<4x16x16x64xf32>
    %6 = vector.shape_cast %5 : vector<4x16x16x64xf32> to vector<1024x64xf32>
    %c0_2 = arith.constant 0 : index
    %c0_3 = arith.constant 0 : index
    %7 = vector.load %arg2[%c0_2, %c0_3] : memref<64x64xf32, #tpu.memory_space<vmem>>, vector<64x64xf32>
    %cst = arith.constant dense<0.000000e+00> : vector<1024x64xf32>
    %8 = tpu.matmul %6, %7, %cst {dimension_numbers = #tpu.dot_dimension_numbers<[1], [0], [0], [1], [0, 0, 1, 1], [], []>} : vector<1024x64xf32>, vector<64x64xf32>, vector<1024x64xf32> -> vector<1024x64xf32>
    %c0_4 = arith.constant 0 : index
    %c0_5 = arith.constant 0 : index
    %9 = vector.load %arg3[%c0_4, %c0_5] : memref<1x64xf32, #tpu.memory_space<vmem>>, vector<1x64xf32>
    %10 = vector.shape_cast %9 : vector<1x64xf32> to vector<64xf32>
    %11 = vector.shape_cast %10 : vector<64xf32> to vector<1x64xf32>
    %12 = vector.broadcast %11 : vector<1x64xf32> to vector<1024x64xf32>
    %13 = arith.addf %8, %12 : vector<1024x64xf32>
    %14 = math.tanh %13 : vector<1024x64xf32>
    %15 = vector.shape_cast %14 : vector<1024x64xf32> to vector<4x16x16x64xf32>
    %c0_6 = arith.constant 0 : index
    %c0_7 = arith.constant 0 : index
    %16 = vector.load %arg4[%c0_6, %c0_7] : memref<1x64xf32, #tpu.memory_space<vmem>>, vector<1x64xf32>
    %17 = vector.shape_cast %16 : vector<1x64xf32> to vector<64xf32>
    %18 = vector.shape_cast %17 : vector<64xf32> to vector<1x1x1x64xf32>
    %19 = vector.broadcast %18 : vector<1x1x1x64xf32> to vector<4x16x16x64xf32>
    %20 = arith.mulf %15, %19 : vector<4x16x16x64xf32>
    %cst_8 = arith.constant dense<0.000000e+00> : vector<4x16x16xf32>
    %21 = vector.multi_reduction <add>, %20, %cst_8 [3] : vector<4x16x16x64xf32> to vector<4x16x16xf32>
    %22 = tpu.iota {dimensions = array<i32: 2>} : vector<1x1x16xi32>
    %c12_i32 = arith.constant 12 : i32
    %23 = vector.broadcast %c12_i32 : i32 to vector<1x1x16xi32>
    %24 = arith.cmpi slt, %22, %23 : vector<1x1x16xi32>
    %cst_9 = arith.constant -1.000000e+30 : f32
    %25 = vector.shape_cast %24 : vector<1x1x16xi1> to vector<1x1x16xi1>
    %26 = vector.broadcast %25 : vector<1x1x16xi1> to vector<4x16x16xi1>
    %27 = vector.broadcast %cst_9 : f32 to vector<4x16x16xf32>
    %28 = arith.select %26, %21, %27 : vector<4x16x16xi1>, vector<4x16x16xf32>
    %cst_10 = arith.constant dense<0xFF800000> : vector<4x16xf32>
    %29 = vector.multi_reduction <maximumf>, %28, %cst_10 [2] : vector<4x16x16xf32> to vector<4x16xf32>
    %30 = vector.shape_cast %29 : vector<4x16xf32> to vector<4x16x1xf32>
    %31 = vector.broadcast %30 : vector<4x16x1xf32> to vector<4x16x16xf32>
    %32 = arith.subf %28, %31 : vector<4x16x16xf32>
    %33 = math.exp %32 : vector<4x16x16xf32>
    %cst_11 = arith.constant dense<0.000000e+00> : vector<4x16xf32>
    %34 = vector.multi_reduction <add>, %33, %cst_11 [2] : vector<4x16x16xf32> to vector<4x16xf32>
    %35 = vector.shape_cast %34 : vector<4x16xf32> to vector<4x16x1xf32>
    %36 = tpu.reciprocal %35 {approx = true} : vector<4x16x1xf32> -> vector<4x16x1xf32>
    %37 = vector.broadcast %36 : vector<4x16x1xf32> to vector<4x16x16xf32>
    %38 = arith.mulf %33, %37 : vector<4x16x16xf32>
    "tpu.trace_start"() <{level = 10 : i32, message = "bij,bjd->bid"}> : () -> ()
    %cst_12 = arith.constant dense<0.000000e+00> : vector<4x16x64xf32>
    %39 = tpu.matmul %38, %0, %cst_12 {dimension_numbers = #tpu.dot_dimension_numbers<[2], [1], [1], [2], [0, 0, 0, 1, 1, 2], [0], [0]>} : vector<4x16x16xf32>, vector<4x16x64xf32>, vector<4x16x64xf32> -> vector<4x16x64xf32>
    "tpu.trace_stop"() : () -> ()
    %40 = tpu.concatenate %39, %0 in 2 : vector<4x16x64xf32>, vector<4x16x64xf32> -> vector<4x16x128xf32>
    %41 = vector.shape_cast %40 : vector<4x16x128xf32> to vector<64x128xf32>
    %c0_13 = arith.constant 0 : index
    %c0_14 = arith.constant 0 : index
    %42 = vector.load %arg5[%c0_13, %c0_14] : memref<128x64xf32, #tpu.memory_space<vmem>>, vector<128x64xf32>
    %cst_15 = arith.constant dense<0.000000e+00> : vector<64x64xf32>
    %43 = tpu.matmul %41, %42, %cst_15 {dimension_numbers = #tpu.dot_dimension_numbers<[1], [0], [0], [1], [0, 0, 1, 1], [], []>} : vector<64x128xf32>, vector<128x64xf32>, vector<64x64xf32> -> vector<64x64xf32>
    %c0_16 = arith.constant 0 : index
    %c0_17 = arith.constant 0 : index
    %44 = vector.load %arg6[%c0_16, %c0_17] : memref<1x64xf32, #tpu.memory_space<vmem>>, vector<1x64xf32>
    %45 = vector.shape_cast %44 : vector<1x64xf32> to vector<64xf32>
    %46 = vector.shape_cast %45 : vector<64xf32> to vector<1x64xf32>
    %47 = vector.broadcast %46 : vector<1x64xf32> to vector<64x64xf32>
    %48 = arith.addf %43, %47 : vector<64x64xf32>
    %cst_18 = arith.constant 0.000000e+00 : f32
    %49 = vector.broadcast %cst_18 : f32 to vector<64x64xf32>
    %50 = arith.cmpf ogt, %48, %49 : vector<64x64xf32>
    %cst_19 = arith.constant 0.000000e+00 : f32
    %51 = vector.broadcast %cst_19 : f32 to vector<64x64xf32>
    %52 = arith.minimumf %48, %51 : vector<64x64xf32>
    %53 = math.exp %52 : vector<64x64xf32>
    %cst_20 = arith.constant 1.000000e+00 : f32
    %54 = vector.broadcast %cst_20 : f32 to vector<64x64xf32>
    %55 = arith.subf %53, %54 : vector<64x64xf32>
    %cst_21 = arith.constant 1.67326319 : f32
    %56 = vector.broadcast %cst_21 : f32 to vector<64x64xf32>
    %57 = arith.mulf %56, %55 : vector<64x64xf32>
    %58 = arith.select %50, %48, %57 : vector<64x64xi1>, vector<64x64xf32>
    %cst_22 = arith.constant 1.05070102 : f32
    %59 = vector.broadcast %cst_22 : f32 to vector<64x64xf32>
    %60 = arith.mulf %59, %58 : vector<64x64xf32>
    %61 = vector.shape_cast %60 : vector<64x64xf32> to vector<4x16x64xf32>
    %c0_23 = arith.constant 0 : index
    %c0_24 = arith.constant 0 : index
    %c0_25 = arith.constant 0 : index
    %62 = vector.load %arg7[%c0_23, %c0_24, %c0_25] : memref<4x16x64xf32, #tpu.memory_space<vmem>>, vector<4x16x64xf32>
    tpu.vector_store %arg7[%c0_23, %c0_24, %c0_25], %61 {strides = array<i32>} : memref<4x16x64xf32, #tpu.memory_space<vmem>>, vector<4x16x64xf32>,
    return
  }
  func.func @transform_0(%arg0: i32) -> (i32, i32, i32) {
    %c0_i32 = arith.constant 0 : i32
    %c0_i32_0 = arith.constant 0 : i32
    %c0_i32_1 = arith.constant 0 : i32
    return %arg0, %c0_i32, %c0_i32_0 : i32, i32, i32
  }
  func.func @transform_1(%arg0: i32) -> (i32, i32) {
    %c0_i32 = arith.constant 0 : i32
    %c0_i32_0 = arith.constant 0 : i32
    %c0_i32_1 = arith.constant 0 : i32
    return %c0_i32, %c0_i32_0 : i32, i32
  }
  func.func @transform_2(%arg0: i32) -> (i32, i32) {
    %c0_i32 = arith.constant 0 : i32
    %c0_i32_0 = arith.constant 0 : i32
    %c0_i32_1 = arith.constant 0 : i32
    return %c0_i32, %c0_i32_0 : i32, i32
  }
  func.func @transform_3(%arg0: i32) -> (i32, i32) {
    %c0_i32 = arith.constant 0 : i32
    %c0_i32_0 = arith.constant 0 : i32
    %c0_i32_1 = arith.constant 0 : i32
    return %c0_i32, %c0_i32_0 : i32, i32
  }
  func.func @transform_4(%arg0: i32) -> (i32, i32) {
    %c0_i32 = arith.constant 0 : i32
    %c0_i32_0 = arith.constant 0 : i32
    %c0_i32_1 = arith.constant 0 : i32
    return %c0_i32, %c0_i32_0 : i32, i32
  }
  func.func @transform_5(%arg0: i32) -> (i32, i32) {
    %c0_i32 = arith.constant 0 : i32
    %c0_i32_0 = arith.constant 0 : i32
    %c0_i32_1 = arith.constant 0 : i32
    return %c0_i32, %c0_i32_0 : i32, i32
  }
  func.func @transform_6(%arg0: i32) -> (i32, i32, i32) {
    %c0_i32 = arith.constant 0 : i32
    %c0_i32_0 = arith.constant 0 : i32
    %c0_i32_1 = arith.constant 0 : i32
    return %arg0, %c0_i32, %c0_i32_0 : i32, i32, i32
  }
}

</mosaic_0001>

<bundles_post_ra>
// kernel: tpu_custom_call.1
= control target key start
LH: loop header
LB: loop body
LE: loop exit
PB: predicated region body
PF: predicated region fallthrough
CT: control target
= control target key end

     0   :  { %11 = vsyncpa [#allocation3], 0  ;;  %s7184_s0 = inlined_call_operand.vmem [shape: f32[8,16,64], index: 0, kind: input, shape index: {}]   ;;  %s7185_s1 = inlined_call_operand.vmem [shape: f32[64,64], index: 1, kind: input, shape index: {}]   ;;  %s7186_s2 = inlined_call_operand.vmem [shape: f32[1,64], index: 2, kind: input, shape index: {}]   ;;  %s7187_s3 = inlined_call_operand.vmem [shape: f32[1,64], index: 3, kind: input, shape index: {}]   ;;  %s7188_s4 = inlined_call_operand.vmem [shape: f32[128,64], index: 4, kind: input, shape index: {}]   ;;  %s7189_s5 = inlined_call_operand.vmem [shape: f32[1,64], index: 5, kind: input, shape index: {}]   ;;  %s7190_s6 = inlined_call_operand.hbm [shape: f32[8,16,64], index: 6, kind: output, shape index: {}]  }
   0x1   :  { %13 = vsyncpa [#allocation3 + $0x1], 0  ;;  %s5499_s21 = smov 0   ;;  %s5501_s22 = smov 0  }
   0x2   :  { %s5503_s23 = smov 0   ;;  %s5505_s24 = smov 0  }
   0x3 LB: > { %s5520_s25 = sadd.s32 4294967295, %s5457_s24   ;;  %s4376_s26 = sadd.s32 4294967294, %s5457_s24   ;;  %s5457_s24 = sphi %s5505_s24, %s7196_s24   ;;  %s5453_s23 = sphi %s5503_s23, %s7195_s23   ;;  %s5449_s22 = sphi %s5501_s22, %s7194_s22   ;;  %s5445_s21 = sphi %s5499_s21, %s7193_s21  }
   0x4   : > { %s5524_s27 = sadd.s32 1, %s5457_s24   ;;  %s157_s28 = sadd.s32 1, %s5453_s23 }
   0x5   : > { %s154_s29 = ssub.s32 %s5457_s24, %s5524_s27  ;;  %p167_p0 = scmp.ne.s32.totalorder %s5453_s23, %s5449_s22 }
   0x6   : > { %p155_p1 = scmp.eq.s32.totalorder %s154_s29, 0  ;;  %p168_p2 = scmp.eq.s32.totalorder %s5520_s25, 1 }
   0x7   : > { %p173_p3 = scmp.ne.s32.totalorder %s5449_s22, %s5445_s21  ;;  %p174_p4 = scmp.eq.s32.totalorder %s4376_s26, 1 }
   0x8   : > { %s5535_s30 = scalar_select %p155_p1, %s5453_s23, %s157_s28  }
   0x9   : > { %p5537_p5 = por %p168_p2, %p167_p0  ;;  %p5541_p6 = por %p174_p4, %p173_p3 }
   0xa   : > { %p4379_p7 = scmp.ge.s32.totalorder %s5457_s24, 1  ;;  %p217_p8 = scmp.lt.s32.totalorder %s5457_s24, 3 }
   0xc   : > { %p218_p9 = pnand %p4379_p7, %p217_p8 }
   0xd   : > { %s4381_s13 = sshll.u32 (!%p218_p9), %s5520_s25, 2  ;;  %s5460_s9 = smov (!%p218_p9), 64  }
   0xe   : > { %221 = sbr.rel (%p218_p9) target bundleno = 1390 (0x56e), region = 44  ;;  %p249_p10 = scmp.lt.s32.totalorder (!%p218_p9), %s4381_s13, 7 }
   0xf   : > { %s4539_s16 = sshll.u32 (!%p218_p9), %s5520_s25, 10  ;;  %s5461_s28 = smov (!%p218_p9), [#allocation2]  }
  0x10   : > { %s7134_s20 = scalar_lea.hbm (!%p218_p9), %s7190_s6, %s4539_s16 }
  0x13   : > { %v1119_v0 = vld [vmem:[%s7185_s1 + $0x38] sm:$0xff]  ;;  %v1118_v1 = vld [vmem:[%s7185_s1 + $0x30] sm:$0xff]  ;;  %v276_v2 = vlaneseq  ;;  %v5459_v3 = vmov 1966171168   ;;  %v1117_v5 = vld [vmem:[%s7185_s1 + $0x28] sm:$0xff]  ;;  %s7198_s13 = smov (!%p249_p10, %s4381_s13), 7 }
  0x14   : > { %4716 = vmatprep.subr.mxu0 %v1119_v0  ;;  %4996 = vmatprep.subr.mxu1 %v1119_v0  ;;  %v274_v4 = vunpack.c.l.s4 %v5459_v3  ;;  %v1116_v8 = vld [vmem:[%s7185_s1 + $0x20] sm:$0xff]  ;;  %s4537_s18 = sshll.u32 %s7198_s13, 4  ;;  %v1115_v10 = vld [vmem:[%s7185_s1 + $0x18] sm:$0xff]  ;;  %v1114_v12 = vld [vmem:[%s7185_s1 + $0x10] sm:$0xff]  ;;  %vm1127_vm0 = vcmask 523264   ;;  %vm3006_vm1 = vcmask 130112  }
  0x15   : > { %4717 = vmatpush3.msra.mxu0 %v1119_v0  ;;  %5004 = vmatpush3.msra.mxu1 %v1119_v0  ;;  %v5558_v6 = vshrl.u32 %v276_v2, 7  ;;  %s5572_s29 = scalar_lea.vmem %s7184_s0, %s4537_s18  ;;  %v1113_v18 = vld [vmem:[%s7185_s1 + $0x8] sm:$0xff]  ;;  %v1112_v26 = vld [vmem:[%s7185_s1] sm:$0xff]  ;;  %vm3575_vm2 = vcmask 1041409   ;;  %vm3577_vm3 = vcmask 1042434   ;;  %vm3579_vm4 = vcmask 1043459  }
  0x16   : > { %4718 = vmatprep.subr.mxu0 %v1118_v1  ;;  %4997 = vmatprep.subr.mxu1 %v1118_v1  ;;  %v275_v7 = vunpack.c.0.s8 %v274_v4  ;;  %v5575_v11 = vld [vmem:[%s5572_s29] sm:$0xff]  ;;  %v5586_v15 = vld [vmem:[%s5572_s29 + $0x28] sm:$0xff]  ;;  %vm3581_vm5 = vcmask 1044484   ;;  %vm3583_vm6 = vcmask 1045509   ;;  %vm3585_vm7 = vcmask 1046534   ;;  %s245_s13 = sand.u32 1, %s5449_s22  }
  0x17   : > { %4719 = vmatpush3.msra.mxu0 %v1118_v1  ;;  %5005 = vmatpush3.msra.mxu1 %v1118_v1  ;;  %v5583_v14 = vsub.s32 0, %v5558_v6  ;;  %v272_v16 = vcombine.high %v5575_v11, %v5575_v11  ;;  %v517_v21 = vcombine.high %v5586_v15, %v5586_v15  ;;  %v5599_v22 = vld [vmem:[%s5572_s29 + $0x8] sm:$0xff]  ;;  %v5608_v29 = vld [vmem:[%s5572_s29 + $0x20] sm:$0xff]  ;;  %vm3587_vm8 = vcmask 1047559   ;;  %s4380_s14 = sshll.u32 %s245_s13, 6  ;;  %s7144_s25 = scalar_lea.sflag [#allocation3], %s245_s13 }
  0x18   : > { %4720 = vmatprep.subr.mxu0 %v1117_v5  ;;  %4998 = vmatprep.subr.mxu1 %v1117_v5  ;;  %v5564_v9 = vsub.s32 %v275_v7, %v5558_v6  ;;  %vm3654_vm10 = vcmask 130048   ;;  %s7109_s15 = scalar_lea.vmem [#allocation2], %s4380_s14 }
  0x19   : > { %4721 = vmatpush3.msra.mxu0 %v1117_v5  ;;  %5006 = vmatpush3.msra.mxu1 %v1117_v5  ;;  %s4314_s17 = sshll.u32 %s7109_s15, 4  ;;  %s7136_s17 = int_to_ptr.vmem [resolvable:$true] %s4314_s17 }
  0x1a   : > { %4722 = vmatprep.subr.mxu0 %v1116_v8  ;;  %4999 = vmatprep.subr.mxu1 %v1116_v8  ;;  %v279_v13 = vrot.slane %v5575_v11, %v5564_v9  ;;  %v524_v17 = vrot.slane %v5586_v15, %v5564_v9  ;;  %v286_v25 = vrot.slane %v272_v16, %v5564_v9  ;;  %v5668_v16 = vld [vmem:[%s5572_s29 + $0x18] sm:$0xff]  ;;  %s5397_s26 = scalar_lea.vmem %s7136_s17, 1024 }
  0x1b   : > { %4723 = vmatpush3.msra.mxu0 %v1116_v8  ;;  %5007 = vmatpush3.msra.mxu1 %v1116_v8  ;;  %v531_v42 = vrot.slane %v517_v21, %v5564_v9  ;;  %v5660_v8 = vld [vmem:[%s5572_s29 + $0x30] sm:$0xff]  ;;  %p5398_p11 = scmp.ne.s32.totalorder %s7136_s17, %s5397_s26 }
  0x1c   : > { %4724 = vmatprep.subr.mxu0 %v1115_v10  ;;  %5000 = vmatprep.subr.mxu1 %v1115_v10  ;;  %v287_v19 = vcombine.high %v279_v13, %v279_v13  ;;  %v295_v20 = vrot.slane %v279_v13, %v5564_v9  ;;  %v532_v23 = vcombine.high %v524_v17, %v524_v17 }
  0x1d   : > { %4725 = vmatpush3.msra.mxu0 %v1115_v10  ;;  %5008 = vmatpush3.msra.mxu1 %v1115_v10  ;;  %v540_v24 = vrot.slane %v524_v17, %v5564_v9  ;;  %v302_v52 = vrot.slane %v286_v25, %v5564_v9  ;;  %v547_v53 = vrot.slane %v531_v42, %v5564_v9  ;;  %p5399_p12 = pnand %p5398_p11, %p5537_p5 }
  0x1e   : > { %4726 = vmatprep.subr.mxu0 %v1114_v12  ;;  %5001 = vmatprep.subr.mxu1 %v1114_v12  ;;  %v317_v27 = vcombine.high %v295_v20, %v295_v20  ;;  %v667_v28 = vrot.slane %v295_v20, %v5583_v14  ;;  %v309_v30 = vrot.slane %v287_v19, %v5564_v9 }
  0x1f   : > { %4727 = vmatpush3.msra.mxu0 %v1114_v12  ;;  %5009 = vmatpush3.msra.mxu1 %v1114_v12  ;;  %v562_v31 = vcombine.high %v540_v24, %v540_v24  ;;  %v827_v32 = vrot.slane %v540_v24, %v5583_v14  ;;  %v554_v33 = vrot.slane %v532_v23, %v5564_v9  ;;  %p5400_p13 = pneg %p5399_p12 }
  0x20   : > { %4728 = vmatprep.subr.mxu0 %v1113_v18  ;;  %5002 = vmatprep.subr.mxu1 %v1113_v18  ;;  %v984_v34 = vmul.f32 %v667_v28, %v5575_v11  ;;  %v985_v35 = vmul.f32 %v667_v28, %v5599_v22  ;;  %v671_v36 = vrot.slane %v309_v30, %v5583_v14 }
  0x21   : > { %4729 = vmatpush3.msra.mxu0 %v1113_v18  ;;  %5010 = vmatpush3.msra.mxu1 %v1113_v18  ;;  %v1064_v37 = vmul.f32 %v827_v32, %v5608_v29  ;;  %v1065_v38 = vmul.f32 %v827_v32, %v5586_v15  ;;  %v831_v39 = vrot.slane %v554_v33, %v5583_v14 }
  0x22   : > { %4730 = vmatprep.subr.mxu0 %v1112_v26  ;;  %5003 = vmatprep.subr.mxu1 %v1112_v26  ;;  %v986_v40 = vmul.f32 %v671_v36, %v5575_v11  ;;  %v675_v41 = vrot.slane %v317_v27, %v5583_v14  ;;  %v835_v44 = vrot.slane %v562_v31, %v5583_v14 }
  0x23   : > { %4731 = vmatpush3.msra.mxu0 %v1112_v26  ;;  %5011 = vmatpush3.msra.mxu1 %v1112_v26  ;;  %v1066_v43 = vmul.f32 %v831_v39, %v5608_v29  ;;  %v987_v45 = vmul.f32 %v671_v36, %v5599_v22  ;;  %v1067_v46 = vmul.f32 %v831_v39, %v5586_v15 }
  0x24   : > { %4732 = vmatprep.mubr.msk.f32.mxu0 %vm1127_vm0, %v984_v34  ;;  %4852 = vmatprep.mubr.msk.f32.mxu1 %vm1127_vm0, %v1064_v37  ;;  %v319_v47 = vcombine.high %v309_v30, %v309_v30  ;;  %v988_v48 = vmul.f32 %v675_v41, %v5575_v11  ;;  %v1068_v49 = vmul.f32 %v835_v44, %v5608_v29 }
  0x25   : > { %4733 = vmatmul.mubr.msk.f32.vlgmr.msra.gmra.mxu0 %vm1127_vm0, %v985_v35  ;;  %4853 = vmatmul.mubr.msk.f32.vlgmr.msra.gmra.mxu1 %vm1127_vm0, %v1065_v38  ;;  %v564_v50 = vcombine.high %v554_v33, %v554_v33  ;;  %v288_v54 = vcombine.high %v286_v25, %v286_v25  ;;  %v533_v56 = vcombine.high %v531_v42, %v531_v42 }
  0x26   : > { %4735 = vmatprep.mubr.msk.f32.mxu0 %vm1127_vm0, %v986_v40  ;;  %4855 = vmatprep.mubr.msk.f32.mxu1 %vm1127_vm0, %v1066_v43  ;;  %v679_v51 = vrot.slane %v319_v47, %v5583_v14  ;;  %v989_v57 = vmul.f32 %v675_v41, %v5599_v22  ;;  %v1069_v58 = vmul.f32 %v835_v44, %v5586_v15 }
  0x27   : > { %4924 = vmatprep.subr.mxu1 %v5599_v22  ;;  %v839_v55 = vrot.slane %v564_v50, %v5583_v14  ;;  %v683_v59 = vrot.slane %v302_v52, %v5583_v14  ;;  %v843_v62 = vrot.slane %v547_v53, %v5583_v14  ;;  %v316_v63 = vrot.slane %v288_v54, %v5564_v9 }
  0x28   : > { %4925 = vmatpush3.msra.mxu1 %v5599_v22  ;;  %v990_v60 = vmul.f32 %v679_v51, %v5575_v11  ;;  %v561_v0 = vrot.slane %v533_v56, %v5564_v9  ;;  %v991_v1 = vmul.f32 %v679_v51, %v5599_v22  ;;  %v318_v5 = vcombine.high %v302_v52, %v302_v52 }
  0x29   : > { %4736 = vmatmul.mubr.msk.f32.gmra.mxu0 %vm1127_vm0, %v987_v45  ;;  %4856 = vmatmul.mubr.msk.f32.gmra.mxu1 %vm1127_vm0, %v1067_v46  ;;  %v1070_v61 = vmul.f32 %v839_v55, %v5608_v29  ;;  %v1071_v3 = vmul.f32 %v839_v55, %v5586_v15  ;;  %v992_v4 = vmul.f32 %v683_v59, %v5575_v11 }
  0x2a   : > { %4738 = vmatprep.mubr.msk.f32.mxu0 %vm1127_vm0, %v988_v48  ;;  %4858 = vmatprep.mubr.msk.f32.mxu1 %vm1127_vm0, %v1068_v49  ;;  %v563_v7 = vcombine.high %v547_v53, %v547_v53  ;;  %v1072_v10 = vmul.f32 %v843_v62, %v5608_v29  ;;  %v687_v12 = vrot.slane %v316_v63, %v5583_v14  ;;  %v5716_v53 = vld [vmem:[%s5572_s29 + $0x38] sm:$0xff] }
  0x2b   : > { %4926 = vmatprep.subr.mxu1 %v5575_v11  ;;  %v847_v13 = vrot.slane %v561_v0, %v5583_v14  ;;  %v993_v17 = vmul.f32 %v683_v59, %v5599_v22  ;;  %v1073_v18 = vmul.f32 %v843_v62, %v5586_v15  ;;  %v328_v19 = vrot.slane %v5599_v22, %v5564_v9 }
  0x2c   : > { %4927 = vmatpush3.msra.mxu1 %v5575_v11  ;;  %v573_v20 = vrot.slane %v5660_v8, %v5564_v9  ;;  %v691_v21 = vrot.slane %v318_v5, %v5583_v14  ;;  %v851_v23 = vrot.slane %v563_v7, %v5583_v14  ;;  %v320_v24 = vcombine.high %v316_v63, %v316_v63 }
  0x2d   : > { %4739 = vmatmul.mubr.msk.f32.gmra.mxu0 %vm1127_vm0, %v989_v57  ;;  %4859 = vmatmul.mubr.msk.f32.gmra.mxu1 %vm1127_vm0, %v1069_v58  ;;  %v994_v25 = vmul.f32 %v687_v12, %v5575_v11  ;;  %v1074_v26 = vmul.f32 %v847_v13, %v5608_v29  ;;  %v565_v27 = vcombine.high %v561_v0, %v561_v0 }
  0x2e   : > { %4741 = vmatprep.mubr.msk.f32.mxu0 %vm1127_vm0, %v990_v60  ;;  %4861 = vmatprep.mubr.msk.f32.mxu1 %vm1127_vm0, %v1070_v61  ;;  %v995_v28 = vmul.f32 %v687_v12, %v5599_v22  ;;  %v1075_v30 = vmul.f32 %v847_v13, %v5586_v15  ;;  %v344_v31 = vrot.slane %v328_v19, %v5564_v9 }
  0x2f   : > { %4931 = vmatprep.subr.mxu1 %v5668_v16  ;;  %v589_v32 = vrot.slane %v573_v20, %v5564_v9  ;;  %v996_v33 = vmul.f32 %v691_v21, %v5575_v11  ;;  %v1076_v34 = vmul.f32 %v851_v23, %v5608_v29  ;;  %v695_v35 = vrot.slane %v320_v24, %v5583_v14 }
  0x30   : > { %v855_v36 = vrot.slane %v565_v27, %v5583_v14  ;;  %v336_v37 = vcombine.high %v328_v19, %v328_v19  ;;  %v581_v38 = vcombine.high %v573_v20, %v573_v20  ;;  %v997_v39 = vmul.f32 %v691_v21, %v5599_v22 }
  0x31   : > { %4742 = vmatmul.mubr.msk.f32.gmra.mxu0 %vm1127_vm0, %v991_v1  ;;  %4862 = vmatmul.mubr.msk.f32.gmra.mxu1 %vm1127_vm0, %v1071_v3  ;;  %v1077_v40 = vmul.f32 %v851_v23, %v5586_v15  ;;  %v998_v41 = vmul.f32 %v695_v35, %v5575_v11  ;;  %v699_v42 = vrot.slane %v344_v31, %v5583_v14 }
  0x32   : > { %4744 = vmatprep.mubr.msk.f32.mxu0 %vm1127_vm0, %v992_v4  ;;  %4864 = vmatprep.mubr.msk.f32.mxu1 %vm1127_vm0, %v1072_v10  ;;  %v859_v43 = vrot.slane %v589_v32, %v5583_v14  ;;  %v1078_v44 = vmul.f32 %v855_v36, %v5608_v29  ;;  %v358_v45 = vrot.slane %v336_v37, %v5564_v9 }
  0x33   : > { %v603_v46 = vrot.slane %v581_v38, %v5564_v9  ;;  %v999_v47 = vmul.f32 %v695_v35, %v5599_v22  ;;  %v1079_v48 = vmul.f32 %v855_v36, %v5586_v15  ;;  %v366_v49 = vcombine.high %v344_v31, %v344_v31 }
  0x34   : > { %v611_v50 = vcombine.high %v589_v32, %v589_v32  ;;  %v1000_v51 = vmul.f32 %v699_v42, %v5575_v11  ;;  %v1080_v52 = vmul.f32 %v859_v43, %v5660_v8  ;;  %v321_v54 = vcombine.high %v5599_v22, %v5599_v22 }
  0x35   : > { %4745 = vmatmul.mubr.msk.f32.gmra.mxu0 %vm1127_vm0, %v993_v17  ;;  %4865 = vmatmul.mubr.msk.f32.gmra.mxu1 %vm1127_vm0, %v1073_v18  ;;  %v703_v55 = vrot.slane %v358_v45, %v5583_v14  ;;  %v863_v56 = vrot.slane %v603_v46, %v5583_v14  ;;  %v566_v57 = vcombine.high %v5660_v8, %v5660_v8 }
  0x36   : > { %4747 = vmatprep.mubr.msk.f32.mxu0 %vm1127_vm0, %v994_v25  ;;  %4867 = vmatprep.mubr.msk.f32.mxu1 %vm1127_vm0, %v1074_v26  ;;  %v1001_v58 = vmul.f32 %v699_v42, %v5599_v22  ;;  %v1081_v59 = vmul.f32 %v859_v43, %v5716_v53  ;;  %v707_v60 = vrot.slane %v366_v49, %v5583_v14 }
  0x37   : > { %v867_v61 = vrot.slane %v611_v50, %v5583_v14  ;;  %v368_v62 = vcombine.high %v358_v45, %v358_v45  ;;  %v613_v63 = vcombine.high %v603_v46, %v603_v46  ;;  %v335_v0 = vrot.slane %v321_v54, %v5564_v9 }
  0x38   : > { %v1002_v1 = vmul.f32 %v703_v55, %v5575_v11  ;;  %v1082_v3 = vmul.f32 %v863_v56, %v5660_v8  ;;  %v580_v4 = vrot.slane %v566_v57, %v5564_v9  ;;  %v1003_v5 = vmul.f32 %v703_v55, %v5599_v22 }
  0x39   : > { %4748 = vmatmul.mubr.msk.f32.gmra.mxu0 %vm1127_vm0, %v995_v28  ;;  %4868 = vmatmul.mubr.msk.f32.gmra.mxu1 %vm1127_vm0, %v1075_v30  ;;  %v1083_v7 = vmul.f32 %v863_v56, %v5716_v53  ;;  %v1004_v10 = vmul.f32 %v707_v60, %v5575_v11  ;;  %v1084_v12 = vmul.f32 %v867_v61, %v5660_v8 }
  0x3a   : > { %4750 = vmatprep.mubr.msk.f32.mxu0 %vm1127_vm0, %v996_v33  ;;  %4870 = vmatprep.mubr.msk.f32.mxu1 %vm1127_vm0, %v1076_v34  ;;  %v711_v13 = vrot.slane %v368_v62, %v5583_v14  ;;  %v871_v17 = vrot.slane %v613_v63, %v5583_v14  ;;  %v351_v18 = vrot.slane %v335_v0, %v5564_v9 }
  0x3b   : > { %v596_v19 = vrot.slane %v580_v4, %v5564_v9  ;;  %v337_v20 = vcombine.high %v335_v0, %v335_v0  ;;  %v582_v21 = vcombine.high %v580_v4, %v580_v4  ;;  %v1005_v23 = vmul.f32 %v707_v60, %v5599_v22 }
  0x3c   : > { %v1085_v24 = vmul.f32 %v867_v61, %v5716_v53  ;;  %v1006_v25 = vmul.f32 %v711_v13, %v5575_v11  ;;  %v1086_v26 = vmul.f32 %v871_v17, %v5660_v8  ;;  %v715_v27 = vrot.slane %v351_v18, %v5583_v14 }
  0x3d   : > { %4751 = vmatmul.mubr.msk.f32.gmra.mxu0 %vm1127_vm0, %v997_v39  ;;  %4871 = vmatmul.mubr.msk.f32.gmra.mxu1 %vm1127_vm0, %v1077_v40  ;;  %v875_v28 = vrot.slane %v596_v19, %v5583_v14  ;;  %v365_v30 = vrot.slane %v337_v20, %v5564_v9  ;;  %v610_v31 = vrot.slane %v582_v21, %v5564_v9  ;;  %v5773_v40 = vld [vmem:[%s5572_s29 + $0x10] sm:$0xff] }
  0x3e   : > { %4753 = vmatprep.mubr.msk.f32.mxu0 %vm1127_vm0, %v998_v41  ;;  %4873 = vmatprep.mubr.msk.f32.mxu1 %vm1127_vm0, %v1078_v44  ;;  %v367_v32 = vcombine.high %v351_v18, %v351_v18  ;;  %v612_v33 = vcombine.high %v596_v19, %v596_v19  ;;  %v1007_v34 = vmul.f32 %v711_v13, %v5599_v22 }
  0x3f   : > { %v1087_v35 = vmul.f32 %v871_v17, %v5716_v53  ;;  %v1008_v36 = vmul.f32 %v715_v27, %v5575_v11  ;;  %v1088_v37 = vmul.f32 %v875_v28, %v5660_v8  ;;  %v719_v38 = vrot.slane %v365_v30, %v5583_v14 }
  0x40   : > { %v879_v39 = vrot.slane %v610_v31, %v5583_v14  ;;  %v1009_v41 = vmul.f32 %v715_v27, %v5599_v22  ;;  %v1089_v42 = vmul.f32 %v875_v28, %v5716_v53  ;;  %v723_v43 = vrot.slane %v367_v32, %v5583_v14 }
  0x41   : > { %4754 = vmatmul.mubr.msk.f32.gmra.mxu0 %vm1127_vm0, %v999_v47  ;;  %4874 = vmatmul.mubr.msk.f32.gmra.mxu1 %vm1127_vm0, %v1079_v48  ;;  %v883_v44 = vrot.slane %v612_v33, %v5583_v14  ;;  %v369_v45 = vcombine.high %v365_v30, %v365_v30  ;;  %v614_v46 = vcombine.high %v610_v31, %v610_v31 }
  0x42   : > { %4756 = vmatprep.mubr.msk.f32.mxu0 %vm1127_vm0, %v1000_v51  ;;  %4876 = vmatprep.mubr.msk.f32.mxu1 %vm1127_vm0, %v1080_v52  ;;  %v377_v47 = vrot.slane %v5773_v40, %v5564_v9  ;;  %v1010_v48 = vmul.f32 %v719_v38, %v5575_v11  ;;  %v1090_v49 = vmul.f32 %v879_v39, %v5660_v8 }
  0x43   : > { %v622_v50 = vrot.slane %v5716_v53, %v5564_v9  ;;  %v1011_v51 = vmul.f32 %v719_v38, %v5599_v22  ;;  %v1091_v52 = vmul.f32 %v879_v39, %v5716_v53  ;;  %v1012_v54 = vmul.f32 %v723_v43, %v5575_v11 }
  0x44   : > { %v1092_v55 = vmul.f32 %v883_v44, %v5660_v8  ;;  %v727_v56 = vrot.slane %v369_v45, %v5583_v14  ;;  %v887_v57 = vrot.slane %v614_v46, %v5583_v14  ;;  %v385_v60 = vcombine.high %v377_v47, %v377_v47 }
  0x45   : > { %4757 = vmatmul.mubr.msk.f32.gmra.mxu0 %vm1127_vm0, %v1001_v58  ;;  %4877 = vmatmul.mubr.msk.f32.gmra.mxu1 %vm1127_vm0, %v1081_v59  ;;  %v393_v58 = vrot.slane %v377_v47, %v5564_v9  ;;  %v638_v59 = vrot.slane %v622_v50, %v5564_v9  ;;  %v630_v61 = vcombine.high %v622_v50, %v622_v50 }
  0x46   : > { %4759 = vmatprep.mubr.msk.f32.mxu0 %vm1127_vm0, %v1002_v1  ;;  %4879 = vmatprep.mubr.msk.f32.mxu1 %vm1127_vm0, %v1082_v3  ;;  %v1013_v62 = vmul.f32 %v723_v43, %v5599_v22  ;;  %v1093_v63 = vmul.f32 %v883_v44, %v5716_v53  ;;  %v1014_v0 = vmul.f32 %v727_v56, %v5575_v11 }
  0x47   : > { %v1094_v1 = vmul.f32 %v887_v57, %v5660_v8  ;;  %v731_v3 = vrot.slane %v393_v58, %v5583_v14  ;;  %v891_v4 = vrot.slane %v638_v59, %v5583_v14  ;;  %v370_v11 = vcombine.high %v5773_v40, %v5773_v40 }
  0x48   : > { %v615_v13 = vcombine.high %v5716_v53, %v5716_v53  ;;  %v1095_v17 = vmul.f32 %v887_v57, %v5716_v53  ;;  %v660_v19 = vcombine.high %v638_v59, %v638_v59 }
  0x49   : > { %4760 = vmatmul.mubr.msk.f32.gmra.mxu0 %vm1127_vm0, %v1003_v5  ;;  %4880 = vmatmul.mubr.msk.f32.gmra.mxu1 %vm1127_vm0, %v1083_v7  ;;  %v407_v5 = vrot.slane %v385_v60, %v5564_v9  ;;  %v652_v7 = vrot.slane %v630_v61, %v5564_v9  ;;  %v1016_v18 = vmul.f32 %v731_v3, %v5773_v40 }
  0x4a   : > { %4762 = vmatprep.mubr.msk.f32.mxu0 %vm1127_vm0, %v1004_v10  ;;  %4882 = vmatprep.mubr.msk.f32.mxu1 %vm1127_vm0, %v1084_v12  ;;  %v1015_v10 = vmul.f32 %v727_v56, %v5599_v22  ;;  %v415_v12 = vcombine.high %v393_v58, %v393_v58  ;;  %v1096_v22 = vmul.f32 %v891_v4, %v5660_v8 }
  0x4b   : > { %v735_v20 = vrot.slane %v407_v5, %v5583_v14  ;;  %v895_v21 = vrot.slane %v652_v7, %v5583_v14  ;;  %v899_v27 = vrot.slane %v660_v19, %v5583_v14  ;;  %v417_v28 = vcombine.high %v407_v5, %v407_v5 }
  0x4c   : > { %v662_v30 = vcombine.high %v652_v7, %v652_v7  ;;  %v629_v33 = vrot.slane %v615_v13, %v5564_v9  ;;  %v426_v61 = vrot.slane %v5668_v16, %v5564_v9 }
  0x4d   : > { %4763 = vmatmul.mubr.msk.f32.gmra.mxu0 %vm1127_vm0, %v1005_v23  ;;  %4883 = vmatmul.mubr.msk.f32.gmra.mxu1 %vm1127_vm0, %v1085_v24  ;;  %v1017_v23 = vmul.f32 %v731_v3, %v5668_v16  ;;  %v1097_v24 = vmul.f32 %v891_v4, %v5716_v53  ;;  %v1018_v31 = vmul.f32 %v735_v20, %v5773_v40 }
  0x4e   : > { %4765 = vmatprep.mubr.msk.f32.mxu0 %vm1127_vm0, %v1006_v25  ;;  %4885 = vmatprep.mubr.msk.f32.mxu1 %vm1127_vm0, %v1086_v26  ;;  %v739_v25 = vrot.slane %v415_v12, %v5583_v14  ;;  %v384_v26 = vrot.slane %v370_v11, %v5564_v9  ;;  %v1098_v32 = vmul.f32 %v895_v21, %v5660_v8 }
  0x4f   : > { %v1100_v38 = vmul.f32 %v899_v27, %v5660_v8  ;;  %v743_v39 = vrot.slane %v417_v28, %v5583_v14  ;;  %v631_v44 = vcombine.high %v629_v33, %v629_v33  ;;  %v1101_v46 = vmul.f32 %v899_v27, %v5716_v53 }
  0x50   : > { %v386_v43 = vcombine.high %v384_v26, %v384_v26  ;;  %v1021_v45 = vmul.f32 %v739_v25, %v5668_v16  ;;  %v434_v13 = vcombine.high %v426_v61, %v426_v61 }
  0x51   : > { %4766 = vmatmul.mubr.msk.f32.gmra.mxu0 %vm1127_vm0, %v1007_v34  ;;  %4886 = vmatmul.mubr.msk.f32.gmra.mxu1 %vm1127_vm0, %v1087_v35  ;;  %v1019_v34 = vmul.f32 %v735_v20, %v5668_v16  ;;  %v1099_v35 = vmul.f32 %v895_v21, %v5716_v53  ;;  %v1022_v47 = vmul.f32 %v743_v39, %v5773_v40 }
  0x52   : > { %4768 = vmatprep.mubr.msk.f32.mxu0 %vm1127_vm0, %v1008_v36  ;;  %4888 = vmatprep.mubr.msk.f32.mxu1 %vm1127_vm0, %v1088_v37  ;;  %v1020_v36 = vmul.f32 %v739_v25, %v5773_v40  ;;  %v400_v37 = vrot.slane %v384_v26, %v5564_v9  ;;  %v419_v25 = vcombine.high %v5668_v16, %v5668_v16 }
  0x54   : > { %v416_v57 = vcombine.high %v400_v37, %v400_v37 }
  0x55   : > { %4769 = vmatmul.mubr.msk.f32.gmra.mxu0 %vm1127_vm0, %v1009_v41  ;;  %4889 = vmatmul.mubr.msk.f32.gmra.mxu1 %vm1127_vm0, %v1089_v42  ;;  %v903_v41 = vrot.slane %v662_v30, %v5583_v14  ;;  %v5851_v42 = vrot.slane %v629_v33, %v5564_v9 }
  0x56   : > { %4771 = vmatprep.mubr.msk.f32.mxu0 %vm1127_vm0, %v1010_v48  ;;  %4891 = vmatprep.mubr.msk.f32.mxu1 %vm1127_vm0, %v1090_v49  ;;  %v747_v49 = vrot.slane %v400_v37, %v5583_v14 }
  0x57   : > { %v1102_v48 = vmul.f32 %v903_v41, %v5660_v8  ;;  %v907_v50 = vrot.slane %v5851_v42, %v5583_v14 }
  0x58   : > { %v1024_v56 = vmul.f32 %v747_v49, %v5773_v40 }
  0x59   : > { %4772 = vmatmul.mubr.msk.f32.gmra.mxu0 %vm1127_vm0, %v1011_v51  ;;  %4892 = vmatmul.mubr.msk.f32.gmra.mxu1 %vm1127_vm0, %v1091_v52  ;;  %v414_v51 = vrot.slane %v386_v43, %v5564_v9  ;;  %v5866_v52 = vrot.slane %v631_v44, %v5564_v9  ;;  %v1104_v58 = vmul.f32 %v907_v50, %v5660_v8 }
  0x5a   : > { %4774 = vmatprep.mubr.msk.f32.mxu0 %vm1127_vm0, %v1012_v54  ;;  %4894 = vmatprep.mubr.msk.f32.mxu1 %vm1127_vm0, %v1092_v55  ;;  %v1023_v54 = vmul.f32 %v743_v39, %v5668_v16  ;;  %v1103_v55 = vmul.f32 %v903_v41, %v5716_v53 }
  0x5b   : > { %v751_v59 = vrot.slane %v414_v51, %v5583_v14  ;;  %v911_v60 = vrot.slane %v5866_v52, %v5583_v14  ;;  %v418_v4 = vcombine.high %v414_v51, %v414_v51 }
  0x5d   : > { %4775 = vmatmul.mubr.msk.f32.gmra.mxu0 %vm1127_vm0, %v1013_v62  ;;  %4895 = vmatmul.mubr.msk.f32.gmra.mxu1 %vm1127_vm0, %v1093_v63  ;;  %v1025_v62 = vmul.f32 %v747_v49, %v5668_v16  ;;  %v1105_v63 = vmul.f32 %v907_v50, %v5716_v53  ;;  %v1106_v3 = vmul.f32 %v911_v60, %v5660_v8 }
  0x5e   : > { %4777 = vmatprep.mubr.msk.f32.mxu0 %vm1127_vm0, %v1014_v0  ;;  %4897 = vmatprep.mubr.msk.f32.mxu1 %vm1127_vm0, %v1094_v1  ;;  %v755_v0 = vrot.slane %v416_v57, %v5583_v14  ;;  %v1026_v1 = vmul.f32 %v751_v59, %v5773_v40  ;;  %v1027_v5 = vmul.f32 %v751_v59, %v5668_v16 }
  0x5f   : > { %v1107_v7 = vmul.f32 %v911_v60, %v5716_v53  ;;  %v759_v11 = vrot.slane %v418_v4, %v5583_v14 }
  0x60   : > { %v1028_v12 = vmul.f32 %v755_v0, %v5773_v40 }
  0x61   : > { %4778 = vmatmul.mubr.msk.f32.gmra.mxu0 %vm1127_vm0, %v1015_v10  ;;  %4898 = vmatmul.mubr.msk.f32.gmra.mxu1 %vm1127_vm0, %v1095_v17  ;;  %v442_v10 = vrot.slane %v426_v61, %v5564_v9  ;;  %v1029_v17 = vmul.f32 %v755_v0, %v5668_v16  ;;  %v1031_v20 = vmul.f32 %v759_v11, %v5668_v16 }
  0x62   : > { %4780 = vmatprep.mubr.msk.f32.mxu0 %vm1127_vm0, %v1016_v18  ;;  %4900 = vmatprep.mubr.msk.f32.mxu1 %vm1127_vm0, %v1096_v22  ;;  %v1030_v18 = vmul.f32 %v759_v11, %v5773_v40  ;;  %v456_v22 = vrot.slane %v434_v13, %v5564_v9  ;;  %v468_v11 = vcombine.high %v5608_v29, %v5608_v29 }
  0x63   : > { %v763_v19 = vrot.slane %v442_v10, %v5583_v14 }
  0x64   : > { %v466_v30 = vcombine.high %v456_v22, %v456_v22 }
  0x65   : > { %4781 = vmatmul.mubr.msk.f32.gmra.mxu0 %vm1127_vm0, %v1017_v23  ;;  %4901 = vmatmul.mubr.msk.f32.gmra.mxu1 %vm1127_vm0, %v1097_v24  ;;  %v1032_v21 = vmul.f32 %v763_v19, %v5773_v40  ;;  %v767_v23 = vrot.slane %v456_v22, %v5583_v14  ;;  %v464_v24 = vcombine.high %v442_v10, %v442_v10 }
  0x66   : > { %4783 = vmatprep.mubr.msk.f32.mxu0 %vm1127_vm0, %v1018_v31  ;;  %4903 = vmatprep.mubr.msk.f32.mxu1 %vm1127_vm0, %v1098_v32  ;;  %v1033_v26 = vmul.f32 %v763_v19, %v5668_v16  ;;  %v433_v31 = vrot.slane %v419_v25, %v5564_v9 }
  0x67   : > { %v1034_v27 = vmul.f32 %v767_v23, %v5773_v40  ;;  %v771_v28 = vrot.slane %v464_v24, %v5583_v14  ;;  %v1035_v32 = vmul.f32 %v767_v23, %v5668_v16 }
  0x69   : > { %4784 = vmatmul.mubr.msk.f32.gmra.mxu0 %vm1127_vm0, %v1019_v34  ;;  %4904 = vmatmul.mubr.msk.f32.gmra.mxu1 %vm1127_vm0, %v1099_v35  ;;  %v1036_v33 = vmul.f32 %v771_v28, %v5773_v40  ;;  %v775_v34 = vrot.slane %v466_v30, %v5583_v14  ;;  %v449_v35 = vrot.slane %v433_v31, %v5564_v9 }
  0x6a   : > { %4786 = vmatprep.mubr.msk.f32.mxu0 %vm1127_vm0, %v1020_v36  ;;  %4906 = vmatprep.mubr.msk.f32.mxu1 %vm1127_vm0, %v1100_v38  ;;  %v435_v36 = vcombine.high %v433_v31, %v433_v31  ;;  %v1037_v37 = vmul.f32 %v771_v28, %v5668_v16 }
  0x6b   : > { %v1038_v38 = vmul.f32 %v775_v34, %v5773_v40  ;;  %v779_v39 = vrot.slane %v449_v35, %v5583_v14  ;;  %v1039_v43 = vmul.f32 %v775_v34, %v5668_v16 }
  0x6c   : > { %v463_v41 = vrot.slane %v435_v36, %v5564_v9 }
  0x6d   : > { %4787 = vmatmul.mubr.msk.f32.gmra.mxu0 %vm1127_vm0, %v1021_v45  ;;  %4907 = vmatmul.mubr.msk.f32.gmra.mxu1 %vm1127_vm0, %v1101_v46  ;;  %v1040_v44 = vmul.f32 %v779_v39, %v5773_v40  ;;  %v465_v46 = vcombine.high %v449_v35, %v449_v35 }
  0x6e   : > { %4789 = vmatprep.mubr.msk.f32.mxu0 %vm1127_vm0, %v1022_v47  ;;  %4909 = vmatprep.mubr.msk.f32.mxu1 %vm1127_vm0, %v1102_v48  ;;  %v783_v45 = vrot.slane %v463_v41, %v5583_v14  ;;  %v1041_v47 = vmul.f32 %v779_v39, %v5668_v16  ;;  %v475_v48 = vrot.slane %v5608_v29, %v5564_v9 }
  0x6f   : > { %v787_v50 = vrot.slane %v465_v46, %v5583_v14  ;;  %v467_v51 = vcombine.high %v463_v41, %v463_v41 }
  0x70   : > { %v1042_v49 = vmul.f32 %v783_v45, %v5773_v40  ;;  %v483_v60 = vcombine.high %v475_v48, %v475_v48 }
  0x71   : > { %4790 = vmatmul.mubr.msk.f32.gmra.mxu0 %vm1127_vm0, %v1023_v54  ;;  %4910 = vmatmul.mubr.msk.f32.gmra.mxu1 %vm1127_vm0, %v1103_v55  ;;  %v661_v54 = vcombine.high %v5851_v42, %v5851_v42  ;;  %v1043_v55 = vmul.f32 %v783_v45, %v5668_v16  ;;  %v791_v59 = vrot.slane %v467_v51, %v5583_v14 }
  0x72   : > { %4792 = vmatprep.mubr.msk.f32.mxu0 %vm1127_vm0, %v1024_v56  ;;  %4912 = vmatprep.mubr.msk.f32.mxu1 %vm1127_vm0, %v1104_v58  ;;  %v491_v56 = vrot.slane %v475_v48, %v5564_v9  ;;  %v1044_v58 = vmul.f32 %v787_v50, %v5773_v40  ;;  %v663_v42 = vcombine.high %v5866_v52, %v5866_v52 }
  0x73   : > { %v915_v57 = vrot.slane %v661_v54, %v5583_v14  ;;  %v505_v4 = vrot.slane %v483_v60, %v5564_v9 }
  0x74   : > { %v795_v0 = vrot.slane %v491_v56, %v5583_v14 }
  0x75   : > { %4793 = vmatmul.mubr.msk.f32.gmra.mxu0 %vm1127_vm0, %v1025_v62  ;;  %4913 = vmatmul.mubr.msk.f32.gmra.mxu1 %vm1127_vm0, %v1105_v63  ;;  %v1108_v61 = vmul.f32 %v915_v57, %v5660_v8  ;;  %v1109_v62 = vmul.f32 %v915_v57, %v5716_v53  ;;  %v1045_v63 = vmul.f32 %v787_v50, %v5668_v16 }
  0x76   : > { %4795 = vmatprep.mubr.msk.f32.mxu0 %vm1127_vm0, %v1026_v1  ;;  %4915 = vmatprep.mubr.msk.f32.mxu1 %vm1127_vm0, %v1106_v3  ;;  %v919_v1 = vrot.slane %v663_v42, %v5583_v14  ;;  %v1046_v3 = vmul.f32 %v791_v59, %v5773_v40  ;;  %v1048_v10 = vmul.f32 %v795_v0, %v5608_v29 }
  0x77   : > { %v799_v40 = vrot.slane %v505_v4, %v5583_v14  ;;  %v515_v13 = vcombine.high %v505_v4, %v505_v4 }
  0x78   : > { %v1110_v52 = vmul.f32 %v919_v1, %v5660_v8  ;;  %v1049_v8 = vmul.f32 %v795_v0, %v5586_v15 }
  0x79   : > { %4796 = vmatmul.mubr.msk.f32.gmra.mxu0 %vm1127_vm0, %v1027_v5  ;;  %4916 = vmatmul.mubr.msk.f32.gmra.mxu1 %vm1127_vm0, %v1107_v7  ;;  %v1111_v5 = vmul.f32 %v919_v1, %v5716_v53  ;;  %v1047_v7 = vmul.f32 %v791_v59, %v5668_v16  ;;  %v1050_v16 = vmul.f32 %v799_v40, %v5608_v29  ;;  %v6035_v1 = vld [vmem:[%s7187_s3] ss:$0 sm:$0xff] }
  0x7a   : > { %4798 = vmatprep.mubr.msk.f32.mxu0 %vm1127_vm0, %v1028_v12  ;;  %4918 = vmatprep.mubr.msk.f32.mxu1 %vm1127_vm0, %v1108_v61  ;;  %v513_v12 = vcombine.high %v491_v56, %v491_v56  ;;  %v807_v22 = vrot.slane %v515_v13, %v5583_v14 }
  0x7c   : > { %v803_v53 = vrot.slane %v513_v12, %v5583_v14  ;;  %v1054_v24 = vmul.f32 %v807_v22, %v5608_v29 }
  0x7d   : > { %4799 = vmatmul.mubr.msk.f32.gmra.mxu0 %vm1127_vm0, %v1029_v17  ;;  %4919 = vmatmul.mubr.msk.f32.gmra.mxu1 %vm1127_vm0, %v1109_v62  ;;  %v482_v17 = vrot.slane %v468_v11, %v5564_v9 }
  0x7e   : > { %4801 = vmatprep.mubr.msk.f32.mxu0 %vm1127_vm0, %v1030_v18  ;;  %4921 = vmatprep.mubr.msk.f32.mxu1 %vm1127_vm0, %v1110_v52  ;;  %v1051_v18 = vmul.f32 %v799_v40, %v5586_v15  ;;  %v1052_v19 = vmul.f32 %v803_v53, %v5608_v29  ;;  %v1053_v23 = vmul.f32 %v803_v53, %v5586_v15 }
  0x81   : > { %4802 = vmatmul.mubr.msk.f32.gmra.mxu0 %vm1127_vm0, %v1031_v20  ;;  %4922 = vmatmul.mubr.msk.f32.gmra.mxu1 %vm1127_vm0, %v1111_v5  ;;  %v498_v20 = vrot.slane %v482_v17, %v5564_v9 }
  0x82   : > { %4804 = vmatprep.mubr.msk.f32.mxu0 %vm1127_vm0, %v1032_v21  ;;  %v484_v21 = vcombine.high %v482_v17, %v482_v17 }
  0x83   : > { %v811_v25 = vrot.slane %v498_v20, %v5583_v14  ;;  %v514_v31 = vcombine.high %v498_v20, %v498_v20 }
  0x85   : > { %4805 = vmatmul.mubr.msk.f32.gmra.mxu0 %vm1127_vm0, %v1033_v26  ;;  %v512_v26 = vrot.slane %v484_v21, %v5564_v9  ;;  %v1056_v28 = vmul.f32 %v811_v25, %v5608_v29  ;;  %v819_v9 = vrot.slane %v514_v31, %v5583_v14 }
  0x86   : > { %4807 = vmatprep.mubr.msk.f32.mxu0 %vm1127_vm0, %v1034_v27  ;;  %v1055_v27 = vmul.f32 %v807_v22, %v5586_v15 }
  0x87   : > { %v815_v30 = vrot.slane %v512_v26, %v5583_v14  ;;  %v516_v34 = vcombine.high %v512_v26, %v512_v26  ;;  %v1060_v36 = vmul.f32 %v819_v9, %v5608_v29 }
  0x89   : > { %4808 = vmatmul.mubr.msk.f32.gmra.mxu0 %vm1127_vm0, %v1035_v32  ;;  %v1057_v32 = vmul.f32 %v811_v25, %v5586_v15  ;;  %v1059_v35 = vmul.f32 %v815_v30, %v5586_v15 }
  0x8a   : > { %4810 = vmatprep.mubr.msk.f32.mxu0 %vm1127_vm0, %v1036_v33  ;;  %v1058_v33 = vmul.f32 %v815_v30, %v5608_v29 }
  0x8d   : > { %4811 = vmatmul.mubr.msk.f32.gmra.mxu0 %vm1127_vm0, %v1037_v37  ;;  %v823_v37 = vrot.slane %v516_v34, %v5583_v14  ;;  %v6020_v14 = vld [vmem:[%s7186_s2] ss:$0 sm:$0xff] }
  0x8e   : > { %4813 = vmatprep.mubr.msk.f32.mxu0 %vm1127_vm0, %v1038_v38  ;;  %v1061_v38 = vmul.f32 %v819_v9, %v5586_v15 }
  0x8f   : > { %v1062_v39 = vmul.f32 %v823_v37, %v5608_v29  ;;  %v1063_v41 = vmul.f32 %v823_v37, %v5586_v15 }
  0x91   : > { %4814 = vmatmul.mubr.msk.f32.gmra.mxu0 %vm1127_vm0, %v1039_v43 }
  0x92   : > { %4816 = vmatprep.mubr.msk.f32.mxu0 %vm1127_vm0, %v1040_v44 }
  0x95   : > { %4817 = vmatmul.mubr.msk.f32.gmra.mxu0 %vm1127_vm0, %v1041_v47 }
  0x96   : > { %4819 = vmatprep.mubr.msk.f32.mxu0 %vm1127_vm0, %v1042_v49 }
  0x99   : > { %4820 = vmatmul.mubr.msk.f32.gmra.mxu0 %vm1127_vm0, %v1043_v55 }
  0x9a   : > { %4822 = vmatprep.mubr.msk.f32.mxu0 %vm1127_vm0, %v1044_v58 }
  0x9d   : > { %4823 = vmatmul.mubr.msk.f32.gmra.mxu0 %vm1127_vm0, %v1045_v63 }
  0x9e   : > { %4825 = vmatprep.mubr.msk.f32.mxu0 %vm1127_vm0, %v1046_v3 }
  0xa1   : > { %4826 = vmatmul.mubr.msk.f32.gmra.mxu0 %vm1127_vm0, %v1047_v7 }
  0xa2   : > { %4828 = vmatprep.mubr.msk.f32.mxu0 %vm1127_vm0, %v1048_v10 }
  0xa5   : > { %4829 = vmatmul.mubr.msk.f32.gmra.mxu0 %vm1127_vm0, %v1049_v8 }
  0xa6   : > { %4831 = vmatprep.mubr.msk.f32.mxu0 %vm1127_vm0, %v1050_v16 }
  0xa9   : > { %4832 = vmatmul.mubr.msk.f32.gmra.mxu0 %vm1127_vm0, %v1051_v18 }
  0xaa   : > { %4834 = vmatprep.mubr.msk.f32.mxu0 %vm1127_vm0, %v1052_v19 }
  0xad   : > { %4835 = vmatmul.mubr.msk.f32.gmra.mxu0 %vm1127_vm0, %v1053_v23 }
  0xae   : > { %4837 = vmatprep.mubr.msk.f32.mxu0 %vm1127_vm0, %v1054_v24 }
  0xb1   : > { %4838 = vmatmul.mubr.msk.f32.gmra.mxu0 %vm1127_vm0, %v1055_v27 }
  0xb2   : > { %4840 = vmatprep.mubr.msk.f32.mxu0 %vm1127_vm0, %v1056_v28 }
  0xb5   : > { %4841 = vmatmul.mubr.msk.f32.gmra.mxu0 %vm1127_vm0, %v1057_v32 }
  0xb6   : > { %4843 = vmatprep.mubr.msk.f32.mxu0 %vm1127_vm0, %v1058_v33 }
  0xb9   : > { %4844 = vmatmul.mubr.msk.f32.gmra.mxu0 %vm1127_vm0, %v1059_v35 }
  0xba   : > { %4846 = vmatprep.mubr.msk.f32.mxu0 %vm1127_vm0, %v1060_v36 }
  0xbd   : > { %4847 = vmatmul.mubr.msk.f32.gmra.mxu0 %vm1127_vm0, %v1061_v38 }
  0xbe   : > { %4849 = vmatprep.mubr.msk.f32.mxu0 %vm1127_vm0, %v1062_v39 }
  0xc1   : > { %4850 = vmatmul.mubr.msk.f32.gmra.mxu0 %vm1127_vm0, %v1063_v41 }
  0xe5   : > { %v4734_v43 = vpop.f32.mrf.mxu0  ;;  %v4854_v44 = vpop.f32.mrf.mxu1 }
  0xe6   : > { %v1584_v45 = vadd.f32 %v4734_v43, %v6020_v14  ;;  %v1984_v46 = vadd.f32 %v4854_v44, %v6020_v14 }
  0xe7   : > { %v1578_v29 = vpop.f32.mrf.mxu0  ;;  %v1978_v47 = vpop.f32.mrf.mxu1 }
  0xe8   : > { %5083 = vtanh.f32 %v1584_v45  ;;  %v1579_v15 = vadd.f32 %v6020_v14, %v1578_v29  ;;  %v1979_v48 = vadd.f32 %v6020_v14, %v1978_v47 }
  0xe9   : > { %5085 = vtanh.f32 %v1984_v46  ;;  %v4737_v49 = vpop.f32.mrf.mxu0  ;;  %v4857_v50 = vpop.f32.mrf.mxu1 }
  0xea   : > { %5087 = vtanh.f32 %v1579_v15  ;;  %v1594_v51 = vadd.f32 %v4737_v49, %v6020_v14  ;;  %v1994_v54 = vadd.f32 %v4857_v50, %v6020_v14 }
  0xeb   : > { %5089 = vtanh.f32 %v1979_v48  ;;  %v1588_v55 = vpop.f32.mrf.mxu0  ;;  %v1988_v56 = vpop.f32.mrf.mxu1 }
  0xec   : > { %5091 = vtanh.f32 %v1594_v51  ;;  %v1989_v57 = vadd.f32 %v6020_v14, %v1988_v56  ;;  %v1589_v58 = vadd.f32 %v6020_v14, %v1588_v55 }
  0xed   : > { %5093 = vtanh.f32 %v1994_v54  ;;  %v4740_v59 = vpop.f32.mrf.mxu0  ;;  %v4860_v60 = vpop.f32.mrf.mxu1 }
  0xee   : > { %5095 = vtanh.f32 %v1989_v57  ;;  %v1604_v42 = vadd.f32 %v4740_v59, %v6020_v14  ;;  %v2004_v7 = vadd.f32 %v4860_v60, %v6020_v14 }
  0xef   : > { %v1598_v61 = vpop.f32.mrf.mxu0  ;;  %5097 = vtanh.f32 %v1589_v58  ;;  %v1998_v63 = vpop.f32.mrf.mxu1 }
  0xf0   : > { %v1599_v62 = vadd.f32 %v6020_v14, %v1598_v61  ;;  %v1999_v4 = vadd.f32 %v6020_v14, %v1998_v63 }
  0xf1   : > { %v4743_v0 = vpop.f32.mrf.mxu0  ;;  %v4863_v52 = vpop.f32.mrf.mxu1 }
  0xf2   : > { %5099 = vtanh.f32 %v1599_v62  ;;  %v1614_v21 = vadd.f32 %v4743_v0, %v6020_v14  ;;  %v2014_v9 = vadd.f32 %v4863_v52, %v6020_v14 }
  0xf3   : > { %v1608_v3 = vpop.f32.mrf.mxu0  ;;  %5101 = vtanh.f32 %v1604_v42  ;;  %v2008_v19 = vpop.f32.mrf.mxu1 }
  0xf4   : > { %5103 = vtanh.f32 %v1999_v4  ;;  %v1609_v17 = vadd.f32 %v6020_v14, %v1608_v3  ;;  %v2009_v26 = vadd.f32 %v6020_v14, %v2008_v19 }
  0xf5   : > { %v5084_v5 = vpop.eup %5083  ;;  %v4746_v10 = vpop.f32.mrf.mxu0  ;;  %5105 = vtanh.f32 %v2004_v7 }
  0xf6   : > { %v5086_v40 = vpop.eup %5085  ;;  %v2353_v12 = vmul.f32 %v5084_v5, %v6035_v1  ;;  %5107 = vtanh.f32 %v1609_v17  ;;  %v4866_v34 = vpop.f32.mrf.mxu1  ;;  %v1624_v45 = vadd.f32 %v4746_v10, %v6020_v14 }
  0xf7   : > { %v5088_v11 = vpop.eup %5087  ;;  %v2433_v8 = vmul.f32 %v5086_v40, %v6035_v1  ;;  %v1618_v16 = vpop.f32.mrf.mxu0  ;;  %5109 = vtanh.f32 %v1614_v21  ;;  %v2024_v55 = vadd.f32 %v4866_v34, %v6020_v14 }
  0xf8   : > { %v5090_v53 = vpop.eup %5089  ;;  %v2483_v13 = vsel %vm1127_vm0, %v2353_v12, 0.0  ;;  %v2352_v18 = vmul.f32 %v5088_v11, %v6035_v1  ;;  %5111 = vtanh.f32 %v2009_v26  ;;  %v1619_v41 = vadd.f32 %v6020_v14, %v1618_v16  ;;  %v2018_v29 = vpop.f32.mrf.mxu1 }
  0xf9   : > { %v5092_v22 = vpop.eup %5091  ;;  %v2723_v20 = vsel %vm1127_vm0, %v2433_v8, 0.0  ;;  %2484 = vadd.xlane.f32.xlu0 %v2483_v13  ;;  %v4749_v23 = vpop.f32.mrf.mxu0  ;;  %v2432_v32 = vmul.f32 %v5090_v53, %v6035_v1  ;;  %5113 = vtanh.f32 %v2014_v9  ;;  %v2019_v50 = vadd.f32 %v6020_v14, %v2018_v29 }
  0xfa   : > { %v5094_v24 = vpop.eup %5093  ;;  %2724 = vadd.xlane.f32.xlu1 %v2723_v20  ;;  %v2355_v25 = vmul.f32 %v5092_v22, %v6035_v1  ;;  %v2480_v30 = vsel %vm1127_vm0, %v2352_v18, 0.0  ;;  %5115 = vtanh.f32 %v1619_v41  ;;  %v4869_v58 = vpop.f32.mrf.mxu1  ;;  %v1634_v4 = vadd.f32 %v4749_v23, %v6020_v14 }
  0xfb   : > { %v2435_v27 = vmul.f32 %v5094_v24, %v6035_v1  ;;  %v1628_v28 = vpop.f32.mrf.mxu0  ;;  %v5096_v33 = vpop.eup %5095  ;;  %v2720_v39 = vsel %vm1127_vm0, %v2432_v32, 0.0  ;;  %5117 = vtanh.f32 %v1624_v45  ;;  %v2034_v53 = vadd.f32 %v4869_v58, %v6020_v14 }
  0xfc   : > { %v2489_v31 = vsel %vm1127_vm0, %v2355_v25, 0.0  ;;  %v5098_v36 = vpop.eup %5097  ;;  %v2434_v43 = vmul.f32 %v5096_v33, %v6035_v1  ;;  %5119 = vtanh.f32 %v2019_v50  ;;  %v1629_v42 = vadd.f32 %v6020_v14, %v1628_v28  ;;  %v2028_v5 = vpop.f32.mrf.mxu1 }
  0xfd   : > { %2481 = vadd.xlane.f32.xlu0 %v2480_v30  ;;  %v6053_v35 = vpop.f32.mrf.mxu0  ;;  %v2729_v37 = vsel %vm1127_vm0, %v2435_v27, 0.0  ;;  %v2354_v46 = vmul.f32 %v5098_v36, %v6035_v1  ;;  %5121 = vtanh.f32 %v2024_v55  ;;  %v2029_v11 = vadd.f32 %v6020_v14, %v2028_v5 }
  0xfe   : > { %2490 = vadd.xlane.f32.xlu1 %v2489_v31  ;;  %v2726_v49 = vsel %vm1127_vm0, %v2434_v43, 0.0  ;;  %5123 = vtanh.f32 %v1629_v42  ;;  %v4872_v18 = vpop.f32.mrf.mxu1  ;;  %v1644_v27 = vadd.f32 %v6053_v35, %v6020_v14 }
  0xff   : > { %v1638_v38 = vpop.f32.mrf.mxu0  ;;  %v5100_v44 = vpop.eup %5099  ;;  %v2486_v56 = vsel %vm1127_vm0, %v2354_v46, 0.0  ;;  %5125 = vtanh.f32 %v1634_v4  ;;  %v2044_v35 = vadd.f32 %v4872_v18, %v6020_v14 }
 0x100   : > { %v5102_v15 = vpop.eup %5101  ;;  %v2356_v51 = vmul.f32 %v5100_v44, %v6035_v1  ;;  %5127 = vtanh.f32 %v2029_v11  ;;  %v1639_v23 = vadd.f32 %v6020_v14, %v1638_v38  ;;  %v2038_v30 = vpop.f32.mrf.mxu1 }
 0x101   : > { %2721 = vadd.xlane.f32.xlu0 %v2720_v39  ;;  %v6061_v47 = vpop.f32.mrf.mxu0  ;;  %v5104_v54 = vpop.eup %5103  ;;  %v2357_v57 = vmul.f32 %v5102_v15, %v6035_v1  ;;  %5129 = vtanh.f32 %v2034_v53  ;;  %v2039_v34 = vadd.f32 %v6020_v14, %v2038_v30 }
 0x102   : > { %2730 = vadd.xlane.f32.xlu1 %v2729_v37  ;;  %v5106_v60 = vpop.eup %5105  ;;  %v2492_v62 = vsel %vm1127_vm0, %v2356_v51, 0.0  ;;  %v2436_v63 = vmul.f32 %v5104_v54, %v6035_v1  ;;  %5131 = vtanh.f32 %v1639_v23  ;;  %v4875_v41 = vpop.f32.mrf.mxu1  ;;  %v1654_v51 = vadd.f32 %v6061_v47, %v6020_v14 }
 0x103   : > { %v6063_v48 = vpop.f32.mrf.mxu0  ;;  %v5108_v0 = vpop.eup %5107  ;;  %v2495_v3 = vsel %vm1127_vm0, %v2357_v57, 0.0  ;;  %v2437_v52 = vmul.f32 %v5106_v60, %v6035_v1  ;;  %5133 = vtanh.f32 %v1644_v27  ;;  %v2054_v47 = vadd.f32 %v4875_v41, %v6020_v14 }
 0x104   : > { %v5110_v10 = vpop.eup %5109  ;;  %v2732_v12 = vsel %vm1127_vm0, %v2436_v63, 0.0  ;;  %v2358_v8 = vmul.f32 %v5108_v0, %v6035_v1  ;;  %5135 = vtanh.f32 %v2039_v34  ;;  %v1649_v29 = vadd.f32 %v6020_v14, %v6063_v48  ;;  %v2048_v55 = vpop.f32.mrf.mxu1 }
 0x105   : > { %2727 = vadd.xlane.f32.xlu0 %v2726_v49  ;;  %v6071_v59 = vpop.f32.mrf.mxu0  ;;  %v5112_v16 = vpop.eup %5111  ;;  %v2735_v13 = vsel %vm1127_vm0, %v2437_v52, 0.0  ;;  %v2359_v17 = vmul.f32 %v5110_v10, %v6035_v1  ;;  %5137 = vtanh.f32 %v2044_v35  ;;  %v2049_v60 = vadd.f32 %v6020_v14, %v2048_v55 }
 0x106   : > { %2487 = vadd.xlane.f32.xlu1 %v2486_v56  ;;  %v5114_v22 = vpop.eup %5113  ;;  %v2498_v21 = vsel %vm1127_vm0, %v2358_v8, 0.0  ;;  %v2438_v24 = vmul.f32 %v5112_v16, %v6035_v1  ;;  %5139 = vtanh.f32 %v1649_v29  ;;  %v1664_v53 = vadd.f32 %v6071_v59, %v6020_v14 }
 0x107   : > { %v6073_v61 = vpop.f32.mrf.mxu0  ;;  %v5116_v25 = vpop.eup %5115  ;;  %v2501_v26 = vsel %vm1127_vm0, %v2359_v17, 0.0  ;;  %v2439_v28 = vmul.f32 %v5114_v22, %v6035_v1  ;;  %5141 = vtanh.f32 %v1654_v51 }
 0x108   : > { %v5118_v32 = vpop.eup %5117  ;;  %v2738_v9 = vsel %vm1127_vm0, %v2438_v24, 0.0  ;;  %v2360_v36 = vmul.f32 %v5116_v25, %v6035_v1  ;;  %5143 = vtanh.f32 %v2049_v60 }
 0x109   : > { %2493 = vadd.xlane.f32.xlu0 %v2492_v62  ;;  %v6081_v7 = vpop.f32.mrf.mxu0  ;;  %v5120_v37 = vpop.eup %5119  ;;  %v2741_v38 = vsel %vm1127_vm0, %v2439_v28, 0.0  ;;  %v2361_v39 = vmul.f32 %v5118_v32, %v6035_v1  ;;  %5145 = vtanh.f32 %v2054_v47 }
 0x10a   : > { %2496 = vadd.xlane.f32.xlu1 %v2495_v3  ;;  %v5122_v44 = vpop.eup %5121  ;;  %v2504_v46 = vsel %vm1127_vm0, %v2360_v36, 0.0  ;;  %v2440_v15 = vmul.f32 %v5120_v37, %v6035_v1  ;;  %v4878_v3 = vpop.f32.mrf.mxu1 }
 0x10b   : > { %v6083_v40 = vpop.f32.mrf.mxu0  ;;  %v5124_v49 = vpop.eup %5123  ;;  %v2507_v50 = vsel %vm1127_vm0, %v2361_v39, 0.0  ;;  %v2441_v54 = vmul.f32 %v5122_v44, %v6035_v1  ;;  %v2064_v59 = vadd.f32 %v4878_v3, %v6020_v14  ;;  %v1674_v39 = vadd.f32 %v6081_v7, %v6020_v14 }
 0x10c   : > { %v5126_v57 = vpop.eup %5125  ;;  %v2744_v48 = vsel %vm1127_vm0, %v2440_v15, 0.0  ;;  %v2362_v62 = vmul.f32 %v5124_v49, %v6035_v1  ;;  %v2058_v17 = vpop.f32.mrf.mxu1  ;;  %v1669_v36 = vadd.f32 %v6020_v14, %v6083_v40 }
 0x10d   : > { %2733 = vadd.xlane.f32.xlu0 %v2732_v12  ;;  %v6091_v19 = vpop.f32.mrf.mxu0  ;;  %v5128_v42 = vpop.eup %5127  ;;  %v2747_v63 = vsel %vm1127_vm0, %v2441_v54, 0.0  ;;  %v2363_v0 = vmul.f32 %v5126_v57, %v6035_v1  ;;  %v1659_v12 = vadd.f32 %v6020_v14, %v6073_v61  ;;  %v2059_v23 = vadd.f32 %v6020_v14, %v2058_v17 }
 0x10e   : > { %2736 = vadd.xlane.f32.xlu1 %v2735_v13  ;;  %v5130_v52 = vpop.eup %5129  ;;  %v2510_v10 = vsel %vm1127_vm0, %v2362_v62, 0.0  ;;  %v2442_v11 = vmul.f32 %v5128_v42, %v6035_v1  ;;  %v4881_v28 = vpop.f32.mrf.mxu1 }
 0x10f   : > { %v6093_v20 = vpop.f32.mrf.mxu0  ;;  %v5132_v8 = vpop.eup %5131  ;;  %v2513_v16 = vsel %vm1127_vm0, %v2363_v0, 0.0  ;;  %v2443_v13 = vmul.f32 %v5130_v52, %v6035_v1  ;;  %5147 = vtanh.f32 %v1659_v12  ;;  %v2074_v7 = vadd.f32 %v4881_v28, %v6020_v14 }
 0x110   : > { %v5134_v22 = vpop.eup %5133  ;;  %v2750_v61 = vsel %vm1127_vm0, %v2442_v11, 0.0  ;;  %v2364_v24 = vmul.f32 %v5132_v8, %v6035_v1  ;;  %5149 = vtanh.f32 %v1664_v53  ;;  %v2068_v44 = vpop.f32.mrf.mxu1  ;;  %v1679_v42 = vadd.f32 %v6020_v14, %v6093_v20 }
 0x111   : > { %2499 = vadd.xlane.f32.xlu0 %v2498_v21  ;;  %v6102_v31 = vpop.f32.mrf.mxu0  ;;  %v5136_v25 = vpop.eup %5135  ;;  %v2365_v27 = vmul.f32 %v5134_v22, %v6035_v1  ;;  %5151 = vtanh.f32 %v2059_v23  ;;  %v2069_v49 = vadd.f32 %v6020_v14, %v2068_v44  ;;  %v1684_v52 = vadd.f32 %v6091_v19, %v6020_v14 }
 0x112   : > { %2502 = vadd.xlane.f32.xlu1 %v2501_v26  ;;  %v2753_v26 = vsel %vm1127_vm0, %v2443_v13, 0.0  ;;  %v5138_v32 = vpop.eup %5137  ;;  %v2516_v34 = vsel %vm1127_vm0, %v2364_v24, 0.0  ;;  %v2444_v37 = vmul.f32 %v5136_v25, %v6035_v1  ;;  %5153 = vtanh.f32 %v2064_v59  ;;  %v4884_v57 = vpop.f32.mrf.mxu1 }
 0x113   : > { %v6104_v33 = vpop.f32.mrf.mxu0  ;;  %v5140_v35 = vpop.eup %5139  ;;  %v2445_v41 = vmul.f32 %v5138_v32, %v6035_v1  ;;  %5155 = vtanh.f32 %v1669_v36  ;;  %v2084_v17 = vadd.f32 %v4884_v57, %v6020_v14 }
 0x114   : > { %v5142_v29 = vpop.eup %5141  ;;  %v2756_v40 = vsel %vm1127_vm0, %v2444_v37, 0.0  ;;  %5157 = vtanh.f32 %v1674_v39  ;;  %v2078_v12 = vpop.f32.mrf.mxu1  ;;  %v1689_v59 = vadd.f32 %v6020_v14, %v6104_v33 }
 0x115   : > { %2739 = vadd.xlane.f32.xlu0 %v2738_v9  ;;  %v6112_v43 = vpop.f32.mrf.mxu0  ;;  %v5144_v51 = vpop.eup %5143  ;;  %v2759_v54 = vsel %vm1127_vm0, %v2445_v41, 0.0  ;;  %v2367_v55 = vmul.f32 %v5142_v29, %v6035_v1  ;;  %5159 = vtanh.f32 %v2069_v49 }
 0x116   : > { %2742 = vadd.xlane.f32.xlu1 %v2741_v38  ;;  %v2519_v38 = vsel %vm1127_vm0, %v2365_v27, 0.0  ;;  %v5146_v60 = vpop.eup %5145  ;;  %v2446_v47 = vmul.f32 %v5144_v51, %v6035_v1  ;;  %5161 = vtanh.f32 %v2074_v7 }
 0x117   : > { %v6114_v45 = vpop.f32.mrf.mxu0  ;;  %v2525_v3 = vsel %vm1127_vm0, %v2367_v55, 0.0  ;;  %5163 = vtanh.f32 %v1679_v42 }
 0x118   : > { %v2762_v20 = vsel %vm1127_vm0, %v2446_v47, 0.0  ;;  %5165 = vtanh.f32 %v1684_v52 }
 0x119   : > { %2505 = vadd.xlane.f32.xlu0 %v2504_v46  ;;  %v6124_v56 = vpop.f32.mrf.mxu0 }
 0x11a   : > { %2508 = vadd.xlane.f32.xlu1 %v2507_v50  ;;  %v2366_v50 = vmul.f32 %v5140_v35, %v6035_v1 }
 0x11b   : > { %v6126_v58 = vpop.f32.mrf.mxu0 }
 0x11c   : > { %v2522_v62 = vsel %vm1127_vm0, %v2366_v50, 0.0  ;;  %v5148_v0 = vpop.eup %5147 }
 0x11d   : > { %2745 = vadd.xlane.f32.xlu0 %v2744_v48  ;;  %v6134_v4 = vpop.f32.mrf.mxu0  ;;  %v5150_v11 = vpop.eup %5149  ;;  %v2368_v53 = vmul.f32 %v5148_v0, %v6035_v1 }
 0x11e   : > { %2748 = vadd.xlane.f32.xlu1 %v2747_v63  ;;  %v5152_v13 = vpop.eup %5151  ;;  %v2369_v22 = vmul.f32 %v5150_v11, %v6035_v1 }
 0x11f   : > { %v6136_v5 = vpop.f32.mrf.mxu0  ;;  %v5154_v23 = vpop.eup %5153  ;;  %v2528_v25 = vsel %vm1127_vm0, %v2368_v53, 0.0 }
 0x120   : > { %v5156_v28 = vpop.eup %5155  ;;  %v2531_v32 = vsel %vm1127_vm0, %v2369_v22, 0.0  ;;  %v2449_v36 = vmul.f32 %v5154_v23, %v6035_v1 }
 0x121   : > { %2511 = vadd.xlane.f32.xlu0 %v2510_v10  ;;  %v6146_v18 = vpop.f32.mrf.mxu0  ;;  %v2447_v10 = vmul.f32 %v5146_v60, %v6035_v1  ;;  %v5158_v35 = vpop.eup %5157  ;;  %v2370_v39 = vmul.f32 %v5156_v28, %v6035_v1 }
 0x122   : > { %2514 = vadd.xlane.f32.xlu1 %v2513_v16  ;;  %v2079_v16 = vadd.f32 %v6020_v14, %v2078_v12  ;;  %v5160_v44 = vpop.eup %5159 }
 0x123   : > { %v6148_v21 = vpop.f32.mrf.mxu0  ;;  %v2765_v19 = vsel %vm1127_vm0, %v2447_v10, 0.0  ;;  %v5162_v50 = vpop.eup %5161  ;;  %v2534_v7 = vsel %vm1127_vm0, %v2370_v39, 0.0  ;;  %v2450_v55 = vmul.f32 %v5160_v44, %v6035_v1 }
 0x124   : > { %5167 = vtanh.f32 %v2079_v16  ;;  %v5164_v57 = vpop.eup %5163  ;;  %v2451_v42 = vmul.f32 %v5162_v50, %v6035_v1 }
 0x125   : > { %2751 = vadd.xlane.f32.xlu0 %v2750_v61  ;;  %v6156_v30 = vpop.f32.mrf.mxu0  ;;  %v4887_v61 = vpop.f32.mrf.mxu1  ;;  %5169 = vtanh.f32 %v2084_v17  ;;  %v2372_v10 = vmul.f32 %v5164_v57, %v6035_v1 }
 0x126   : > { %2754 = vadd.xlane.f32.xlu1 %v2753_v26  ;;  %v2448_v26 = vmul.f32 %v5152_v13, %v6035_v1  ;;  %5171 = vtanh.f32 %v1689_v59  ;;  %v2094_v29 = vadd.f32 %v4887_v61, %v6020_v14  ;;  %v5166_v0 = vpop.eup %5165  ;;  %v1714_v59 = vadd.f32 %v6124_v56, %v6020_v14 }
 0x127   : > { %v6158_v9 = vpop.f32.mrf.mxu0  ;;  %v2088_v37 = vpop.f32.mrf.mxu1  ;;  %v2373_v16 = vmul.f32 %v5166_v0, %v6035_v1  ;;  %v2540_v17 = vsel %vm1127_vm0, %v2372_v10, 0.0 }
 0x128   : > { %v2768_v33 = vsel %vm1127_vm0, %v2448_v26, 0.0 }
 0x129   : > { %2517 = vadd.xlane.f32.xlu0 %v2516_v34  ;;  %v6168_v46 = vpop.f32.mrf.mxu0  ;;  %v1694_v34 = vadd.f32 %v6102_v31, %v6020_v14  ;;  %v2771_v31 = vsel %vm1127_vm0, %v2449_v36, 0.0  ;;  %v4890_v49 = vpop.f32.mrf.mxu1 }
 0x12a   : > { %2520 = vadd.xlane.f32.xlu1 %v2519_v38  ;;  %v2089_v38 = vadd.f32 %v6020_v14, %v2088_v37 }
 0x12b   : > { %v6170_v15 = vpop.f32.mrf.mxu0  ;;  %5173 = vtanh.f32 %v1694_v34  ;;  %v2098_v47 = vpop.f32.mrf.mxu1 }
 0x12c   : > { %5175 = vtanh.f32 %v2089_v38  ;;  %v2099_v52 = vadd.f32 %v6020_v14, %v2098_v47 }
 0x12d   : > { %2757 = vadd.xlane.f32.xlu0 %v2756_v40  ;;  %v6178_v48 = vpop.f32.mrf.mxu0  ;;  %v2371_v40 = vmul.f32 %v5158_v35, %v6035_v1  ;;  %5177 = vtanh.f32 %v2094_v29  ;;  %v4893_v53 = vpop.f32.mrf.mxu1 }
 0x12e   : > { %2760 = vadd.xlane.f32.xlu1 %v2759_v54  ;;  %v1699_v54 = vadd.f32 %v6020_v14, %v6114_v45  ;;  %v2774_v45 = vsel %vm1127_vm0, %v2450_v55, 0.0 }
 0x12f   : > { %v6184_v63 = vpop.f32.mrf.mxu0  ;;  %v2537_v60 = vsel %vm1127_vm0, %v2371_v40, 0.0  ;;  %v2108_v28 = vpop.f32.mrf.mxu1 }
 0x130   : > { %5179 = vtanh.f32 %v1699_v54  ;;  %v2109_v34 = vadd.f32 %v6020_v14, %v2108_v28  ;;  %v1724_v54 = vadd.f32 %v6134_v4, %v6020_v14 }
 0x131   : > { %2523 = vadd.xlane.f32.xlu0 %v2522_v62  ;;  %v6190_v8 = vpop.f32.mrf.mxu0  ;;  %v1704_v62 = vadd.f32 %v6112_v43, %v6020_v14  ;;  %v5168_v11 = vpop.eup %5167  ;;  %v2104_v43 = vadd.f32 %v4890_v49, %v6020_v14 }
 0x132   : > { %2526 = vadd.xlane.f32.xlu1 %v2525_v3  ;;  %v5170_v13 = vpop.eup %5169  ;;  %v2452_v22 = vmul.f32 %v5168_v11, %v6035_v1  ;;  %v4896_v39 = vpop.f32.mrf.mxu1 }
 0x133   : > { %v6198_v24 = vpop.f32.mrf.mxu0  ;;  %5181 = vtanh.f32 %v1704_v62  ;;  %v5172_v23 = vpop.eup %5171  ;;  %v2453_v26 = vmul.f32 %v5170_v13, %v6035_v1 }
 0x134   : > { %5183 = vtanh.f32 %v2099_v52  ;;  %v2374_v36 = vmul.f32 %v5172_v23, %v6035_v1  ;;  %v2118_v57 = vpop.f32.mrf.mxu1 }
 0x135   : > { %2763 = vadd.xlane.f32.xlu0 %v2762_v20  ;;  %v6204_v27 = vpop.f32.mrf.mxu0  ;;  %v2777_v20 = vsel %vm1127_vm0, %v2451_v42, 0.0  ;;  %5185 = vtanh.f32 %v2104_v43  ;;  %v2783_v56 = vsel %vm1127_vm0, %v2453_v26, 0.0  ;;  %v2119_v62 = vadd.f32 %v6020_v14, %v2118_v57 }
 0x136   : > { %2766 = vadd.xlane.f32.xlu1 %v2765_v19  ;;  %v1709_v19 = vadd.f32 %v6020_v14, %v6126_v58  ;;  %v2780_v58 = vsel %vm1127_vm0, %v2452_v22, 0.0  ;;  %v2546_v29 = vsel %vm1127_vm0, %v2374_v36, 0.0  ;;  %v4899_v10 = vpop.f32.mrf.mxu1 }
 0x137   : > { %v6213_v41 = vpop.f32.mrf.mxu0 }
 0x138   : > { %5187 = vtanh.f32 %v1709_v19  ;;  %v1734_v19 = vadd.f32 %v6146_v18, %v6020_v14  ;;  %v2128_v23 = vpop.f32.mrf.mxu1 }
 0x139   : > { %2529 = vadd.xlane.f32.xlu0 %v2528_v25  ;;  %v6218_v51 = vpop.f32.mrf.mxu0  ;;  %v2543_v25 = vsel %vm1127_vm0, %v2373_v16, 0.0  ;;  %5189 = vtanh.f32 %v1714_v59  ;;  %v2129_v59 = vadd.f32 %v6020_v14, %v2128_v23 }
 0x13a   : > { %2532 = vadd.xlane.f32.xlu1 %v2531_v32  ;;  %v5174_v32 = vpop.eup %5173  ;;  %5191 = vtanh.f32 %v2109_v34  ;;  %v4902_v36 = vpop.f32.mrf.mxu1 }
 0x13b   : > { %v6228_v3 = vpop.f32.mrf.mxu0  ;;  %v5176_v35 = vpop.eup %5175  ;;  %v2375_v38 = vmul.f32 %v5174_v32, %v6035_v1 }
 0x13c   : > { %v5178_v44 = vpop.eup %5177  ;;  %v2454_v40 = vmul.f32 %v5176_v35, %v6035_v1 }
 0x13d   : > { %2769 = vadd.xlane.f32.xlu0 %v2768_v33  ;;  %v6233_v12 = vpop.f32.mrf.mxu0  ;;  %v2114_v33 = vadd.f32 %v4893_v53, %v6020_v14  ;;  %v5180_v50 = vpop.eup %5179  ;;  %v2455_v55 = vmul.f32 %v5178_v44, %v6035_v1 }
 0x13e   : > { %2772 = vadd.xlane.f32.xlu1 %v2771_v31  ;;  %v1719_v31 = vadd.f32 %v6020_v14, %v6136_v5  ;;  %v2786_v5 = vsel %vm1127_vm0, %v2454_v40, 0.0  ;;  %v2376_v42 = vmul.f32 %v5180_v50, %v6035_v1  ;;  %v2138_v50 = vpop.f32.mrf.mxu1 }
 0x13f   : > { %v6242_v61 = vpop.f32.mrf.mxu0  ;;  %5193 = vtanh.f32 %v2114_v33  ;;  %v2789_v4 = vsel %vm1127_vm0, %v2455_v55, 0.0 }
 0x140   : > { %5195 = vtanh.f32 %v1719_v31  ;;  %v2552_v43 = vsel %vm1127_vm0, %v2376_v42, 0.0  ;;  %v1744_v31 = vadd.f32 %v6156_v30, %v6020_v14  ;;  %v4905_v42 = vpop.f32.mrf.mxu1 }
 0x141   : > { %2535 = vadd.xlane.f32.xlu0 %v2534_v7  ;;  %v6251_v37 = vpop.f32.mrf.mxu0  ;;  %v2549_v7 = vsel %vm1127_vm0, %v2375_v38, 0.0  ;;  %5197 = vtanh.f32 %v1724_v54  ;;  %v2139_v54 = vadd.f32 %v6020_v14, %v2138_v50 }
 0x142   : > { %2538 = vadd.xlane.f32.xlu1 %v2537_v60  ;;  %v5182_v60 = vpop.eup %5181  ;;  %5199 = vtanh.f32 %v2119_v62 }
 0x143   : > { %v6260_v49 = vpop.f32.mrf.mxu0  ;;  %v5184_v0 = vpop.eup %5183  ;;  %v2377_v52 = vmul.f32 %v5182_v60, %v6035_v1 }
 0x144   : > { %v5186_v11 = vpop.eup %5185  ;;  %v2456_v16 = vmul.f32 %v5184_v0, %v6035_v1 }
 0x145   : > { %2775 = vadd.xlane.f32.xlu0 %v2774_v45  ;;  %v6269_v47 = vpop.f32.mrf.mxu0  ;;  %v2124_v45 = vadd.f32 %v4896_v39, %v6020_v14  ;;  %v5188_v13 = vpop.eup %5187  ;;  %v2457_v22 = vmul.f32 %v5186_v11, %v6035_v1 }
 0x146   : > { %2778 = vadd.xlane.f32.xlu1 %v2777_v20  ;;  %v1729_v20 = vadd.f32 %v6020_v14, %v6148_v21  ;;  %v2792_v21 = vsel %vm1127_vm0, %v2456_v16, 0.0  ;;  %v2378_v26 = vmul.f32 %v5188_v13, %v6035_v1  ;;  %v2148_v13 = vpop.f32.mrf.mxu1 }
 0x147   : > { %v6278_v53 = vpop.f32.mrf.mxu0  ;;  %5201 = vtanh.f32 %v2124_v45  ;;  %v2795_v18 = vsel %vm1127_vm0, %v2457_v22, 0.0 }
 0x148   : > { %5203 = vtanh.f32 %v1729_v20  ;;  %v2558_v33 = vsel %vm1127_vm0, %v2378_v26, 0.0  ;;  %v1754_v20 = vadd.f32 %v6168_v46, %v6020_v14  ;;  %v4908_v26 = vpop.f32.mrf.mxu1 }
 0x149   : > { %2541 = vadd.xlane.f32.xlu0 %v2540_v17  ;;  %v2555_v17 = vsel %vm1127_vm0, %v2377_v52, 0.0  ;;  %v6287_v28 = vpop.f32.mrf.mxu0  ;;  %5205 = vtanh.f32 %v1734_v19  ;;  %v2149_v19 = vadd.f32 %v6020_v14, %v2148_v13 }
 0x14a   : > { %2544 = vadd.xlane.f32.xlu1 %v2543_v25  ;;  %v5190_v25 = vpop.eup %5189  ;;  %5207 = vtanh.f32 %v2129_v59 }
 0x14b   : > { %v5192_v32 = vpop.eup %5191  ;;  %v2379_v34 = vmul.f32 %v5190_v25, %v6035_v1  ;;  %v6296_v39 = vpop.f32.mrf.mxu0 }
 0x14c   : > { %v5194_v35 = vpop.eup %5193  ;;  %v2458_v38 = vmul.f32 %v5192_v32, %v6035_v1 }
 0x14d   : > { %2781 = vadd.xlane.f32.xlu0 %v2780_v58  ;;  %v2134_v58 = vadd.f32 %v4899_v10, %v6020_v14  ;;  %v5196_v44 = vpop.eup %5195  ;;  %v2459_v40 = vmul.f32 %v5194_v35, %v6035_v1  ;;  %v6305_v57 = vpop.f32.mrf.mxu0 }
 0x14e   : > { %2784 = vadd.xlane.f32.xlu1 %v2783_v56  ;;  %v1739_v56 = vadd.f32 %v6020_v14, %v6158_v9  ;;  %v2798_v9 = vsel %vm1127_vm0, %v2458_v38, 0.0  ;;  %v2380_v55 = vmul.f32 %v5196_v44, %v6035_v1  ;;  %v2158_v44 = vpop.f32.mrf.mxu1 }
 0x14f   : > { %5209 = vtanh.f32 %v2134_v58  ;;  %v2801_v30 = vsel %vm1127_vm0, %v2459_v40, 0.0  ;;  %v6314_v10 = vpop.f32.mrf.mxu0 }
 0x150   : > { %5211 = vtanh.f32 %v1739_v56  ;;  %v2564_v45 = vsel %vm1127_vm0, %v2380_v55, 0.0  ;;  %v1764_v56 = vadd.f32 %v6178_v48, %v6020_v14  ;;  %v4911_v55 = vpop.f32.mrf.mxu1 }
 0x151   : > { %2547 = vadd.xlane.f32.xlu0 %v2546_v29  ;;  %v2561_v29 = vsel %vm1127_vm0, %v2379_v34, 0.0  ;;  %5213 = vtanh.f32 %v1744_v31  ;;  %v6323_v23 = vpop.f32.mrf.mxu0  ;;  %v2159_v31 = vadd.f32 %v6020_v14, %v2158_v44 }
 0x152   : > { %2550 = vadd.xlane.f32.xlu1 %v2549_v7  ;;  %v5198_v7 = vpop.eup %5197  ;;  %5215 = vtanh.f32 %v2139_v54 }
 0x153   : > { %v5200_v60 = vpop.eup %5199  ;;  %v2381_v62 = vmul.f32 %v5198_v7, %v6035_v1 }
 0x154   : > { %v5202_v0 = vpop.eup %5201  ;;  %v2460_v52 = vmul.f32 %v5200_v60, %v6035_v1 }
 0x155   : > { %2787 = vadd.xlane.f32.xlu0 %v2786_v5  ;;  %v2144_v5 = vadd.f32 %v4902_v36, %v6020_v14  ;;  %v5204_v11 = vpop.eup %5203  ;;  %v2461_v16 = vmul.f32 %v5202_v0, %v6035_v1  ;;  %v6332_v36 = vpop.f32.mrf.mxu0 }
 0x156   : > { %2790 = vadd.xlane.f32.xlu1 %v2789_v4  ;;  %v1749_v4 = vadd.f32 %v6020_v14, %v6170_v15  ;;  %v2804_v15 = vsel %vm1127_vm0, %v2460_v52, 0.0  ;;  %v2382_v22 = vmul.f32 %v5204_v11, %v6035_v1  ;;  %v2168_v11 = vpop.f32.mrf.mxu1 }
 0x157   : > { %5217 = vtanh.f32 %v2144_v5  ;;  %v2807_v46 = vsel %vm1127_vm0, %v2461_v16, 0.0  ;;  %v6341_v50 = vpop.f32.mrf.mxu0 }
 0x158   : > { %5219 = vtanh.f32 %v1749_v4  ;;  %v2570_v58 = vsel %vm1127_vm0, %v2382_v22, 0.0 }
 0x159   : > { %2553 = vadd.xlane.f32.xlu0 %v2552_v43  ;;  %v2567_v43 = vsel %vm1127_vm0, %v2381_v62, 0.0  ;;  %5221 = vtanh.f32 %v1754_v20  ;;  %v6362_v20 = vand.u32 127, %v276_v2  ;;  %v4914_v2 = vpop.f32.mrf.mxu1 }
 0x15a   : > { %2556 = vadd.xlane.f32.xlu1 %v2555_v17  ;;  %v5206_v17 = vpop.eup %5205  ;;  %5223 = vtanh.f32 %v2149_v19 }
 0x15b   : > { %v5208_v25 = vpop.eup %5207  ;;  %v2383_v59 = vmul.f32 %v5206_v17, %v6035_v1  ;;  %vm2866_vm9 = vcmp.lt.s32.totalorder %v6362_v20, 12 }
 0x15c   : > { %v5210_v32 = vpop.eup %5209  ;;  %v2462_v34 = vmul.f32 %v5208_v25, %v6035_v1 }
 0x15d   : > { %2793 = vadd.xlane.f32.xlu0 %v2792_v21  ;;  %v2154_v21 = vadd.f32 %v4905_v42, %v6020_v14  ;;  %v5212_v35 = vpop.eup %5211  ;;  %v2463_v38 = vmul.f32 %v5210_v32, %v6035_v1  ;;  %v6355_v42 = vpop.f32.mrf.mxu0 }
 0x15e   : > { %2796 = vadd.xlane.f32.xlu1 %v2795_v18  ;;  %v1759_v18 = vadd.f32 %v6020_v14, %v6184_v63  ;;  %v2810_v63 = vsel %vm1127_vm0, %v2462_v34, 0.0  ;;  %v2384_v40 = vmul.f32 %v5212_v35, %v6035_v1  ;;  %v6385_v35 = vld [vmem:[%s7187_s3] ss:$0 sm:$0xff] }
 0x15f   : > { %5225 = vtanh.f32 %v2154_v21  ;;  %v2813_v48 = vsel %vm1127_vm0, %v2463_v38, 0.0  ;;  %v6367_v17 = vpop.f32.mrf.mxu0  ;;  %v3001_v21 = vadd.s32 4294967288, %v6362_v20 }
 0x160   : > { %5227 = vtanh.f32 %v1759_v18  ;;  %v2576_v5 = vsel %vm1127_vm0, %v2384_v40, 0.0 }
 0x161   : > { %2559 = vadd.xlane.f32.xlu0 %v2558_v33  ;;  %v2573_v33 = vsel %vm1127_vm0, %v2383_v59, 0.0  ;;  %5229 = vtanh.f32 %v1764_v56  ;;  %v6377_v32 = vpop.f32.mrf.mxu0  ;;  %v6389_v38 = vsub.s32 %v3001_v21, %v5558_v6 }
 0x162   : > { %2562 = vadd.xlane.f32.xlu1 %v2561_v29  ;;  %v5214_v29 = vpop.eup %5213  ;;  %5231 = vtanh.f32 %v2159_v31 }
 0x163   : > { %v5216_v7 = vpop.eup %5215  ;;  %v2385_v54 = vmul.f32 %v5214_v29, %v6035_v1 }
 0x164   : > { %v5218_v60 = vpop.eup %5217 }
 0x165   : > { %2799 = vadd.xlane.f32.xlu0 %v2798_v9  ;;  %v2164_v9 = vadd.f32 %v4908_v26, %v6020_v14  ;;  %v2464_v14 = vmul.f32 %v5216_v7, %v6035_v1  ;;  %v5220_v0 = vpop.eup %5219  ;;  %v2465_v52 = vmul.f32 %v5218_v60, %v6035_v1 }
 0x166   : > { %2802 = vadd.xlane.f32.xlu1 %v2801_v30  ;;  %v6350_v30 = vld [vmem:[%s7186_s2] ss:$0 sm:$0xff]  ;;  %v2386_v13 = vmul.f32 %v5220_v0, %v6035_v1 }
 0x167   : > { %v1769_v62 = vadd.f32 %v6350_v30, %v6198_v24  ;;  %5233 = vtanh.f32 %v2164_v9  ;;  %v1774_v4 = vadd.f32 %v6350_v30, %v6190_v8  ;;  %v2816_v24 = vsel %vm1127_vm0, %v2464_v14, 0.0  ;;  %v6399_v9 = vpop.f32.mrf.mxu0 }
 0x168   : > { %v2169_v16 = vadd.f32 %v6350_v30, %v2168_v11  ;;  %v2174_v8 = vadd.f32 %v6350_v30, %v4911_v55  ;;  %v2819_v19 = vsel %vm1127_vm0, %v2465_v52, 0.0  ;;  %v1779_v59 = vadd.f32 %v6350_v30, %v6213_v41  ;;  %v2178_v41 = vpop.f32.mrf.mxu1 }
 0x169   : > { %2565 = vadd.xlane.f32.xlu0 %v2564_v45  ;;  %v2579_v45 = vsel %vm1127_vm0, %v2385_v54, 0.0  ;;  %5235 = vtanh.f32 %v1769_v62  ;;  %v1784_v34 = vadd.f32 %v6350_v30, %v6204_v27  ;;  %v2184_v29 = vadd.f32 %v6350_v30, %v4914_v2  ;;  %v6409_v11 = vpop.f32.mrf.mxu0 }
 0x16a   : > { %2568 = vadd.xlane.f32.xlu1 %v2567_v43  ;;  %v5222_v43 = vpop.eup %5221  ;;  %5237 = vtanh.f32 %v1774_v4  ;;  %v6394_v27 = vsub.s32 %v6362_v20, %v5558_v6  ;;  %v2179_v31 = vadd.f32 %v6350_v30, %v2178_v41  ;;  %v4917_v7 = vpop.f32.mrf.mxu1 }
 0x16b   : > { %v2387_v22 = vmul.f32 %v5222_v43, %v6035_v1  ;;  %5239 = vtanh.f32 %v2169_v16 }
 0x16c   : > { %5241 = vtanh.f32 %v2174_v8  ;;  %v2188_v52 = vpop.f32.mrf.mxu1 }
 0x16d   : > { %2805 = vadd.xlane.f32.xlu0 %v2804_v15  ;;  %v5224_v15 = vpop.eup %5223  ;;  %v2585_v18 = vsel %vm1127_vm0, %v2387_v22, 0.0  ;;  %5243 = vtanh.f32 %v1779_v59  ;;  %v2189_v21 = vadd.f32 %v6350_v30, %v2188_v52  ;;  %v6422_v59 = vpop.f32.mrf.mxu0 }
 0x16e   : > { %2808 = vadd.xlane.f32.xlu1 %v2807_v46  ;;  %v5226_v25 = vpop.eup %5225  ;;  %v2582_v46 = vsel %vm1127_vm0, %v2386_v13, 0.0  ;;  %v2466_v26 = vmul.f32 %v5224_v15, %v6035_v1  ;;  %5245 = vtanh.f32 %v1784_v34  ;;  %v1794_v13 = vadd.f32 %v6350_v30, %v6218_v51 }
 0x16f   : > { %5247 = vtanh.f32 %v2184_v29  ;;  %v1799_v29 = vadd.f32 %v6350_v30, %v6242_v61 }
 0x170   : > { %5249 = vtanh.f32 %v2179_v31 }
 0x171   : > { %2571 = vadd.xlane.f32.xlu0 %v2570_v58  ;;  %v5228_v58 = vpop.eup %5227 }
 0x172   : > { %2574 = vadd.xlane.f32.xlu1 %v2573_v33  ;;  %v2467_v33 = vmul.f32 %v6385_v35, %v5226_v25  ;;  %v5230_v56 = vpop.eup %5229  ;;  %v2388_v40 = vmul.f32 %v6385_v35, %v5228_v58 }
 0x173   : > { %v2389_v55 = vmul.f32 %v6385_v35, %v5230_v56 }
 0x174   : > { %v2825_v54 = vsel %vm1127_vm0, %v2467_v33, 0.0  ;;  %v2588_v0 = vsel %vm1127_vm0, %v2388_v40, 0.0 }
 0x175   : > { %2811 = vadd.xlane.f32.xlu0 %v2810_v63  ;;  %v2822_v63 = vsel %vm1127_vm0, %v2466_v26, 0.0  ;;  %v2591_v16 = vsel %vm1127_vm0, %v2389_v55, 0.0 }
 0x176   : > { %2814 = vadd.xlane.f32.xlu1 %v2813_v48  ;;  %v5232_v48 = vpop.eup %5231 }
 0x177   : > { %v5234_v60 = vpop.eup %5233  ;;  %v2468_v4 = vmul.f32 %v6385_v35, %v5232_v48  ;;  %v6435_v48 = vpop.f32.mrf.mxu0 }
 0x178   : > { %v5236_v43 = vpop.eup %5235  ;;  %v2469_v15 = vmul.f32 %v6385_v35, %v5234_v60 }
 0x179   : > { %2577 = vadd.xlane.f32.xlu0 %v2576_v5  ;;  %v5238_v8 = vpop.eup %5237  ;;  %v2390_v51 = vmul.f32 %v6385_v35, %v5236_v43  ;;  %v1809_v43 = vadd.f32 %v6350_v30, %v6260_v49 }
 0x17a   : > { %2580 = vadd.xlane.f32.xlu1 %v2579_v45  ;;  %v1789_v45 = vadd.f32 %v6350_v30, %v6228_v3  ;;  %v2194_v3 = vadd.f32 %v6350_v30, %v4917_v7  ;;  %v5240_v26 = vpop.eup %5239  ;;  %v2391_v34 = vmul.f32 %v6385_v35, %v5238_v8  ;;  %v6451_v8 = vpop.f32.mrf.mxu0 }
 0x17b   : > { %v5242_v33 = vpop.eup %5241  ;;  %v2594_v40 = vsel %vm1127_vm0, %v2390_v51, 0.0  ;;  %v2470_v7 = vmul.f32 %v6385_v35, %v5240_v26  ;;  %v1819_v51 = vadd.f32 %v6350_v30, %v6278_v53 }
 0x17c   : > { %5251 = vtanh.f32 %v1789_v45  ;;  %v2597_v60 = vsel %vm1127_vm0, %v2391_v34, 0.0  ;;  %v2471_v61 = vmul.f32 %v6385_v35, %v5242_v33 }
 0x17d   : > { %2817 = vadd.xlane.f32.xlu0 %v2816_v24  ;;  %5253 = vtanh.f32 %v1794_v13  ;;  %v2834_v13 = vsel %vm1127_vm0, %v2470_v7, 0.0 }
 0x17e   : > { %2820 = vadd.xlane.f32.xlu1 %v2819_v19  ;;  %5255 = vtanh.f32 %v2194_v3  ;;  %v1814_v3 = vadd.f32 %v6350_v30, %v6251_v37 }
 0x17f   : > { %5257 = vtanh.f32 %v2189_v21 }
 0x180   : > { %5259 = vtanh.f32 %v1799_v29 }
 0x181   : > { %2583 = vadd.xlane.f32.xlu0 %v2582_v46  ;;  %v2828_v46 = vsel %vm1127_vm0, %v2468_v4, 0.0 }
 0x182   : > { %2586 = vadd.xlane.f32.xlu1 %v2585_v18  ;;  %v2485_v1 = vpop.xlane.xlu0 %2484  ;;  %v2831_v18 = vsel %vm1127_vm0, %v2469_v15, 0.0 }
 0x183   : > { %v2725_v44 = vpop.xlane.xlu1 %2724  ;;  %v3005_v5 = vrot.slane %v2485_v1, %v6389_v38 }
 0x184   : > { %v3366_v22 = vrot.slane %v2725_v44, %v6389_v38 }
 0x185   : > { %2823 = vadd.xlane.f32.xlu0 %v2822_v63 }
 0x186   : > { %2826 = vadd.xlane.f32.xlu1 %v2825_v54  ;;  %v2482_v6 = vpop.xlane.xlu0 %2481  ;;  %v5244_v54 = vpop.eup %5243 }
 0x187   : > { %v3000_v62 = vrot.slane %v2482_v6, %v6394_v27  ;;  %v2491_v14 = vpop.xlane.xlu1 %2490  ;;  %v1804_v6 = vadd.f32 %v6350_v30, %v6233_v12  ;;  %v2392_v15 = vmul.f32 %v6385_v35, %v5244_v54 }
 0x188   : > { %v3015_v63 = vrot.slane %v2491_v14, %v6389_v38 }
 0x189   : > { %v3007_v24 = vsel %vm3006_vm1, %v3005_v5, %v3000_v62  ;;  %2589 = vadd.xlane.f32.xlu0 %v2588_v0  ;;  %v5246_v5 = vpop.eup %5245  ;;  %5261 = vtanh.f32 %v1804_v6  ;;  %v2600_v37 = vsel %vm1127_vm0, %v2392_v15, 0.0 }
 0x18a   : > { %2592 = vadd.xlane.f32.xlu1 %v2591_v16  ;;  %v2722_v19 = vpop.xlane.xlu0 %2721  ;;  %v5248_v12 = vpop.eup %5247  ;;  %v2393_v49 = vmul.f32 %v6385_v35, %v5246_v5  ;;  %5263 = vtanh.f32 %v1809_v43  ;;  %v1834_v5 = vadd.f32 %v6350_v30, %v6287_v28 }
 0x18b   : > { %v3362_v2 = vrot.slane %v2722_v19, %v6394_v27  ;;  %v2731_v25 = vpop.xlane.xlu1 %2730  ;;  %v5250_v19 = vpop.eup %5249  ;;  %5265 = vtanh.f32 %v1814_v3 }
 0x18c   : > { %v3375_v56 = vrot.slane %v2731_v25, %v6389_v38  ;;  %v5252_v34 = vpop.eup %5251  ;;  %v2603_v33 = vsel %vm1127_vm0, %v2393_v49, 0.0  ;;  %5267 = vtanh.f32 %v1819_v51 }
 0x18d   : > { %v3367_v58 = vsel %vm3006_vm1, %v3366_v22, %v3362_v2  ;;  %2829 = vadd.xlane.f32.xlu0 %v2828_v46  ;;  %v5254_v53 = vpop.eup %5253 }
 0x18e   : > { %2832 = vadd.xlane.f32.xlu1 %v2831_v18  ;;  %v2728_v41 = vpop.xlane.xlu0 %2727  ;;  %v6465_v18 = vpop.f32.mrf.mxu0 }
 0x18f   : > { %v3371_v1 = vrot.slane %v2728_v41, %v6394_v27  ;;  %v2488_v44 = vpop.xlane.xlu1 %2487  ;;  %v1824_v41 = vadd.f32 %v6350_v30, %v6269_v47  ;;  %v5256_v29 = vpop.eup %5255 }
 0x190   : > { %v3011_v31 = vrot.slane %v2488_v44, %v6394_v27  ;;  %v5258_v7 = vpop.eup %5257  ;;  %v6479_v6 = vpop.f32.mrf.mxu0 }
 0x191   : > { %v3376_v55 = vsel %vm3006_vm1, %v3375_v56, %v3371_v1  ;;  %2595 = vadd.xlane.f32.xlu0 %v2594_v40  ;;  %v2473_v56 = vmul.f32 %v6385_v35, %v5248_v12  ;;  %5269 = vtanh.f32 %v1824_v41  ;;  %v2474_v12 = vmul.f32 %v6385_v35, %v5258_v7 }
 0x192   : > { %v3617_v62 = vsel %vm3575_vm2, %v3376_v55, %v3367_v58  ;;  %v3016_v14 = vsel %vm3006_vm1, %v3015_v63, %v3011_v31  ;;  %2598 = vadd.xlane.f32.xlu1 %v2597_v60  ;;  %v2494_v0 = vpop.xlane.xlu0 %2493  ;;  %v2472_v58 = vmul.f32 %v6385_v35, %v5250_v19  ;;  %v1829_v55 = vadd.f32 %v6350_v30, %v6296_v39 }
 0x193   : > { %v3576_v45 = vsel %vm3575_vm2, %v3016_v14, %v3007_v24  ;;  %v3020_v4 = vrot.slane %v2494_v0, %v6394_v27  ;;  %v2497_v52 = vpop.xlane.xlu1 %2496  ;;  %v2837_v24 = vsel %vm1127_vm0, %v2471_v61, 0.0  ;;  %v2394_v60 = vmul.f32 %v6385_v35, %v5252_v34 }
 0x194   : > { %v3024_v16 = vrot.slane %v2497_v52, %v6389_v38  ;;  %v2840_v47 = vsel %vm1127_vm0, %v2472_v58, 0.0  ;;  %v2843_v61 = vsel %vm1127_vm0, %v2473_v56, 0.0  ;;  %v1839_v52 = vadd.f32 %v6350_v30, %v6314_v10 }
 0x195   : > { %2835 = vadd.xlane.f32.xlu0 %v2834_v13  ;;  %5271 = vtanh.f32 %v1829_v55  ;;  %v2606_v28 = vsel %vm1127_vm0, %v2394_v60, 0.0  ;;  %v5260_v13 = vpop.eup %5259  ;;  %v1844_v19 = vadd.f32 %v6350_v30, %v6305_v57  ;;  %v1849_v57 = vadd.f32 %v6350_v30, %v6332_v36 }
 0x196   : > { %v3025_v22 = vsel %vm3006_vm1, %v3024_v16, %v3020_v4  ;;  %2838 = vadd.xlane.f32.xlu1 %v2837_v24  ;;  %v2734_v2 = vpop.xlane.xlu0 %2733  ;;  %v6493_v16 = vpop.f32.mrf.mxu0  ;;  %5273 = vtanh.f32 %v1834_v5  ;;  %v2475_v24 = vmul.f32 %v6385_v35, %v5256_v29  ;;  %v2396_v51 = vmul.f32 %v6385_v35, %v5260_v13 }
 0x197   : > { %v3578_v25 = vsel %vm3577_vm3, %v3025_v22, %v3576_v45  ;;  %v3380_v21 = vrot.slane %v2734_v2, %v6394_v27  ;;  %v2737_v46 = vpop.xlane.xlu1 %2736  ;;  %v5262_v10 = vpop.eup %5261  ;;  %5275 = vtanh.f32 %v1839_v52  ;;  %v1854_v34 = vadd.f32 %v6350_v30, %v6323_v23 }
 0x198   : > { %v3384_v26 = vrot.slane %v2737_v46, %v6389_v38  ;;  %v2846_v46 = vsel %vm1127_vm0, %v2474_v12, 0.0  ;;  %5277 = vtanh.f32 %v1844_v19  ;;  %v2849_v58 = vsel %vm1127_vm0, %v2475_v24, 0.0 }
 0x199   : > { %2601 = vadd.xlane.f32.xlu0 %v2600_v37  ;;  %v5264_v37 = vpop.eup %5263  ;;  %v1859_v29 = vadd.f32 %v6350_v30, %v6355_v42  ;;  %5279 = vtanh.f32 %v1849_v57  ;;  %v2612_v23 = vsel %vm1127_vm0, %v2396_v51, 0.0 }
 0x19a   : > { %v3385_v1 = vsel %vm3006_vm1, %v3384_v26, %v3380_v21  ;;  %2604 = vadd.xlane.f32.xlu1 %v2603_v33  ;;  %v2500_v44 = vpop.xlane.xlu0 %2499  ;;  %v6507_v26 = vpop.f32.mrf.mxu0  ;;  %v2397_v33 = vmul.f32 %v6385_v35, %v5262_v10  ;;  %5281 = vtanh.f32 %v1854_v34 }
 0x19b   : > { %v3618_v63 = vsel %vm3577_vm3, %v3385_v1, %v3617_v62  ;;  %v2503_v31 = vpop.xlane.xlu1 %2502  ;;  %v3029_v40 = vrot.slane %v2500_v44, %v6394_v27  ;;  %v2395_v62 = vmul.f32 %v6385_v35, %v5254_v53  ;;  %v5266_v41 = vpop.eup %5265  ;;  %5283 = vtanh.f32 %v1859_v29 }
 0x19c   : > { %v3033_v54 = vrot.slane %v2503_v31, %v6389_v38  ;;  %v6521_v7 = vpop.f32.mrf.mxu0  ;;  %v2399_v55 = vmul.f32 %v6385_v35, %v5266_v41 }
 0x19d   : > { %2841 = vadd.xlane.f32.xlu0 %v2840_v47  ;;  %v2609_v15 = vsel %vm1127_vm0, %v2395_v62, 0.0  ;;  %v1864_v47 = vadd.f32 %v6350_v30, %v6341_v50 }
 0x19e   : > { %v3034_v14 = vsel %vm3006_vm1, %v3033_v54, %v3029_v40  ;;  %2844 = vadd.xlane.f32.xlu1 %v2843_v61  ;;  %v2740_v0 = vpop.xlane.xlu0 %2739  ;;  %v2398_v40 = vmul.f32 %v6385_v35, %v5264_v37  ;;  %v2615_v54 = vsel %vm1127_vm0, %v2397_v33, 0.0 }
 0x19f   : > { %v3580_v45 = vsel %vm3579_vm4, %v3034_v14, %v3578_v25  ;;  %v2743_v39 = vpop.xlane.xlu1 %2742  ;;  %v3389_v4 = vrot.slane %v2740_v0, %v6394_v27  ;;  %5285 = vtanh.f32 %v1864_v47  ;;  %v1899_v47 = vadd.f32 %v6350_v30, %v6465_v18 }
 0x1a0   : > { %v3393_v43 = vrot.slane %v2743_v39, %v6389_v38  ;;  %v2618_v50 = vsel %vm1127_vm0, %v2398_v40, 0.0  ;;  %v1869_v39 = vadd.f32 %v6350_v30, %v6377_v32 }
 0x1a1   : > { %2607 = vadd.xlane.f32.xlu0 %v2606_v28  ;;  %v1874_v28 = vadd.f32 %v6350_v30, %v6367_v17  ;;  %v1879_v17 = vadd.f32 %v6350_v30, %v6409_v11 }
 0x1a2   : > { %v3394_v3 = vsel %vm3006_vm1, %v3393_v43, %v3389_v4  ;;  %2610 = vadd.xlane.f32.xlu1 %v2609_v15  ;;  %v2506_v49 = vpop.xlane.xlu0 %2505  ;;  %v6535_v4 = vpop.f32.mrf.mxu0  ;;  %v2621_v43 = vsel %vm1127_vm0, %v2399_v55, 0.0  ;;  %5287 = vtanh.f32 %v1869_v39 }
 0x1a3   : > { %v3619_v22 = vsel %vm3579_vm4, %v3394_v3, %v3618_v63  ;;  %v2509_v2 = vpop.xlane.xlu1 %2508  ;;  %v3038_v25 = vrot.slane %v2506_v49, %v6394_v27  ;;  %v5268_v63 = vpop.eup %5267  ;;  %5289 = vtanh.f32 %v1874_v28  ;;  %v1914_v28 = vadd.f32 %v6350_v30, %v6479_v6 }
 0x1a4   : > { %v3042_v21 = vrot.slane %v2509_v2, %v6389_v38  ;;  %v5270_v42 = vpop.eup %5269  ;;  %v2400_v0 = vmul.f32 %v6385_v35, %v5268_v63  ;;  %5291 = vtanh.f32 %v1879_v17 }
 0x1a5   : > { %2847 = vadd.xlane.f32.xlu0 %v2846_v46  ;;  %v5272_v52 = vpop.eup %5271  ;;  %v2401_v12 = vmul.f32 %v6385_v35, %v5270_v42  ;;  %v1884_v46 = vadd.f32 %v6350_v30, %v6399_v9  ;;  %v1889_v9 = vadd.f32 %v6350_v30, %v6435_v48 }
 0x1a6   : > { %v3043_v56 = vsel %vm3006_vm1, %v3042_v21, %v3038_v25  ;;  %2850 = vadd.xlane.f32.xlu1 %v2849_v58  ;;  %v2746_v53 = vpop.xlane.xlu0 %2745  ;;  %v5274_v13 = vpop.eup %5273  ;;  %v2624_v10 = vsel %vm1127_vm0, %v2400_v0, 0.0  ;;  %v2402_v2 = vmul.f32 %v6385_v35, %v5272_v52 }
 0x1a7   : > { %v3582_v36 = vsel %vm3581_vm5, %v3043_v56, %v3580_v45  ;;  %v2749_v1 = vpop.xlane.xlu1 %2748  ;;  %v3398_v44 = vrot.slane %v2746_v53, %v6394_v27  ;;  %v5276_v49 = vpop.eup %5275  ;;  %v2627_v21 = vsel %vm1127_vm0, %v2401_v12, 0.0  ;;  %v2403_v57 = vmul.f32 %v6385_v35, %v5274_v13 }
 0x1a8   : > { %v3402_v31 = vrot.slane %v2749_v1, %v6389_v38  ;;  %v6551_v25 = vpop.f32.mrf.mxu0  ;;  %v5278_v51 = vpop.eup %5277  ;;  %v2404_v34 = vmul.f32 %v6385_v35, %v5276_v49  ;;  %v2630_v41 = vsel %vm1127_vm0, %v2402_v2, 0.0  ;;  %5293 = vtanh.f32 %v1884_v46 }
 0x1a9   : > { %2613 = vadd.xlane.f32.xlu0 %v2612_v23  ;;  %v5280_v53 = vpop.eup %5279  ;;  %v1894_v1 = vadd.f32 %v6350_v30, %v6422_v59  ;;  %5295 = vtanh.f32 %v1889_v9  ;;  %v1924_v2 = vadd.f32 %v6350_v30, %v6507_v26  ;;  %v1929_v26 = vadd.f32 %v6350_v30, %v6551_v25 }
 0x1aa   : > { %v3403_v60 = vsel %vm3006_vm1, %v3402_v31, %v3398_v44  ;;  %2616 = vadd.xlane.f32.xlu1 %v2615_v54  ;;  %v2512_v61 = vpop.xlane.xlu0 %2511  ;;  %v6567_v56 = vpop.f32.mrf.mxu0  ;;  %v2405_v44 = vmul.f32 %v6385_v35, %v5278_v51  ;;  %v2636_v48 = vsel %vm1127_vm0, %v2404_v34, 0.0  ;;  %v2406_v59 = vmul.f32 %v6385_v35, %v5280_v53 }
 0x1ab   : > { %v3620_v5 = vsel %vm3581_vm5, %v3403_v60, %v3619_v22  ;;  %v2515_v62 = vpop.xlane.xlu1 %2514  ;;  %v3047_v14 = vrot.slane %v2512_v61, %v6394_v27  ;;  %v5282_v29 = vpop.eup %5281  ;;  %5297 = vtanh.f32 %v1894_v1  ;;  %v1904_v60 = vadd.f32 %v6350_v30, %v6451_v8 }
 0x1ac   : > { %v3051_v45 = vrot.slane %v2515_v62, %v6389_v38  ;;  %v5284_v40 = vpop.eup %5283  ;;  %v6579_v55 = vpop.f32.mrf.mxu0  ;;  %v2639_v42 = vsel %vm1127_vm0, %v2405_v44, 0.0  ;;  %v2407_v61 = vmul.f32 %v6385_v35, %v5282_v29  ;;  %5299 = vtanh.f32 %v1899_v47 }
 0x1ad   : > { %2619 = vadd.xlane.f32.xlu0 %v2618_v50  ;;  %v2408_v0 = vmul.f32 %v6385_v35, %v5284_v40  ;;  %v2642_v50 = vsel %vm1127_vm0, %v2406_v59, 0.0  ;;  %v1909_v8 = vadd.f32 %v6350_v30, %v6493_v16  ;;  %5301 = vtanh.f32 %v1904_v60 }
 0x1ae   : > { %v3052_v15 = vsel %vm3006_vm1, %v3051_v45, %v3047_v14  ;;  %2622 = vadd.xlane.f32.xlu1 %v2621_v43  ;;  %v2752_v19 = vpop.xlane.xlu0 %2751  ;;  %v6595_v39 = vpop.f32.mrf.mxu0  ;;  %v2645_v43 = vsel %vm1127_vm0, %v2407_v61, 0.0 }
 0x1af   : > { %v2755_v24 = vpop.xlane.xlu1 %2754  ;;  %v3407_v32 = vrot.slane %v2752_v19, %v6394_v27  ;;  %v6545_v3 = vsel %vm3583_vm6, %v3052_v15, %v3582_v36  ;;  %v2633_v36 = vsel %vm1127_vm0, %v2403_v57, 0.0  ;;  %v2648_v16 = vsel %vm1127_vm0, %v2408_v0, 0.0  ;;  %v4920_v0 = vpop.f32.mrf.mxu1 }
 0x1b0   : > { %v3411_v22 = vrot.slane %v2755_v24, %v6389_v38  ;;  %5303 = vtanh.f32 %v1909_v8  ;;  %v1948_v6 = vpop.f32.mrf.mxu0 }
 0x1b1   : > { %2625 = vadd.xlane.f32.xlu0 %v2624_v10  ;;  %v1919_v10 = vadd.f32 %v6350_v30, %v6521_v7  ;;  %5305 = vtanh.f32 %v1914_v28  ;;  %v1949_v61 = vadd.f32 %v6350_v30, %v1948_v6 }
 0x1b2   : > { %v3412_v37 = vsel %vm3006_vm1, %v3411_v22, %v3407_v32  ;;  %2628 = vadd.xlane.f32.xlu1 %v2627_v21  ;;  %v6558_v58 = vpop.xlane.xlu0 %2517 }
 0x1b3   : > { %v6560_v11 = vpop.xlane.xlu1 %2520  ;;  %v3621_v33 = vsel %vm3583_vm6, %v3412_v37, %v3620_v5  ;;  %v5286_v5 = vpop.eup %5285  ;;  %5307 = vtanh.f32 %v1919_v10 }
 0x1b4   : > { %v5288_v52 = vpop.eup %5287  ;;  %v2409_v12 = vmul.f32 %v6385_v35, %v5286_v5  ;;  %5309 = vtanh.f32 %v1924_v2 }
 0x1b5   : > { %2631 = vadd.xlane.f32.xlu0 %v2630_v41  ;;  %v5290_v13 = vpop.eup %5289  ;;  %v2410_v49 = vmul.f32 %v6385_v35, %v5288_v52  ;;  %v4848_v41 = vpop.f32.mrf.mxu0  ;;  %5311 = vtanh.f32 %v1929_v26 }
 0x1b6   : > { %2634 = vadd.xlane.f32.xlu1 %v2633_v36  ;;  %v2758_v63 = vpop.xlane.xlu0 %2757  ;;  %v5292_v22 = vpop.eup %5291  ;;  %v2651_v17 = vsel %vm1127_vm0, %v2409_v12, 0.0  ;;  %v2411_v21 = vmul.f32 %v6385_v35, %v5290_v13  ;;  %v1934_v36 = vadd.f32 %v6350_v30, %v6535_v4  ;;  %v1964_v28 = vadd.f32 %v6350_v30, %v4848_v41 }
 0x1b7   : > { %v2761_v31 = vpop.xlane.xlu1 %2760  ;;  %v3416_v23 = vrot.slane %v2758_v63, %v6394_v27  ;;  %v5294_v46 = vpop.eup %5293  ;;  %v2654_v34 = vsel %vm1127_vm0, %v2410_v49, 0.0 }
 0x1b8   : > { %v3420_v54 = vrot.slane %v2761_v31, %v6389_v38  ;;  %v5296_v9 = vpop.eup %5295  ;;  %v2657_v53 = vsel %vm1127_vm0, %v2411_v21, 0.0  ;;  %v2413_v1 = vmul.f32 %v6385_v35, %v5294_v46  ;;  %v1939_v31 = vadd.f32 %v6350_v30, %v6579_v55 }
 0x1b9   : > { %2637 = vadd.xlane.f32.xlu0 %v2636_v48  ;;  %v5298_v44 = vpop.eup %5297  ;;  %v1958_v48 = vpop.f32.mrf.mxu0  ;;  %5313 = vtanh.f32 %v1934_v36 }
 0x1ba   : > { %v3421_v62 = vsel %vm3006_vm1, %v3420_v54, %v3416_v23  ;;  %2640 = vadd.xlane.f32.xlu1 %v2639_v42  ;;  %v6586_v14 = vpop.xlane.xlu0 %2523  ;;  %v2414_v23 = vmul.f32 %v6385_v35, %v5296_v9  ;;  %v5300_v40 = vpop.eup %5299  ;;  %v2663_v4 = vsel %vm1127_vm0, %v2413_v1, 0.0  ;;  %v1944_v54 = vadd.f32 %v6350_v30, %v6567_v56 }
 0x1bb   : > { %v6588_v18 = vpop.xlane.xlu1 %2526  ;;  %v3622_v45 = vsel %vm3585_vm7, %v3421_v62, %v3621_v33  ;;  %v2412_v33 = vmul.f32 %v6385_v35, %v5292_v22  ;;  %v2415_v47 = vmul.f32 %v6385_v35, %v5298_v44  ;;  %v5302_v59 = vpop.eup %5301  ;;  %5315 = vtanh.f32 %v1939_v31 }
 0x1bc   : > { %v2666_v55 = vsel %vm1127_vm0, %v2414_v23, 0.0  ;;  %v2416_v5 = vmul.f32 %v6385_v35, %v5300_v40  ;;  %v4851_v62 = vpop.f32.mrf.mxu0  ;;  %5317 = vtanh.f32 %v1944_v54  ;;  %v2417_v8 = vmul.f32 %v6385_v35, %v5302_v59 }
 0x1bd   : > { %2643 = vadd.xlane.f32.xlu0 %v2642_v50  ;;  %v2660_v25 = vsel %vm1127_vm0, %v2412_v33, 0.0  ;;  %v2669_v56 = vsel %vm1127_vm0, %v2415_v47, 0.0  ;;  %v1954_v50 = vadd.f32 %v6350_v30, %v6595_v39  ;;  %v1959_v13 = vadd.f32 %v6350_v30, %v1958_v48  ;;  %v2198_v39 = vpop.f32.mrf.mxu1 }
 0x1be   : > { %2646 = vadd.xlane.f32.xlu1 %v2645_v43  ;;  %v2764_v15 = vpop.xlane.xlu0 %2763  ;;  %5319 = vtanh.f32 %v1949_v61  ;;  %v1974_v22 = vadd.f32 %v6350_v30, %v4851_v62  ;;  %v2199_v1 = vadd.f32 %v6350_v30, %v2198_v39  ;;  %v2204_v23 = vadd.f32 %v6350_v30, %v4920_v0 }
 0x1bf   : > { %v2767_v19 = vpop.xlane.xlu1 %2766  ;;  %v3425_v24 = vrot.slane %v2764_v15, %v6394_v27  ;;  %v2672_v15 = vsel %vm1127_vm0, %v2416_v5, 0.0  ;;  %5321 = vtanh.f32 %v1954_v50 }
 0x1c0   : > { %v3429_v32 = vrot.slane %v2767_v19, %v6389_v38  ;;  %5323 = vtanh.f32 %v1964_v28 }
 0x1c1   : > { %2649 = vadd.xlane.f32.xlu0 %v2648_v16  ;;  %5325 = vtanh.f32 %v1959_v13 }
 0x1c2   : > { %2652 = vadd.xlane.f32.xlu1 %v2651_v17  ;;  %v6611_v57 = vpop.xlane.xlu0 %2529  ;;  %v3430_v7 = vsel %vm3006_vm1, %v3429_v32, %v3425_v24  ;;  %v1968_v24 = vpop.f32.mrf.mxu0  ;;  %v2675_v32 = vsel %vm1127_vm0, %v2417_v8, 0.0  ;;  %5327 = vtanh.f32 %v1974_v22 }
 0x1c3   : > { %v6614_v51 = vpop.xlane.xlu1 %2532  ;;  %v6617_v37 = vsel %vm3587_vm8, %v3430_v7, %v3622_v45  ;;  %v5304_v45 = vpop.eup %5303  ;;  %v1969_v2 = vadd.f32 %v6350_v30, %v1968_v24 }
 0x1c4   : > { %v5306_v52 = vpop.eup %5305  ;;  %v2418_v19 = vmul.f32 %v6385_v35, %v5304_v45  ;;  %v4923_v7 = vpop.f32.mrf.mxu1 }
 0x1c5   : > { %2655 = vadd.xlane.f32.xlu0 %v2654_v34  ;;  %v5308_v16 = vpop.eup %5307  ;;  %v2419_v10 = vmul.f32 %v6385_v35, %v5306_v52  ;;  %5329 = vtanh.f32 %v1969_v2  ;;  %v2214_v62 = vadd.f32 %v6350_v30, %v4923_v7 }
 0x1c6   : > { %2658 = vadd.xlane.f32.xlu1 %v2657_v53  ;;  %v6627_v29 = vpop.xlane.xlu0 %2769  ;;  %v5310_v49 = vpop.eup %5309  ;;  %v2678_v21 = vsel %vm1127_vm0, %v2418_v19, 0.0  ;;  %v2420_v46 = vmul.f32 %v6385_v35, %v5308_v16  ;;  %5331 = vtanh.f32 %v2199_v1 }
 0x1c7   : > { %v6629_v63 = vpop.xlane.xlu1 %2772  ;;  %v5312_v34 = vpop.eup %5311  ;;  %v2681_v26 = vsel %vm1127_vm0, %v2419_v10, 0.0  ;;  %v2421_v33 = vmul.f32 %v6385_v35, %v5310_v49  ;;  %5333 = vtanh.f32 %v2204_v23  ;;  %v3065_v23 = vrot.slane %v6586_v14, %v6394_v27 }
 0x1c8   : > { %v5314_v41 = vpop.eup %5313  ;;  %v2684_v36 = vsel %vm1127_vm0, %v2420_v46, 0.0  ;;  %v2422_v44 = vmul.f32 %v6385_v35, %v5312_v34 }
 0x1c9   : > { %2661 = vadd.xlane.f32.xlu0 %v2660_v25  ;;  %v2208_v25 = vpop.f32.mrf.mxu1  ;;  %v5316_v31 = vpop.eup %5315  ;;  %v2687_v48 = vsel %vm1127_vm0, %v2421_v33, 0.0  ;;  %v2423_v40 = vmul.f32 %v6385_v35, %v5314_v41  ;;  %v3060_v41 = vrot.slane %v6560_v11, %v6389_v38 }
 0x1ca   : > { %2664 = vadd.xlane.f32.xlu1 %v2663_v4  ;;  %v6639_v42 = vpop.xlane.xlu0 %2535  ;;  %v5318_v4 = vpop.eup %5317  ;;  %v2209_v59 = vadd.f32 %v6350_v30, %v2208_v25  ;;  %v2424_v61 = vmul.f32 %v6385_v35, %v5316_v31  ;;  %v3069_v31 = vrot.slane %v6588_v18, %v6389_v38 }
 0x1cb   : > { %v6641_v60 = vpop.xlane.xlu1 %2538  ;;  %v5320_v5 = vpop.eup %5319  ;;  %v2693_v0 = vsel %vm1127_vm0, %v2423_v40, 0.0  ;;  %v2425_v45 = vmul.f32 %v6385_v35, %v5318_v4 }
 0x1cc   : > { %5335 = vtanh.f32 %v2209_v59  ;;  %v2696_v13 = vsel %vm1127_vm0, %v2424_v61, 0.0 }
 0x1cd   : > { %2667 = vadd.xlane.f32.xlu0 %v2666_v55  ;;  %v2690_v55 = vsel %vm1127_vm0, %v2422_v44, 0.0  ;;  %5337 = vtanh.f32 %v2214_v62  ;;  %v2699_v19 = vsel %vm1127_vm0, %v2425_v45, 0.0 }
 0x1ce   : > { %2670 = vadd.xlane.f32.xlu1 %v2669_v56  ;;  %v6650_v43 = vpop.xlane.xlu0 %2775  ;;  %v5322_v56 = vpop.eup %5321 }
 0x1cf   : > { %v6653_v12 = vpop.xlane.xlu1 %2778  ;;  %v5324_v8 = vpop.eup %5323  ;;  %v2427_v30 = vmul.f32 %v6385_v35, %v5322_v56  ;;  %v3443_v44 = vrot.slane %v6650_v43, %v6394_v27  ;;  %v3434_v43 = vrot.slane %v6627_v29, %v6394_v27 }
 0x1d0   : > { %v5326_v28 = vpop.eup %5325  ;;  %v3447_v1 = vrot.slane %v6653_v12, %v6389_v38  ;;  %v3438_v12 = vrot.slane %v6629_v63, %v6389_v38 }
 0x1d1   : > { %2673 = vadd.xlane.f32.xlu0 %v2672_v15  ;;  %v2426_v15 = vmul.f32 %v6385_v35, %v5320_v5  ;;  %v5328_v39 = vpop.eup %5327  ;;  %v2428_v10 = vmul.f32 %v6385_v35, %v5326_v28  ;;  %v2705_v2 = vsel %vm1127_vm0, %v2427_v30, 0.0 }
 0x1d2   : > { %2676 = vadd.xlane.f32.xlu1 %v2675_v32  ;;  %v6660_v6 = vpop.xlane.xlu0 %2541  ;;  %v2429_v32 = vmul.f32 %v6385_v35, %v5324_v8  ;;  %v5330_v49 = vpop.eup %5329  ;;  %v3439_v56 = vsel %vm3006_vm1, %v3438_v12, %v3434_v43 }
 0x1d3   : > { %v6663_v17 = vpop.xlane.xlu1 %2544  ;;  %v2702_v22 = vsel %vm1127_vm0, %v2426_v15, 0.0  ;;  %v2708_v34 = vsel %vm1127_vm0, %v2428_v10, 0.0  ;;  %v2430_v33 = vmul.f32 %v6385_v35, %v5330_v49  ;;  %v5332_v25 = vpop.eup %5331 }
 0x1d4   : > { %v2711_v7 = vsel %vm1127_vm0, %v2429_v32, 0.0  ;;  %v2476_v29 = vmul.f32 %v6385_v35, %v5332_v25 }
 0x1d5   : > { %2679 = vadd.xlane.f32.xlu0 %v2678_v21  ;;  %v2714_v63 = vsel %vm1127_vm0, %v2430_v33, 0.0 }
 0x1d6   : > { %2682 = vadd.xlane.f32.xlu1 %v2681_v26  ;;  %v6670_v9 = vpop.xlane.xlu0 %2781  ;;  %v2431_v26 = vmul.f32 %v6385_v35, %v5328_v39  ;;  %v2852_v10 = vsel %vm1127_vm0, %v2476_v29, 0.0 }
 0x1d7   : > { %v6672_v53 = vpop.xlane.xlu1 %2784  ;;  %v3452_v11 = vrot.slane %v6670_v9, %v6394_v27 }
 0x1d8   : > { %v2717_v62 = vsel %vm1127_vm0, %v2431_v26, 0.0 }
 0x1d9   : > { %2685 = vadd.xlane.f32.xlu0 %v2684_v36  ;;  %v3056_v36 = vrot.slane %v6558_v58, %v6394_v27  ;;  %v5334_v58 = vpop.eup %5333 }
 0x1da   : > { %2688 = vadd.xlane.f32.xlu1 %v2687_v48  ;;  %v6680_v54 = vpop.xlane.xlu0 %2547  ;;  %v3456_v48 = vrot.slane %v6672_v53, %v6389_v38  ;;  %v5336_v59 = vpop.eup %5335 }
 0x1db   : > { %v6682_v47 = vpop.xlane.xlu1 %2550  ;;  %v3061_v61 = vsel %vm3006_vm1, %v3060_v41, %v3056_v36  ;;  %v5338_v45 = vpop.eup %5337  ;;  %v2478_v30 = vmul.f32 %v6385_v35, %v5336_v59  ;;  %v3096_v41 = vrot.slane %v6663_v17, %v6389_v38  ;;  %v3101_v17 = vrot.slane %v6680_v54, %v6394_v27 }
 0x1dc   : > { %v3457_v5 = vsel %vm3006_vm1, %v3456_v48, %v3452_v11  ;;  %v3586_v49 = vsel %vm3585_vm7, %v3061_v61, %v6545_v3  ;;  %v3105_v25 = vrot.slane %v6682_v47, %v6389_v38 }
 0x1dd   : > { %2691 = vadd.xlane.f32.xlu0 %v2690_v55  ;;  %v3448_v55 = vsel %vm3006_vm1, %v3447_v1, %v3443_v44  ;;  %v3074_v44 = vrot.slane %v6611_v57, %v6394_v27 }
 0x1de   : > { %2694 = vadd.xlane.f32.xlu1 %v2693_v0  ;;  %v2788_v50 = vpop.xlane.xlu0 %2787  ;;  %v2477_v0 = vmul.f32 %v6385_v35, %v5334_v58  ;;  %v3624_v28 = vsel %vm3575_vm2, %v3448_v55, %v3439_v56 }
 0x1df   : > { %v2791_v52 = vpop.xlane.xlu1 %2790  ;;  %v3461_v18 = vrot.slane %v2788_v50, %v6394_v27  ;;  %v3625_v39 = vsel %vm3577_vm3, %v3457_v5, %v3624_v28 }
 0x1e0   : > { %v3465_v40 = vrot.slane %v2791_v52, %v6389_v38  ;;  %v3070_v52 = vsel %vm3006_vm1, %v3069_v31, %v3065_v23 }
 0x1e1   : > { %2697 = vadd.xlane.f32.xlu0 %v2696_v13 }
 0x1e2   : > { %2700 = vadd.xlane.f32.xlu1 %v2699_v19  ;;  %v6694_v24 = vpop.xlane.xlu0 %2553  ;;  %v3466_v50 = vsel %vm3006_vm1, %v3465_v40, %v3461_v18  ;;  %v3106_v40 = vsel %vm3006_vm1, %v3105_v25, %v3101_v17 }
 0x1e3   : > { %v6696_v16 = vpop.xlane.xlu1 %2556  ;;  %v3110_v31 = vrot.slane %v6694_v24, %v6394_v27 }
 0x1e5   : > { %2703 = vadd.xlane.f32.xlu0 %v2702_v22  ;;  %v3626_v22 = vsel %vm3579_vm4, %v3466_v50, %v3625_v39 }
 0x1e6   : > { %2706 = vadd.xlane.f32.xlu1 %v2705_v2  ;;  %v2794_v21 = vpop.xlane.xlu0 %2793  ;;  %v2855_v2 = vsel %vm1127_vm0, %v2477_v0, 0.0 }
 0x1e7   : > { %v2797_v46 = vpop.xlane.xlu1 %2796  ;;  %v3470_v4 = vrot.slane %v2794_v21, %v6394_v27  ;;  %v2479_v21 = vmul.f32 %v6385_v35, %v5338_v45  ;;  %v3092_v35 = vrot.slane %v6660_v6, %v6394_v27  ;;  %v3114_v6 = vrot.slane %v6696_v16, %v6389_v38 }
 0x1e8   : > { %v3474_v53 = vrot.slane %v2797_v46, %v6389_v38  ;;  %v3588_v46 = vsel %vm3587_vm8, %v3070_v52, %v3586_v49 }
 0x1e9   : > { %2709 = vadd.xlane.f32.xlu0 %v2708_v34  ;;  %v3083_v34 = vrot.slane %v6639_v42, %v6394_v27  ;;  %v3078_v42 = vrot.slane %v6614_v51, %v6389_v38  ;;  %v2861_v23 = vsel %vm1127_vm0, %v2479_v21, 0.0  ;;  %v6785_v51 = vsel %vm2866_vm9, %v3588_v46, -1e+30 }
 0x1ea   : > { %2712 = vadd.xlane.f32.xlu1 %v2711_v7  ;;  %v6728_v14 = vpop.xlane.xlu0 %2559  ;;  %v3475_v13 = vsel %vm3006_vm1, %v3474_v53, %v3470_v4  ;;  %v3087_v7 = vrot.slane %v6641_v60, %v6389_v38  ;;  %v2858_v60 = vsel %vm1127_vm0, %v2478_v30, 0.0  ;;  %v3097_v48 = vsel %vm3006_vm1, %v3096_v41, %v3092_v35 }
 0x1eb   : > { %v6732_v9 = vpop.xlane.xlu1 %2562  ;;  %v3627_v26 = vsel %vm3581_vm5, %v3475_v13, %v3626_v22  ;;  %v3119_v54 = vrot.slane %v6728_v14, %v6394_v27  ;;  %v3079_v43 = vsel %vm3006_vm1, %v3078_v42, %v3074_v44  ;;  %v3655_v14 = vsel %vm3654_vm10, %v6785_v51, -inf }
 0x1ec   : > { %v3088_v57 = vsel %vm3006_vm1, %v3087_v7, %v3083_v34  ;;  %v3123_v47 = vrot.slane %v6732_v9, %v6389_v38  ;;  %v3115_v4 = vsel %vm3006_vm1, %v3114_v6, %v3110_v31 }
 0x1ed   : > { %2715 = vadd.xlane.f32.xlu0 %v2714_v63  ;;  %v3589_v53 = vsel %vm3575_vm2, %v3088_v57, %v3079_v43 }
 0x1ee   : > { %2718 = vadd.xlane.f32.xlu1 %v2717_v62  ;;  %v2800_v8 = vpop.xlane.xlu0 %2799  ;;  %v3590_v9 = vsel %vm3577_vm3, %v3097_v48, %v3589_v53  ;;  %v3124_v59 = vsel %vm3006_vm1, %v3123_v47, %v3119_v54 }
 0x1ef   : > { %v2803_v15 = vpop.xlane.xlu1 %2802  ;;  %v3479_v19 = vrot.slane %v2800_v8, %v6394_v27  ;;  %v3591_v29 = vsel %vm3579_vm4, %v3106_v40, %v3590_v9 }
 0x1f0   : > { %v3483_v32 = vrot.slane %v2803_v15, %v6389_v38  ;;  %v3592_v45 = vsel %vm3581_vm5, %v3115_v4, %v3591_v29 }
 0x1f1   : > { %2853 = vadd.xlane.f32.xlu0 %v2852_v10  ;;  %v3593_v50 = vsel %vm3583_vm6, %v3124_v59, %v3592_v45 }
 0x1f2   : > { %v3484_v33 = vsel %vm3006_vm1, %v3483_v32, %v3479_v19  ;;  %2856 = vadd.xlane.f32.xlu1 %v2855_v2  ;;  %v2566_v3 = vpop.xlane.xlu0 %2565 }
 0x1f3   : > { %v3628_v36 = vsel %vm3583_vm6, %v3484_v33, %v3627_v26  ;;  %v2569_v1 = vpop.xlane.xlu1 %2568  ;;  %v3128_v11 = vrot.slane %v2566_v3, %v6394_v27 }
 0x1f4   : > { %v3132_v24 = vrot.slane %v2569_v1, %v6389_v38 }
 0x1f5   : > { %2859 = vadd.xlane.f32.xlu0 %v2858_v60 }
 0x1f6   : > { %2862 = vadd.xlane.f32.xlu1 %v2861_v23  ;;  %v2806_v16 = vpop.xlane.xlu0 %2805  ;;  %v3133_v61 = vsel %vm3006_vm1, %v3132_v24, %v3128_v11 }
 0x1f7   : > { %v2809_v58 = vpop.xlane.xlu1 %2808  ;;  %v3488_v12 = vrot.slane %v2806_v16, %v6394_v27  ;;  %v3594_v28 = vsel %vm3585_vm7, %v3133_v61, %v3593_v50 }
 0x1f8   : > { %v3492_v18 = vrot.slane %v2809_v58, %v6389_v38 }
 0x1f9   : > { %3656 = vmax.xlane.f32.xlu0 %v3655_v14 }
 0x1fa   : > { %v3493_v55 = vsel %vm3006_vm1, %v3492_v18, %v3488_v12  ;;  %v2572_v63 = vpop.xlane.xlu0 %2571 }
 0x1fb   : > { %v2575_v5 = vpop.xlane.xlu1 %2574  ;;  %v3137_v62 = vrot.slane %v2572_v63, %v6394_v27  ;;  %v3629_v0 = vsel %vm3585_vm7, %v3493_v55, %v3628_v36 }
 0x1fc   : > { %v3141_v56 = vrot.slane %v2575_v5, %v6389_v38 }
 0x1fe   : > { %v3142_v8 = vsel %vm3006_vm1, %v3141_v56, %v3137_v62  ;;  %v2812_v52 = vpop.xlane.xlu0 %2811 }
 0x1ff   : > { %v2815_v13 = vpop.xlane.xlu1 %2814  ;;  %v3497_v15 = vrot.slane %v2812_v52, %v6394_v27  ;;  %v3595_v19 = vsel %vm3587_vm8, %v3142_v8, %v3594_v28 }
 0x200   : > { %v3501_v30 = vrot.slane %v2815_v13, %v6389_v38  ;;  %v6820_v39 = vsel %vm2866_vm9, %v3595_v19, -1e+30 }
 0x201   : > { %v3658_v32 = vsel %vm3654_vm10, %v6820_v39, -inf }
 0x202   : > { %v3502_v10 = vsel %vm3006_vm1, %v3501_v30, %v3497_v15  ;;  %3659 = vmax.xlane.f32.xlu1 %v3658_v32  ;;  %v6825_v49 = vpop.xlane.xlu0 %2577 }
 0x203   : > { %v6827_v22 = vpop.xlane.xlu1 %2580  ;;  %v6830_v2 = vsel %vm3587_vm8, %v3502_v10, %v3629_v0  ;;  %v3146_v0 = vrot.slane %v6825_v49, %v6394_v27 }
 0x204   : > { %v3150_v52 = vrot.slane %v6827_v22, %v6389_v38 }
 0x206   : > { %v2818_v21 = vpop.xlane.xlu0 %2817 }
 0x207   : > { %v2821_v46 = vpop.xlane.xlu1 %2820  ;;  %v3506_v7 = vrot.slane %v2818_v21, %v6394_v27 }
 0x208   : > { %v3510_v34 = vrot.slane %v2821_v46, %v6389_v38 }
 0x20a   : > { %v3511_v26 = vsel %vm3006_vm1, %v3510_v34, %v3506_v7  ;;  %v2584_v33 = vpop.xlane.xlu0 %2583 }
 0x20b   : > { %v2587_v3 = vpop.xlane.xlu1 %2586  ;;  %v3155_v5 = vrot.slane %v2584_v33, %v6394_v27  ;;  %v3151_v33 = vsel %vm3006_vm1, %v3150_v52, %v3146_v0 }
 0x20c   : > { %v3159_v61 = vrot.slane %v2587_v3, %v6389_v38 }
 0x20e   : > { %v2824_v41 = vpop.xlane.xlu0 %2823  ;;  %v3160_v32 = vsel %vm3006_vm1, %v3159_v61, %v3155_v5 }
 0x20f   : > { %v2827_v35 = vpop.xlane.xlu1 %2826  ;;  %v3515_v36 = vrot.slane %v2824_v41, %v6394_v27 }
 0x210   : > { %v3519_v1 = vrot.slane %v2827_v35, %v6389_v38  ;;  %v3596_v35 = vsel %vm3575_vm2, %v3160_v32, %v3151_v33 }
 0x212   : > { %v3520_v60 = vsel %vm3006_vm1, %v3519_v1, %v3515_v36  ;;  %v2590_v42 = vpop.xlane.xlu0 %2589 }
 0x213   : > { %v3631_v44 = vsel %vm3575_vm2, %v3520_v60, %v3511_v26  ;;  %v2593_v25 = vpop.xlane.xlu1 %2592  ;;  %v3164_v56 = vrot.slane %v2590_v42, %v6394_v27 }
 0x214   : > { %v3168_v45 = vrot.slane %v2593_v25, %v6389_v38 }
 0x216   : > { %v2830_v17 = vpop.xlane.xlu0 %2829  ;;  %v3169_v22 = vsel %vm3006_vm1, %v3168_v45, %v3164_v56 }
 0x217   : > { %v2833_v6 = vpop.xlane.xlu1 %2832  ;;  %v3524_v31 = vrot.slane %v2830_v17, %v6394_v27  ;;  %v3597_v1 = vsel %vm3577_vm3, %v3169_v22, %v3596_v35 }
 0x218   : > { %v3528_v23 = vrot.slane %v2833_v6, %v6389_v38 }
 0x21a   : > { %v3529_v57 = vsel %vm3006_vm1, %v3528_v23, %v3524_v31  ;;  %v2596_v47 = vpop.xlane.xlu0 %2595 }
 0x21b   : > { %v3632_v54 = vsel %vm3577_vm3, %v3529_v57, %v3631_v44  ;;  %v2599_v16 = vpop.xlane.xlu1 %2598  ;;  %v3173_v13 = vrot.slane %v2596_v47, %v6394_v27 }
 0x21c   : > { %v3177_v28 = vrot.slane %v2599_v16, %v6389_v38 }
 0x21e   : > { %v2836_v48 = vpop.xlane.xlu0 %2835  ;;  %v3178_v3 = vsel %vm3006_vm1, %v3177_v28, %v3173_v13 }
 0x21f   : > { %v2839_v24 = vpop.xlane.xlu1 %2838  ;;  %v3533_v11 = vrot.slane %v2836_v48, %v6394_v27  ;;  %v3598_v44 = vsel %vm3579_vm4, %v3178_v3, %v3597_v1 }
 0x220   : > { %v3537_v58 = vrot.slane %v2839_v24, %v6389_v38 }
 0x222   : > { %v3538_v12 = vsel %vm3006_vm1, %v3537_v58, %v3533_v11  ;;  %v2602_v43 = vpop.xlane.xlu0 %2601 }
 0x223   : > { %v3633_v40 = vsel %vm3579_vm4, %v3538_v12, %v3632_v54  ;;  %v2605_v18 = vpop.xlane.xlu1 %2604  ;;  %v3182_v30 = vrot.slane %v2602_v43, %v6394_v27 }
 0x224   : > { %v3186_v19 = vrot.slane %v2605_v18, %v6389_v38 }
 0x226   : > { %v2842_v14 = vpop.xlane.xlu0 %2841  ;;  %v3187_v36 = vsel %vm3006_vm1, %v3186_v19, %v3182_v30 }
 0x227   : > { %v2845_v53 = vpop.xlane.xlu1 %2844  ;;  %v3542_v4 = vrot.slane %v2842_v14, %v6394_v27  ;;  %v3599_v31 = vsel %vm3581_vm5, %v3187_v36, %v3598_v44 }
 0x228   : > { %v3546_v9 = vrot.slane %v2845_v53, %v6389_v38 }
 0x22a   : > { %v3547_v59 = vsel %vm3006_vm1, %v3546_v9, %v3542_v4  ;;  %v2608_v55 = vpop.xlane.xlu0 %2607 }
 0x22b   : > { %v3634_v63 = vsel %vm3581_vm5, %v3547_v59, %v3633_v40  ;;  %v2611_v29 = vpop.xlane.xlu1 %2610  ;;  %v3191_v49 = vrot.slane %v2608_v55, %v6394_v27 }
 0x22c   : > { %v3195_v10 = vrot.slane %v2611_v29, %v6389_v38 }
 0x22e   : > { %v2848_v62 = vpop.xlane.xlu0 %2847  ;;  %v3196_v60 = vsel %vm3006_vm1, %v3195_v10, %v3191_v49 }
 0x22f   : > { %v2851_v50 = vpop.xlane.xlu1 %2850  ;;  %v3551_v8 = vrot.slane %v2848_v62, %v6394_v27  ;;  %v3600_v57 = vsel %vm3583_vm6, %v3196_v60, %v3599_v31 }
 0x230   : > { %v3555_v15 = vrot.slane %v2851_v50, %v6389_v38 }
 0x232   : > { %v3556_v21 = vsel %vm3006_vm1, %v3555_v15, %v3551_v8  ;;  %v2614_v46 = vpop.xlane.xlu0 %2613 }
 0x233   : > { %v6871_v7 = vsel %vm3583_vm6, %v3556_v21, %v3634_v63  ;;  %v2617_v34 = vpop.xlane.xlu1 %2616  ;;  %v3200_v26 = vrot.slane %v2614_v46, %v6394_v27 }
 0x234   : > { %v3204_v41 = vrot.slane %v2617_v34, %v6389_v38 }
 0x236   : > { %v2620_v42 = vpop.xlane.xlu0 %2619  ;;  %v3205_v25 = vsel %vm3006_vm1, %v3204_v41, %v3200_v26 }
 0x237   : > { %v2623_v17 = vpop.xlane.xlu1 %2622  ;;  %v3209_v6 = vrot.slane %v2620_v42, %v6394_v27  ;;  %v3601_v16 = vsel %vm3585_vm7, %v3205_v25, %v3600_v57 }
 0x238   : > { %v3213_v23 = vrot.slane %v2623_v17, %v6389_v38 }
 0x23a   : > { %v3214_v47 = vsel %vm3006_vm1, %v3213_v23, %v3209_v6  ;;  %v2626_v54 = vpop.xlane.xlu0 %2625 }
 0x23b   : > { %v2629_v48 = vpop.xlane.xlu1 %2628  ;;  %v3602_v24 = vsel %vm3587_vm8, %v3214_v47, %v3601_v16  ;;  %v3218_v0 = vrot.slane %v2626_v54, %v6394_v27  ;;  %v6936_v54 = vsel %vm2866_vm9, %v6617_v37, -1e+30 }
 0x23c   : > { %v6892_v11 = vsel %vm2866_vm9, %v3602_v24, -1e+30  ;;  %v3222_v62 = vrot.slane %v2629_v48, %v6389_v38  ;;  %v3670_v48 = vsel %vm3654_vm10, %v6936_v54, -inf }
 0x23d   : > { %v3661_v58 = vsel %vm3654_vm10, %v6892_v11, -inf }
 0x23e   : > { %3662 = vmax.xlane.f32.xlu0 %v3661_v58  ;;  %v2632_v12 = vpop.xlane.xlu0 %2631  ;;  %v3223_v10 = vsel %vm3006_vm1, %v3222_v62, %v3218_v0 }
 0x23f   : > { %v2635_v43 = vpop.xlane.xlu1 %2634  ;;  %v3227_v55 = vrot.slane %v2632_v12, %v6394_v27 }
 0x240   : > { %v3231_v59 = vrot.slane %v2635_v43, %v6389_v38 }
 0x242   : > { %v2638_v40 = vpop.xlane.xlu0 %2637  ;;  %v3232_v52 = vsel %vm3006_vm1, %v3231_v59, %v3227_v55 }
 0x243   : > { %v2641_v18 = vpop.xlane.xlu1 %2640  ;;  %v3236_v61 = vrot.slane %v2638_v40, %v6394_v27  ;;  %v3603_v46 = vsel %vm3575_vm2, %v3232_v52, %v3223_v10 }
 0x244   : > { %v3240_v29 = vrot.slane %v2641_v18, %v6389_v38 }
 0x246   : > { %v2644_v14 = vpop.xlane.xlu0 %2643  ;;  %v3241_v19 = vsel %vm3006_vm1, %v3240_v29, %v3236_v61 }
 0x247   : > { %v2647_v53 = vpop.xlane.xlu1 %2646  ;;  %v3245_v56 = vrot.slane %v2644_v14, %v6394_v27  ;;  %v3604_v34 = vsel %vm3577_vm3, %v3241_v19, %v3603_v46 }
 0x248   : > { %v3249_v45 = vrot.slane %v2647_v53, %v6389_v38 }
 0x24a   : > { %v2650_v4 = vpop.xlane.xlu0 %2649  ;;  %v3250_v49 = vsel %vm3006_vm1, %v3249_v45, %v3245_v56 }
 0x24b   : > { %v2653_v9 = vpop.xlane.xlu1 %2652  ;;  %v3254_v8 = vrot.slane %v2650_v4, %v6394_v27  ;;  %v3605_v3 = vsel %vm3579_vm4, %v3250_v49, %v3604_v34 }
 0x24c   : > { %v3258_v50 = vrot.slane %v2653_v9, %v6389_v38 }
 0x24e   : > { %v2656_v63 = vpop.xlane.xlu0 %2655  ;;  %v3259_v22 = vsel %vm3006_vm1, %v3258_v50, %v3254_v8 }
 0x24f   : > { %v2659_v5 = vpop.xlane.xlu1 %2658  ;;  %v3263_v13 = vrot.slane %v2656_v63, %v6394_v27  ;;  %v3606_v1 = vsel %vm3581_vm5, %v3259_v22, %v3605_v3 }
 0x250   : > { %v3267_v28 = vrot.slane %v2659_v5, %v6389_v38 }
 0x252   : > { %v2662_v15 = vpop.xlane.xlu0 %2661  ;;  %v3268_v26 = vsel %vm3006_vm1, %v3267_v28, %v3263_v13 }
 0x253   : > { %v2665_v30 = vpop.xlane.xlu1 %2664  ;;  %v3272_v32 = vrot.slane %v2662_v15, %v6394_v27  ;;  %v3607_v42 = vsel %vm3583_vm6, %v3268_v26, %v3606_v1 }
 0x254   : > { %v3276_v21 = vrot.slane %v2665_v30, %v6389_v38 }
 0x256   : > { %v2668_v33 = vpop.xlane.xlu0 %2667  ;;  %v3277_v41 = vsel %vm3006_vm1, %v3276_v21, %v3272_v32 }
 0x257   : > { %v2671_v35 = vpop.xlane.xlu1 %2670  ;;  %v3281_v36 = vrot.slane %v2668_v33, %v6394_v27  ;;  %v3608_v17 = vsel %vm3585_vm7, %v3277_v41, %v3607_v42 }
 0x258   : > { %v3285_v60 = vrot.slane %v2671_v35, %v6389_v38 }
 0x25a   : > { %v3286_v44 = vsel %vm3006_vm1, %v3285_v60, %v3281_v36  ;;  %v2674_v25 = vpop.xlane.xlu0 %2673 }
 0x25b   : > { %v2677_v6 = vpop.xlane.xlu1 %2676  ;;  %v3609_v31 = vsel %vm3587_vm8, %v3286_v44, %v3608_v17  ;;  %v3290_v63 = vrot.slane %v2674_v25, %v6394_v27 }
 0x25c   : > { %v6929_v23 = vsel %vm2866_vm9, %v3609_v31, -1e+30  ;;  %v3294_v55 = vrot.slane %v2677_v6, %v6389_v38 }
 0x25d   : > { %v3664_v57 = vsel %vm3654_vm10, %v6929_v23, -inf }
 0x25e   : > { %3665 = vmax.xlane.f32.xlu1 %v3664_v57  ;;  %v2680_v47 = vpop.xlane.xlu0 %2679  ;;  %v3295_v13 = vsel %vm3006_vm1, %v3294_v55, %v3290_v63  ;;  %v3652_v57 = vsel %vm2866_vm9, %v6830_v2, -1e+30 }
 0x25f   : > { %v2683_v16 = vpop.xlane.xlu1 %2682  ;;  %v3299_v53 = vrot.slane %v2680_v47, %v6394_v27 }
 0x260   : > { %v3303_v14 = vrot.slane %v2683_v16, %v6389_v38 }
 0x262   : > { %3671 = vmax.xlane.f32.xlu1 %v3670_v48  ;;  %v2686_v24 = vpop.xlane.xlu0 %2685  ;;  %v3304_v0 = vsel %vm3006_vm1, %v3303_v14, %v3299_v53 }
 0x263   : > { %v2689_v58 = vpop.xlane.xlu1 %2688  ;;  %v3308_v37 = vrot.slane %v2686_v24, %v6394_v27  ;;  %v3610_v30 = vsel %vm3575_vm2, %v3304_v0, %v3295_v13 }
 0x264   : > { %v3312_v9 = vrot.slane %v2689_v58, %v6389_v38  ;;  %v3673_v58 = vsel %vm3654_vm10, %v3652_v57, -inf }
 0x266   : > { %v2692_v12 = vpop.xlane.xlu0 %2691  ;;  %v3313_v8 = vsel %vm3006_vm1, %v3312_v9, %v3308_v37 }
 0x267   : > { %v2695_v43 = vpop.xlane.xlu1 %2694  ;;  %v3317_v61 = vrot.slane %v2692_v12, %v6394_v27  ;;  %v3611_v10 = vsel %vm3577_vm3, %v3313_v8, %v3610_v30 }
 0x268   : > { %v3321_v29 = vrot.slane %v2695_v43, %v6389_v38 }
 0x26a   : > { %v2698_v40 = vpop.xlane.xlu0 %2697  ;;  %v3322_v15 = vsel %vm3006_vm1, %v3321_v29, %v3317_v61 }
 0x26b   : > { %v2701_v18 = vpop.xlane.xlu1 %2700  ;;  %v3326_v62 = vrot.slane %v2698_v40, %v6394_v27  ;;  %v3612_v46 = vsel %vm3579_vm4, %v3322_v15, %v3611_v10 }
 0x26c   : > { %v3330_v5 = vrot.slane %v2701_v18, %v6389_v38 }
 0x26e   : > { %v2704_v4 = vpop.xlane.xlu0 %2703  ;;  %v3331_v32 = vsel %vm3006_vm1, %v3330_v5, %v3326_v62 }
 0x26f   : > { %v2707_v59 = vpop.xlane.xlu1 %2706  ;;  %v3335_v56 = vrot.slane %v2704_v4, %v6394_v27  ;;  %v3613_v33 = vsel %vm3581_vm5, %v3331_v32, %v3612_v46 }
 0x270   : > { %v3339_v45 = vrot.slane %v2707_v59, %v6389_v38 }
 0x272   : > { %v2710_v50 = vpop.xlane.xlu0 %2709  ;;  %v3340_v49 = vsel %vm3006_vm1, %v3339_v45, %v3335_v56 }
 0x273   : > { %v2713_v52 = vpop.xlane.xlu1 %2712  ;;  %v3344_v28 = vrot.slane %v2710_v50, %v6394_v27  ;;  %v3614_v41 = vsel %vm3583_vm6, %v3340_v49, %v3613_v33 }
 0x274   : > { %v3348_v19 = vrot.slane %v2713_v52, %v6389_v38 }
 0x276   : > { %v2716_v21 = vpop.xlane.xlu0 %2715  ;;  %v3349_v22 = vsel %vm3006_vm1, %v3348_v19, %v3344_v28 }
 0x277   : > { %v2719_v34 = vpop.xlane.xlu1 %2718  ;;  %v3353_v26 = vrot.slane %v2716_v21, %v6394_v27  ;;  %v3615_v1 = vsel %vm3585_vm7, %v3349_v22, %v3614_v41 }
 0x278   : > { %v3357_v3 = vrot.slane %v2719_v34, %v6389_v38 }
 0x27a   : > { %v3358_v35 = vsel %vm3006_vm1, %v3357_v3, %v3353_v26  ;;  %v2854_v36 = vpop.xlane.xlu0 %2853 }
 0x27b   : > { %v2857_v60 = vpop.xlane.xlu1 %2856  ;;  %v3560_v42 = vrot.slane %v2854_v36, %v6394_v27  ;;  %v3616_v44 = vsel %vm3587_vm8, %v3358_v35, %v3615_v1  ;;  %v5389_v36 = vld [vmem:[%s5572_s29] sm:$0xff]  ;;  %v5390_v1 = vld [vmem:[%s5572_s29 + $0x8] sm:$0xff] }
 0x27c   : > { %v3564_v25 = vrot.slane %v2857_v60, %v6389_v38  ;;  %v3650_v17 = vsel %vm2866_vm9, %v3616_v44, -1e+30  ;;  %v5055_v60 = vpack.i.bf16 %v5390_v1, %v5389_v36 }
 0x27d   : > { %v3667_v6 = vsel %vm3654_vm10, %v3650_v17, -inf }
 0x27e   : > { %3668 = vmax.xlane.f32.xlu0 %v3667_v6  ;;  %v2860_v31 = vpop.xlane.xlu0 %2859  ;;  %v3565_v47 = vsel %vm3006_vm1, %v3564_v25, %v3560_v42  ;;  %v5391_v25 = vld [vmem:[%s5572_s29 + $0x18] sm:$0xff]  ;;  %v5393_v6 = vld [vmem:[%s5572_s29 + $0x28] sm:$0xff] }
 0x27f   : > { %v2863_v16 = vpop.xlane.xlu1 %2862  ;;  %v3569_v48 = vrot.slane %v2860_v31, %v6394_v27  ;;  %v3636_v40 = vsel %vm3585_vm7, %v3565_v47, %v6871_v7 }
 0x280   : > { %v3573_v24 = vrot.slane %v2863_v16, %v6389_v38 }
 0x282   : > { %v3574_v12 = vsel %vm3006_vm1, %v3573_v24, %v3569_v48  ;;  %3674 = vmax.xlane.f32.xlu0 %v3673_v58  ;;  %v3657_v43 = vpop.xlane.xlu0 %3656  ;;  %v5394_v48 = vld [vmem:[%s5572_s29 + $0x20] sm:$0xff]  ;;  %v5395_v58 = vld [vmem:[%s5572_s29 + $0x30] sm:$0xff] }
 0x283   : > { %v3679_v18 = vsub.f32 %v6785_v51, %v3657_v43  ;;  %v3637_v2 = vsel %vm3587_vm8, %v3574_v12, %v3636_v40  ;;  %v5065_v24 = vpack.i.bf16 %v5393_v6, %v5394_v48  ;;  %v5396_v12 = vld [vmem:[%s5572_s29 + $0x38] sm:$0xff] }
 0x284   : > { %v3653_v14 = vsel %vm2866_vm9, %v3637_v2, -1e+30  ;;  %v5070_v43 = vpack.i.bf16 %v5396_v12, %v5395_v58 }
 0x285   : > { %v3687_v53 = vmul.f32 1.442695, %v3679_v18  ;;  %v3676_v27 = vsel %vm3654_vm10, %v3653_v14, -inf }
 0x286   : > { %3677 = vmax.xlane.f32.xlu1 %v3676_v27 }
 0x287   : > { %5339 = vpow2.f32 %v3687_v53 }
 0x28b   : > { %v3660_v38 = vpop.xlane.xlu1 %3659 }
 0x28c   : > { %v3680_v4 = vsub.f32 %v6820_v39, %v3660_v38 }
 0x28e   : > { %v3689_v9 = vmul.f32 1.442695, %v3680_v4 }
 0x290   : > { %5341 = vpow2.f32 %v3689_v9 }
 0x294   : > { %v5340_v37 = vpop.eup %5339 }
 0x295   : > { %v3703_v7 = vsel %vm3654_vm10, %v5340_v37, 0.0 }
 0x296   : > { %3704 = vadd.xlane.f32.xlu0 %v3703_v7 }
 0x29d   : > { %v5342_v51 = vpop.eup %5341 }
 0x29e   : > { %v3706_v59 = vsel %vm3654_vm10, %v5342_v51, 0.0 }
 0x29f   : > { %3707 = vadd.xlane.f32.xlu1 %v3706_v59 }
 0x2c7   : > { %v3663_v20 = vpop.xlane.xlu0 %3662 }
 0x2c8   : > { %v3681_v55 = vsub.f32 %v6892_v11, %v3663_v20  ;;  %v4114_v20 = vld [vmem:[%s7188_s4 + $0x78] sm:$0xff] }
 0x2ca   : > { %v3691_v63 = vmul.f32 1.442695, %v3681_v55 }
 0x2cc   : > { %5343 = vpow2.f32 %v3691_v63 }
 0x2d9   : > { %v6995_v29 = vpop.eup %5343 }
 0x2da   : > { %v3709_v39 = vsel %vm3654_vm10, %v6995_v29, 0.0 }
 0x2db   : > { %3710 = vadd.xlane.f32.xlu0 %v3709_v39  ;;  %v4112_v39 = vld [vmem:[%s7188_s4 + $0x68] sm:$0xff] }
 0x2e7   : > { %v3666_v61 = vpop.xlane.xlu1 %3665 }
 0x2e8   : > { %v3682_v5 = vsub.f32 %v6929_v23, %v3666_v61  ;;  %v4111_v61 = vld [vmem:[%s7188_s4 + $0x60] sm:$0xff] }
 0x2ea   : > { %v3693_v62 = vmul.f32 1.442695, %v3682_v5  ;;  %v4110_v5 = vld [vmem:[%s7188_s4 + $0x58] sm:$0xff] }
 0x2eb   : > { %v3672_v0 = vpop.xlane.xlu1 %3671 }
 0x2ec   : > { %5345 = vpow2.f32 %v3693_v62  ;;  %v3684_v45 = vsub.f32 %v6936_v54, %v3672_v0  ;;  %v4109_v62 = vld [vmem:[%s7188_s4 + $0x50] sm:$0xff]  ;;  %v4108_v0 = vld [vmem:[%s7188_s4 + $0x48] sm:$0xff] }
 0x2ee   : > { %v3697_v56 = vmul.f32 1.442695, %v3684_v45  ;;  %v4107_v45 = vld [vmem:[%s7188_s4 + $0x40] sm:$0xff] }
 0x2f0   : > { %5347 = vpow2.f32 %v3697_v56  ;;  %v4106_v56 = vld [vmem:[%s7188_s4 + $0x38] sm:$0xff] }
 0x2f9   : > { %v7001_v50 = vpop.eup %5345 }
 0x2fa   : > { %v3712_v11 = vsel %vm3654_vm10, %v7001_v50, 0.0 }
 0x2fb   : > { %3713 = vadd.xlane.f32.xlu1 %v3712_v11  ;;  %v4104_v11 = vld [vmem:[%s7188_s4 + $0x28] sm:$0xff] }
 0x2fd   : > { %v7005_v8 = vpop.eup %5347 }
 0x2fe   : > { %v3718_v52 = vsel %vm3654_vm10, %v7005_v8, 0.0 }
 0x2ff   : > { %3719 = vadd.xlane.f32.xlu1 %v3718_v52  ;;  %v4102_v52 = vld [vmem:[%s7188_s4 + $0x18] sm:$0xff] }
 0x307   : > { %v3669_v23 = vpop.xlane.xlu0 %3668 }
 0x308   : > { %v3683_v28 = vsub.f32 %v3650_v17, %v3669_v23  ;;  %v5392_v17 = vld [vmem:[%s5572_s29 + $0x10] sm:$0xff] }
 0x309   : > { %v5060_v31 = vpack.i.bf16 %v5391_v25, %v5392_v17  ;;  %v4101_v23 = vld [vmem:[%s7188_s4 + $0x10] sm:$0xff] }
 0x30a   : > { %v3695_v13 = vmul.f32 1.442695, %v3683_v28  ;;  %v4100_v28 = vld [vmem:[%s7188_s4 + $0x8] sm:$0xff] }
 0x30b   : > { %v3675_v15 = vpop.xlane.xlu0 %3674 }
 0x30c   : > { %5349 = vpow2.f32 %v3695_v13  ;;  %v3685_v54 = vsub.f32 %v3652_v57, %v3675_v15  ;;  %v4099_v13 = vld [vmem:[%s7188_s4] sm:$0xff] }
 0x30e   : > { %v3699_v19 = vmul.f32 1.442695, %v3685_v54 }
 0x30f   : > { %v3678_v30 = vpop.xlane.xlu1 %3677 }
 0x310   : > { %5351 = vpow2.f32 %v3699_v19  ;;  %v3686_v32 = vsub.f32 %v3653_v14, %v3678_v30 }
 0x312   : > { %v3701_v10 = vmul.f32 1.442695, %v3686_v32 }
 0x314   : > { %5353 = vpow2.f32 %v3701_v10 }
 0x319   : > { %v7009_v49 = vpop.eup %5349 }
 0x31a   : > { %v3715_v21 = vsel %vm3654_vm10, %v7009_v49, 0.0 }
 0x31b   : > { %3716 = vadd.xlane.f32.xlu0 %v3715_v21 }
 0x31d   : > { %v7013_v46 = vpop.eup %5351 }
 0x31e   : > { %v3721_v22 = vsel %vm3654_vm10, %v7013_v46, 0.0 }
 0x31f   : > { %3722 = vadd.xlane.f32.xlu0 %v3721_v22  ;;  %v3705_v34 = vpop.xlane.xlu0 %3704 }
 0x320   : > { %5355 = vrcp.f32 %v3705_v34 }
 0x321   : > { %v7017_v26 = vpop.eup %5353 }
 0x322   : > { %v3724_v33 = vsel %vm3654_vm10, %v7017_v26, 0.0 }
 0x323   : > { %3725 = vadd.xlane.f32.xlu1 %v3724_v33 }
 0x328   : > { %v3708_v3 = vpop.xlane.xlu1 %3707 }
 0x329   : > { %5357 = vrcp.f32 %v3708_v3 }
 0x32d   : > { %v5356_v41 = vpop.eup %5355 }
 0x32e   : > { %v3735_v35 = vmul.f32 %v5356_v41, %v5340_v37 }
 0x330   : > { %4928 = vmatprep.mubr.msk.f32.mxu1 %vm3654_vm10, %v3735_v35 }
 0x334   : > { %5061 = vrot.lane.b32.xlu1 %v5060_v31, %s5460_s9 }
 0x335   : > { %5056 = vrot.lane.b32.xlu0 %v5055_v60, %s5460_s9 }
 0x336   : > { %v5358_v42 = vpop.eup %5357 }
 0x337   : > { %v3736_v44 = vmul.f32 %v5358_v42, %v5342_v51 }
 0x338   : > { %5066 = vrot.lane.b32.xlu1 %v5065_v24, %s5460_s9 }
 0x339   : > { %4929 = vmatmul.mubr.msk.f32.vlgmr.msra.gmra.mxu1 %vm3654_vm10, %v3736_v44 }
 0x33a   : > { %4932 = vmatpush3.msra.mxu1 %v5391_v25 }
 0x33b   : > { %4933 = vmatprep.subr.mxu1 %v5392_v17 }
 0x33c   : > { %4934 = vmatpush3.msra.mxu1 %v5392_v17  ;;  %5071 = vrot.lane.b32.xlu1 %v5070_v43, %s5460_s9  ;;  %s5401_s9 = sshll.u32 %s5461_s28, 4  ;;  %s5402_s9 = int_to_ptr.vmem [resolvable:$false] %s5401_s9 }
 0x33d   : > { %4938 = vmatprep.subr.mxu1 %v5393_v6  ;;  %s5403_s29 = scalar_lea.vmem %s5402_s9, 2048  ;;  %p5404_p0 = scmp.lt.s32.totalorder %s7136_s17, %s5402_s9 }
 0x33e   : > { %p5405_p1 = scmp.lt.s32.totalorder %s5403_s29, %s5397_s26 }
 0x340   : > { %p5406_p2 = por %p5405_p1, %p5404_p0 }
 0x342   : > { %p5407_p3 = pnand %p5406_p2, %p5400_p13 }
 0x364   : > { %v3711_v57 = vpop.xlane.xlu0 %3710 }
 0x365   : > { %5359 = vrcp.f32 %v3711_v57 }
 0x372   : > { %v5360_v47 = vpop.eup %5359 }
 0x373   : > { %v3737_v16 = vmul.f32 %v5360_v47, %v6995_v29  ;;  %v4113_v29 = vld [vmem:[%s7188_s4 + $0x70] sm:$0xff] }
 0x375   : > { %4935 = vmatprep.mubr.msk.f32.mxu1 %vm3654_vm10, %v3737_v16 }
 0x384   : > { %v3714_v40 = vpop.xlane.xlu1 %3713 }
 0x385   : > { %5361 = vrcp.f32 %v3714_v40 }
 0x388   : > { %v3720_v14 = vpop.xlane.xlu1 %3719 }
 0x389   : > { %5363 = vrcp.f32 %v3720_v14 }
 0x392   : > { %v5362_v18 = vpop.eup %5361 }
 0x393   : > { %v3738_v2 = vmul.f32 %v5362_v18, %v7001_v50  ;;  %v4105_v50 = vld [vmem:[%s7188_s4 + $0x30] sm:$0xff] }
 0x395   : > { %4936 = vmatmul.mubr.msk.f32.vlgmr.msra.gmra.mxu1 %vm3654_vm10, %v3738_v2 }
 0x396   : > { %4939 = vmatpush3.msra.mxu1 %v5393_v6  ;;  %v5364_v4 = vpop.eup %5363 }
 0x397   : > { %4940 = vmatprep.subr.mxu1 %v5394_v48  ;;  %v3740_v7 = vmul.f32 %v5364_v4, %v7005_v8  ;;  %v4103_v8 = vld [vmem:[%s7188_s4 + $0x20] sm:$0xff] }
 0x398   : > { %4941 = vmatpush3.msra.mxu1 %v5394_v48  ;;  %v7102_v48 = vld [vmem:[%s7189_s5] ss:$0 sm:$0xff] }
 0x399   : > { %4945 = vmatprep.subr.mxu1 %v5396_v12 }
 0x3a4   : > { %v3717_v53 = vpop.xlane.xlu0 %3716 }
 0x3a5   : > { %5365 = vrcp.f32 %v3717_v53 }
 0x3a8   : > { %v3723_v27 = vpop.xlane.xlu0 %3722 }
 0x3a9   : > { %5367 = vrcp.f32 %v3723_v27 }
 0x3ac   : > { %v3726_v38 = vpop.xlane.xlu1 %3725  ;;  %v5057_v15 = vpop.permute.xlu0 %5056 }
 0x3ad   : > { %5369 = vrcp.f32 %v3726_v38  ;;  %v5058_v54 = vunpack.i.l.bf16 %v5057_v15  ;;  %v5059_v19 = vunpack.i.h.bf16 %v5057_v15 }
 0x3b0   : > { %v5062_v21 = vpop.permute.xlu1 %5061 }
 0x3b1   : > { %v5064_v22 = vunpack.i.h.bf16 %v5062_v21 }
 0x3b2   : > { %v5366_v9 = vpop.eup %5365 }
 0x3b3   : > { %v3739_v37 = vmul.f32 %v5366_v9, %v7009_v49 }
 0x3b4   : > { %v5067_v41 = vpop.permute.xlu1 %5066 }
 0x3b5   : > { %4942 = vmatprep.mubr.msk.f32.mxu1 %vm3654_vm10, %v3739_v37  ;;  %v5068_v35 = vunpack.i.l.bf16 %v5067_v41  ;;  %v5069_v36 = vunpack.i.h.bf16 %v5067_v41 }
 0x3b6   : > { %v5368_v51 = vpop.eup %5367  ;;  %4943 = vmatmul.mubr.msk.f32.vlgmr.msra.gmra.mxu1 %vm3654_vm10, %v3740_v7 }
 0x3b7   : > { %4946 = vmatpush3.msra.mxu1 %v5396_v12  ;;  %v3741_v59 = vmul.f32 %v5368_v51, %v7013_v46  ;;  %v5063_v46 = vunpack.i.l.bf16 %v5062_v21 }
 0x3b8   : > { %4947 = vmatprep.subr.mxu1 %v5395_v58  ;;  %v5072_v44 = vpop.permute.xlu1 %5071 }
 0x3b9   : > { %4949 = vmatprep.mubr.msk.f32.mxu1 %vm3654_vm10, %v3741_v59  ;;  %4948 = vmatpush3.msra.mxu1 %v5395_v58  ;;  %v5073_v17 = vunpack.i.l.bf16 %v5072_v44  ;;  %v5074_v6 = vunpack.i.h.bf16 %v5072_v44 }
 0x3ba   : > { %v5370_v55 = vpop.eup %5369  ;;  %4952 = vmatprep.subr.mxu1 %v4114_v20 }
 0x3bb   : > { %v3742_v63 = vmul.f32 %v5370_v55, %v7017_v26 }
 0x3bd   : > { %4950 = vmatmul.mubr.msk.f32.vlgmr.msra.gmra.mxu1 %vm3654_vm10, %v3742_v63 }
 0x3be   : > { %4953 = vmatpush3.msra.mxu1 %v4114_v20 }
 0x3bf   : > { %4954 = vmatprep.subr.mxu1 %v4113_v29 }
 0x3c0   : > { %4955 = vmatpush3.msra.mxu1 %v4113_v29 }
 0x3c1   : > { %4956 = vmatprep.subr.mxu1 %v4112_v39 }
 0x3c2   : > { %4957 = vmatpush3.msra.mxu1 %v4112_v39 }
 0x3c3   : > { %4958 = vmatprep.subr.mxu1 %v4111_v61 }
 0x3c4   : > { %4959 = vmatpush3.msra.mxu1 %v4111_v61 }
 0x3c5   : > { %4960 = vmatprep.subr.mxu1 %v4110_v5 }
 0x3c6   : > { %4961 = vmatpush3.msra.mxu1 %v4110_v5 }
 0x3c7   : > { %4962 = vmatprep.subr.mxu1 %v4109_v62 }
 0x3c8   : > { %4963 = vmatpush3.msra.mxu1 %v4109_v62 }
 0x3c9   : > { %4964 = vmatprep.subr.mxu1 %v4108_v0 }
 0x3ca   : > { %4965 = vmatpush3.msra.mxu1 %v4108_v0 }
 0x3cb   : > { %4966 = vmatprep.subr.mxu1 %v4107_v45 }
 0x3cc   : > { %4967 = vmatpush3.msra.mxu1 %v4107_v45 }
 0x3cd   : > { %4968 = vmatprep.subr.mxu1 %v4106_v56 }
 0x3ce   : > { %4969 = vmatpush3.msra.mxu1 %v4106_v56 }
 0x3cf   : > { %4970 = vmatprep.subr.mxu1 %v4105_v50 }
 0x3d0   : > { %4971 = vmatpush3.msra.mxu1 %v4105_v50 }
 0x3d1   : > { %4972 = vmatprep.subr.mxu1 %v4104_v11 }
 0x3d2   : > { %4973 = vmatpush3.msra.mxu1 %v4104_v11 }
 0x3d3   : > { %4974 = vmatprep.subr.mxu1 %v4103_v8 }
 0x3d4   : > { %4975 = vmatpush3.msra.mxu1 %v4103_v8 }
 0x3d5   : > { %4976 = vmatprep.subr.mxu1 %v4102_v52 }
 0x3d6   : > { %4977 = vmatpush3.msra.mxu1 %v4102_v52 }
 0x3d7   : > { %4978 = vmatprep.subr.mxu1 %v4101_v23 }
 0x3d8   : > { %4979 = vmatpush3.msra.mxu1 %v4101_v23 }
 0x3d9   : > { %4980 = vmatprep.subr.mxu1 %v4100_v28 }
 0x3da   : > { %4981 = vmatpush3.msra.mxu1 %v4100_v28 }
 0x3db   : > { %4982 = vmatprep.subr.mxu1 %v4099_v13 }
 0x3dc   : > { %4983 = vmatpush3.msra.mxu1 %v4099_v13 }
 0x3f9   : > { %v4930_v30 = vpop.f32.mrf.mxu1 }
 0x3fa   : > { %v4092_v49 = vsel %vm1127_vm0, %v4930_v30, %v5059_v19 }
 0x3fb   : > { %v3815_v32 = vpop.f32.mrf.mxu1 }
 0x3fc   : > { %v4091_v10 = vsel %vm1127_vm0, %v3815_v32, %v5058_v54 }
 0x3fd   : > { %4984 = vmatprep.mubr.f32.mxu1 %v4091_v10 }
 0x3fe   : > { %4985 = vmatmul.mubr.f32.vlgmr.msra.gmra.mxu1 %v4092_v49 }
 0x455   : > { %v4937_v34 = vpop.f32.mrf.mxu1 }
 0x456   : > { %v4094_v3 = vsel %vm1127_vm0, %v4937_v34, %v5064_v22 }
 0x457   : > { %v3896_v26 = vpop.f32.mrf.mxu1 }
 0x458   : > { %v4093_v33 = vsel %vm1127_vm0, %v3896_v26, %v5063_v46 }
 0x459   : > { %4987 = vmatprep.mubr.f32.mxu1 %v4093_v33 }
 0x45a   : > { %4988 = vmatmul.mubr.f32.gmra.mxu1 %v4094_v3 }
 0x476   : > { %v4944_v1 = vpop.f32.mrf.mxu1 }
 0x477   : > { %v4096_v25 = vsel %vm1127_vm0, %v4944_v1, %v5069_v36 }
 0x478   : > { %v3977_v60 = vpop.f32.mrf.mxu1 }
 0x479   : > { %v4095_v42 = vsel %vm1127_vm0, %v3977_v60, %v5068_v35 }
 0x47a   : > { %4990 = vmatprep.mubr.f32.mxu1 %v4095_v42 }
 0x47b   : > { %4991 = vmatmul.mubr.f32.gmra.mxu1 %v4096_v25 }
 0x47d   : > { %v4951_v31 = vpop.f32.mrf.mxu1 }
 0x47e   : > { %v4098_v16 = vsel %vm1127_vm0, %v4951_v31, %v5074_v6 }
 0x47f   : > { %v4058_v57 = vpop.f32.mrf.mxu1 }
 0x480   : > { %v4097_v47 = vsel %vm1127_vm0, %v4058_v57, %v5073_v17 }
 0x481   : > { %4993 = vmatprep.mubr.f32.mxu1 %v4097_v47 }
 0x482   : > { %4994 = vmatmul.mubr.f32.gmra.mxu1 %v4098_v16 }
 0x4be   : > { %v4986_v24 = vpop.f32.mrf.mxu1 }
 0x4bf   : > { %v4194_v58 = vadd.f32 %v4986_v24, %v7102_v48 }
 0x4c0   : > { %v4188_v12 = vpop.f32.mrf.mxu1 }
 0x4c1   : > { %v4236_v43 = vmin.f32 %v4194_v58, 0.0  ;;  %v4189_v40 = vadd.f32 %v7102_v48, %v4188_v12  ;;  %vm4228_vm11 = vcmp.gt.f32.partialorder %v4194_v58, 0.0 }
 0x4c3   : > { %v4245_v18 = vmul.f32 1.442695, %v4236_v43  ;;  %v4235_v2 = vmin.f32 %v4189_v40, 0.0  ;;  %vm4227_vm12 = vcmp.gt.f32.partialorder %v4189_v40, 0.0 }
 0x4c5   : > { %5371 = vpow2.f32 %v4245_v18  ;;  %v4243_v14 = vmul.f32 1.442695, %v4235_v2 }
 0x4c7   : > { %5373 = vpow2.f32 %v4243_v14 }
 0x4d2   : > { %v5372_v53 = vpop.eup %5371 }
 0x4d3   : > { %v4524_v27 = vadd.f32 -1.0, %v5372_v53 }
 0x4d4   : > { %v5374_v38 = vpop.eup %5373 }
 0x4d5   : > { %v4268_v4 = vmul.f32 1.6732632, %v4524_v27  ;;  %v4523_v9 = vadd.f32 -1.0, %v5374_v38 }
 0x4d7   : > { %v4276_v37 = vsel %vm4228_vm11, %v4194_v58, %v4268_v4  ;;  %v4267_v7 = vmul.f32 1.6732632, %v4523_v9 }
 0x4d8   : > { %v4284_v51 = vmul.f32 1.050701, %v4276_v37 }
 0x4d9   : > { %v4275_v59 = vsel %vm4227_vm12, %v4189_v40, %v4267_v7 }
 0x4da   : > { %4292 = vst.msk [vmem:[%s7109_s15 + $0x8] sm:$0xff] %vm1127_vm0, %v4284_v51  ;;  %v4283_v20 = vmul.f32 1.050701, %v4275_v59 }
 0x4dc   : > { %4291 = vst.msk [vmem:[%s7109_s15] sm:$0xff] %vm1127_vm0, %v4283_v20 }
 0x51a   : > { %v4989_v55 = vpop.f32.mrf.mxu1 }
 0x51b   : > { %v4204_v63 = vadd.f32 %v4989_v55, %v7102_v48 }
 0x51c   : > { %v4198_v29 = vpop.f32.mrf.mxu1 }
 0x51d   : > { %v4238_v39 = vmin.f32 %v4204_v63, 0.0  ;;  %v4199_v61 = vadd.f32 %v7102_v48, %v4198_v29  ;;  %vm4230_vm13 = vcmp.gt.f32.partialorder %v4204_v63, 0.0 }
 0x51f   : > { %v4249_v5 = vmul.f32 1.442695, %v4238_v39  ;;  %v4237_v62 = vmin.f32 %v4199_v61, 0.0  ;;  %vm4229_vm14 = vcmp.gt.f32.partialorder %v4199_v61, 0.0 }
 0x521   : > { %5375 = vpow2.f32 %v4249_v5  ;;  %v4247_v0 = vmul.f32 1.442695, %v4237_v62 }
 0x523   : > { %5377 = vpow2.f32 %v4247_v0 }
 0x52e   : > { %v5376_v45 = vpop.eup %5375 }
 0x52f   : > { %v4526_v56 = vadd.f32 -1.0, %v5376_v45 }
 0x530   : > { %v5378_v50 = vpop.eup %5377 }
 0x531   : > { %v4270_v11 = vmul.f32 1.6732632, %v4526_v56  ;;  %v4525_v8 = vadd.f32 -1.0, %v5378_v50 }
 0x533   : > { %v4278_v52 = vsel %vm4230_vm13, %v4204_v63, %v4270_v11  ;;  %v4269_v23 = vmul.f32 1.6732632, %v4525_v8 }
 0x534   : > { %v4286_v28 = vmul.f32 1.050701, %v4278_v52 }
 0x535   : > { %v4277_v13 = vsel %vm4229_vm14, %v4199_v61, %v4269_v23 }
 0x536   : > { %4294 = vst.msk [vmem:[%s7109_s15 + $0x18] sm:$0xff] %vm1127_vm0, %v4286_v28  ;;  %v4285_v15 = vmul.f32 1.050701, %v4277_v13 }
 0x538   : > { %4293 = vst.msk [vmem:[%s7109_s15 + $0x10] sm:$0xff] %vm1127_vm0, %v4285_v15 }
 0x53b   : > { %v4992_v54 = vpop.f32.mrf.mxu1 }
 0x53c   : > { %v4214_v19 = vadd.f32 %v4992_v54, %v7102_v48 }
 0x53d   : > { %v4208_v30 = vpop.f32.mrf.mxu1 }
 0x53e   : > { %v4240_v32 = vmin.f32 %v4214_v19, 0.0  ;;  %v4209_v10 = vadd.f32 %v7102_v48, %v4208_v30  ;;  %vm4232_vm15 = vcmp.gt.f32.partialorder %v4214_v19, 0.0 }
 0x540   : > { %v4253_v49 = vmul.f32 1.442695, %v4240_v32  ;;  %v4239_v21 = vmin.f32 %v4209_v10, 0.0  ;;  %vm4231_vm1 = vcmp.gt.f32.partialorder %v4209_v10, 0.0 }
 0x542   : > { %5379 = vpow2.f32 %v4253_v49  ;;  %v4251_v46 = vmul.f32 1.442695, %v4239_v21  ;;  %v4995_v22 = vpop.f32.mrf.mxu1 }
 0x543   : > { %v4224_v34 = vadd.f32 %v4995_v22, %v7102_v48 }
 0x544   : > { %5381 = vpow2.f32 %v4251_v46  ;;  %v4218_v26 = vpop.f32.mrf.mxu1 }
 0x545   : > { %v4242_v33 = vmin.f32 %v4224_v34, 0.0  ;;  %v4219_v3 = vadd.f32 %v7102_v48, %v4218_v26  ;;  %vm4234_vm2 = vcmp.gt.f32.partialorder %v4224_v34, 0.0 }
 0x547   : > { %v4257_v41 = vmul.f32 1.442695, %v4242_v33  ;;  %v4241_v35 = vmin.f32 %v4219_v3, 0.0  ;;  %vm4233_vm3 = vcmp.gt.f32.partialorder %v4219_v3, 0.0 }
 0x549   : > { %5383 = vpow2.f32 %v4257_v41  ;;  %v4255_v36 = vmul.f32 1.442695, %v4241_v35 }
 0x54b   : > { %5385 = vpow2.f32 %v4255_v36 }
 0x54f   : > { %v5380_v1 = vpop.eup %5379 }
 0x550   : > { %v4528_v60 = vadd.f32 -1.0, %v5380_v1 }
 0x551   : > { %v5382_v42 = vpop.eup %5381 }
 0x552   : > { %v4272_v44 = vmul.f32 1.6732632, %v4528_v60  ;;  %v4527_v25 = vadd.f32 -1.0, %v5382_v42 }
 0x554   : > { %v4280_v17 = vsel %vm4232_vm15, %v4214_v19, %v4272_v44  ;;  %v4271_v6 = vmul.f32 1.6732632, %v4527_v25 }
 0x555   : > { %v4288_v31 = vmul.f32 1.050701, %v4280_v17 }
 0x556   : > { %v5384_v57 = vpop.eup %5383  ;;  %v4279_v47 = vsel %vm4231_vm1, %v4209_v10, %v4271_v6 }
 0x557   : > { %4296 = vst.msk [vmem:[%s7109_s15 + $0x28] sm:$0xff] %vm1127_vm0, %v4288_v31  ;;  %v4287_v16 = vmul.f32 1.050701, %v4279_v47  ;;  %v4530_v48 = vadd.f32 -1.0, %v5384_v57 }
 0x558   : > { %v5386_v24 = vpop.eup %5385 }
 0x559   : > { %4295 = vst.msk [vmem:[%s7109_s15 + $0x20] sm:$0xff] %vm1127_vm0, %v4287_v16  ;;  %v4274_v58 = vmul.f32 1.6732632, %v4530_v48  ;;  %v4529_v12 = vadd.f32 -1.0, %v5386_v24 }
 0x55b   : > { %v4282_v43 = vsel %vm4234_vm2, %v4224_v34, %v4274_v58  ;;  %v4273_v40 = vmul.f32 1.6732632, %v4529_v12 }
 0x55c   : > { %v4290_v18 = vmul.f32 1.050701, %v4282_v43 }
 0x55d   : > { %v4281_v2 = vsel %vm4233_vm3, %v4219_v3, %v4273_v40 }
 0x55e   : > { %4298 = vst.msk [vmem:[%s7109_s15 + $0x38] sm:$0xff] %vm1127_vm0, %v4290_v18  ;;  %v4289_v14 = vmul.f32 1.050701, %v4281_v2 }
 0x560   : > { %4297 = vst.msk [vmem:[%s7109_s15 + $0x30] sm:$0xff] %vm1127_vm0, %v4289_v14 }
 0x561   : > { %5410 = shalt.err (!%p5407_p3)
}
 0x562   : > { %s5411_s10 = scalar_lea.hbm %s7134_s20, 1024  ;;  %s5415_s13 = scalar_lea.hbm %s7190_s6, 2048 }
 0x563   : > { %p5412_p4 = scmp.ne.s32.totalorder %s7134_s20, %s5411_s10  ;;  %p5416_p9 = scmp.lt.s32.totalorder %s7134_s20, %s7190_s6 }
 0x564   : > { %p5417_p10 = scmp.lt.s32.totalorder %s5415_s13, %s5411_s10 }
 0x565   : > { %p5413_p7 = pnand %p5412_p4, %p5537_p5 }
 0x566   : > { %p5418_p11 = por %p5417_p10, %p5416_p9 }
 0x567   : > { %p5414_p8 = pneg %p5413_p7 }
 0x569   : > { %p5419_p12 = pnand %p5418_p11, %p5414_p8 }
 0x56b   : > { %5422 = shalt.err (!%p5419_p12)
}
 0x56c   : > { %s5462_s16 = smov 128   ;;  %s5463_s18 = smov 8  }
 0x56d   : > { %5012 = dma.vmem_to_hbm [thread:$0]  (%p5537_p5), %s7136_s17, 1024, %s7134_s20, %s7144_s25, %s5462_s16, %s5462_s16, %s5463_s18  }
 0x56e PF: > { %p5018_p13 = scmp.ge.s32.totalorder %s5457_s24, 2  ;;  %s4329_s19 = sand.u32 1, %s5445_s21  }
 0x56f   : > { %s4330_s26 = scalar_lea.sflag [#allocation3], %s4329_s19 }
 0x570   : > { %p5015_p0 = pnand %p5018_p13, %p5541_p6 }
 0x572   : > { %p5016_p1 = pneg %p5015_p0 }
 0x574   : > { %5440 = dma.done.wait (%p5016_p1), %s4330_s26, 1024  }
 0x575   : > { %5442 = vsyncadd (%p5016_p1), %s4330_s26, 4294966272  ;;  %p16_p2 = scmp.ge.s32.totalorder %s5524_s27, 4   ;;  %s7193_s21 = smov %s5449_s22 }
 0x576   : > { %s7194_s22 = smov %s5453_s23  ;;  %s7195_s23 = smov %s5535_s30 }
 0x577   : > { %s7196_s24 = smov %s5524_s27  ;;  %18 = sbr.rel (!%p16_p2) target bundleno = 3 (0x3), region = 79 }
 0x57c   :  { %4335 = vsyncpa [#allocation3], 1 }
 0x57d   :  { %4337 = vsyncpa [#allocation3 + $0x1], 1 }

</bundles_post_ra>
